<compile_context>
chip_gen: v5e
topology: v5e:2x2
jax: 0.10.0
libtpu: 0.0.40
codegen_flags: <defaults>
</compile_context>

<pallas_src>
import functools

import jax
import jax.numpy as jnp
from jax.experimental import pallas as pl
from jax.experimental.pallas import tpu as pltpu

N_IN = 4
HIDDEN = 512
N_OUT = 60 * 36            # 2160


def _round_up(n, m):
    return ((n + m - 1) // m) * m


def _intensity_mlp_kernel(x_ref, w1_ref, b1_ref, w2_ref, b2_ref, o_ref):
    # x: (tb, 4) f32        w1: (4, 512) f32     b1: (1, 512) f32
    # w2: (512, tn) bf16    b2: (1, tn) f32      o: (tb, tn) f32
    x = x_ref[...]
    w1 = w1_ref[...]
    # Layer 1 on the VPU: K=4 is far too shallow to be worth an MXU pass.
    h = x[:, 0:1] * w1[0:1, :]
    for k in range(1, N_IN):
        h += x[:, k:k + 1] * w1[k:k + 1, :]
    h = jnp.maximum(h + b1_ref[...], 0.0)                       # ReLU
    # Layer 2 on the MXU: bf16 operands, f32 accumulation.
    out = jnp.dot(h.astype(jnp.bfloat16), w2_ref[...],
                  preferred_element_type=jnp.float32)
    o_ref[...] = out + b2_ref[...]


def prepare_params(w1, b1, w2, b2):
    """One-time parameter prep (call OUTSIDE the per-step path): cast the big
    second-layer weight to bf16 (accumulation stays f32 in-kernel) and shape
    biases as (1, F) rows."""
    return (jnp.asarray(w1, jnp.float32).reshape(N_IN, HIDDEN),
            jnp.asarray(b1, jnp.float32).reshape(1, HIDDEN),
            jnp.asarray(w2, jnp.bfloat16).reshape(HIDDEN, N_OUT),
            jnp.asarray(b2, jnp.float32).reshape(1, N_OUT))


@functools.partial(jax.jit, static_argnames=("block_b", "block_n"))
def intensity_net_forward(x, w1, b1, w2, b2, *, block_b=512, block_n=1152):
    """IntensityNet forward: x (B, 4) f32 -> (B, 1, 60, 36) f32.

    Expects parameters already run through `prepare_params` (w2 in bf16)."""
    B = x.shape[0]
    b_pad = _round_up(B, 8)                 # sublane alignment only
    if b_pad != B:
        x = jnp.pad(x, ((0, b_pad - B), (0, 0)))
    tb = min(_round_up(block_b, 8), b_pad)  # batch tile (multiple of 8)
    tn = block_n                            # output-feature tile (9*128)
    n_bt = pl.cdiv(b_pad, tb)
    n_nt = pl.cdiv(N_OUT, tn)

    flops = 2 * (n_bt * tb) * (N_IN * HIDDEN + HIDDEN * (n_nt * tn))
    bytes_accessed = (x.size * 4 + w1.size * 4 + b1.size * 4
                      + w2.size * 2 + b2.size * 4 + b_pad * N_OUT * 4)

    out = pl.pallas_call(
        _intensity_mlp_kernel,
        out_shape=jax.ShapeDtypeStruct((b_pad, N_OUT), jnp.float32),
        # Output-feature tiles on the OUTER axis: w2 changes only when the
        # outer index changes, so it is streamed from HBM once per call while
        # batch tiles pipeline underneath.  Both axes are independent
        # ("parallel"), so v7x's two TensorCores split the work even at a
        # single batch tile.
        grid=(n_nt, n_bt),
        in_specs=[
            pl.BlockSpec((tb, N_IN), lambda j, i: (i, 0)),
            pl.BlockSpec((N_IN, HIDDEN), lambda j, i: (0, 0),
                         pipeline_mode=pl.Buffered(1)),
            pl.BlockSpec((1, HIDDEN), lambda j, i: (0, 0),
                         pipeline_mode=pl.Buffered(1)),
            pl.BlockSpec((HIDDEN, tn), lambda j, i: (0, j)),
            pl.BlockSpec((1, tn), lambda j, i: (0, j)),
        ],
        out_specs=pl.BlockSpec((tb, tn), lambda j, i: (i, j)),
        compiler_params=pltpu.CompilerParams(
            dimension_semantics=("parallel", "parallel"),
            vmem_limit_bytes=32 * 1024 * 1024,   # headroom for larger tb; < physical on all gens
        ),
        cost_estimate=pl.CostEstimate(
            flops=flops, transcendentals=0, bytes_accessed=bytes_accessed),
    )(x, w1, b1, w2, b2)

    # TODO(synk): for repeated per-step inference, keep the bf16 w2 VMEM-resident
    # across calls (cross-pallas_call semaphore/VMEM futures, has_side_effects)
    # or fuse this MLP into the caller's kernel instead of re-streaming 2.2 MB.
    # TODO(synk): optional bf16 output dtype / fp8 (e4m3) w2 on v7x if the
    # consumer's accuracy budget allows.

    if b_pad != B:
        out = out[:B]          # drop only the zero-padded sublane rows
    return out.reshape(B, 1, 60, 36)


def init_params(key):
    """nn.Linear-style U(-1/sqrt(fan_in), 1/sqrt(fan_in)) init; weights stored
    as (in, out) so the kernel computes x @ W."""
    k1, k2, k3, k4 = jax.random.split(key, 4)
    bound1 = 1.0 / jnp.sqrt(4.0)
    bound2 = 1.0 / jnp.sqrt(512.0)
    w1 = jax.random.uniform(k1, (N_IN, HIDDEN), jnp.float32, -bound1, bound1)
    b1 = jax.random.uniform(k2, (1, HIDDEN), jnp.float32, -bound1, bound1)
    w2 = jax.random.uniform(k3, (HIDDEN, N_OUT), jnp.float32, -bound2, bound2)
    b2 = jax.random.uniform(k4, (1, N_OUT), jnp.float32, -bound2, bound2)
    return w1, b1, w2, b2


if __name__ == "__main__":
    key = jax.random.PRNGKey(0)
    kx, kp = jax.random.split(key)
    w1, b1, w2, b2 = init_params(kp)

    # One-time prep, hoisted out of the per-call path.
    params = prepare_params(w1, b1, w2, b2)

    ok = True
    for B in (8, 3):   # B=3 exercises the sublane-padding / trailing-slice path
        x = jax.random.normal(jax.random.fold_in(kx, B), (B, N_IN), jnp.float32)
        out = jax.block_until_ready(intensity_net_forward(x, *params))

        # Plain-JAX f32 reference; tolerance loosened for the bf16 second-layer
        # weights/activations (accumulation is f32, error stays ~1e-3..1e-2).
        ref = (jnp.maximum(x @ w1 + b1, 0.0) @ w2 + b2).reshape(B, 1, 60, 36)
        ok &= out.shape == (B, 1, 60, 36)
        ok &= bool(jnp.allclose(out, ref, atol=2e-2, rtol=2e-2))

    assert ok
    print("KERNEL_OK")
</pallas_src>

<mosaic_0001>
module attributes {stable_mosaic.version = 11 : i64} {
  func.func @_intensity_mlp_kernel(%arg0: i32, %arg1: i32, %arg2: memref<8x4xf32, #tpu.memory_space<vmem>>, %arg3: memref<4x512xf32, #tpu.memory_space<vmem>>, %arg4: memref<1x512xf32, #tpu.memory_space<vmem>>, %arg5: memref<512x1152xbf16, #tpu.memory_space<vmem>>, %arg6: memref<1x1152xf32, #tpu.memory_space<vmem>>, %arg7: memref<8x1152xf32, #tpu.memory_space<vmem>>) attributes {dimension_semantics = [#tpu.dimension_semantics<parallel>, #tpu.dimension_semantics<parallel>], iteration_bounds = array<i64: 2, 1>, scalar_prefetch = 0 : i64, scratch_operands = 0 : i64, tpu.core_type = #tpu.core_type<tc>, window_params = [{transform_indices = @transform_0, window_bounds = array<i64: 8, 4>}, {pipeline_mode = #tpu.pipeline_mode<synchronous>, transform_indices = @transform_1, window_bounds = array<i64: 4, 512>}, {pipeline_mode = #tpu.pipeline_mode<synchronous>, transform_indices = @transform_2, window_bounds = array<i64: 1, 512>}, {transform_indices = @transform_3, window_bounds = array<i64: 512, 1152>}, {transform_indices = @transform_4, window_bounds = array<i64: 1, 1152>}, {transform_indices = @transform_5, window_bounds = array<i64: 8, 1152>}]} {
    %c0 = arith.constant 0 : index
    %c0_0 = arith.constant 0 : index
    %0 = vector.load %arg2[%c0, %c0_0] : memref<8x4xf32, #tpu.memory_space<vmem>>, vector<8x4xf32>
    %c0_1 = arith.constant 0 : index
    %c0_2 = arith.constant 0 : index
    %1 = vector.load %arg3[%c0_1, %c0_2] : memref<4x512xf32, #tpu.memory_space<vmem>>, vector<4x512xf32>
    %2 = vector.extract_strided_slice %0 {offsets = [0, 0], sizes = [8, 1], strides = [1, 1]} : vector<8x4xf32> to vector<8x1xf32>
    %3 = vector.extract_strided_slice %1 {offsets = [0, 0], sizes = [1, 512], strides = [1, 1]} : vector<4x512xf32> to vector<1x512xf32>
    %4 = vector.broadcast %2 : vector<8x1xf32> to vector<8x512xf32>
    %5 = vector.broadcast %3 : vector<1x512xf32> to vector<8x512xf32>
    %6 = arith.mulf %4, %5 : vector<8x512xf32>
    %7 = vector.extract_strided_slice %0 {offsets = [0, 1], sizes = [8, 1], strides = [1, 1]} : vector<8x4xf32> to vector<8x1xf32>
    %8 = vector.extract_strided_slice %1 {offsets = [1, 0], sizes = [1, 512], strides = [1, 1]} : vector<4x512xf32> to vector<1x512xf32>
    %9 = vector.broadcast %7 : vector<8x1xf32> to vector<8x512xf32>
    %10 = vector.broadcast %8 : vector<1x512xf32> to vector<8x512xf32>
    %11 = arith.mulf %9, %10 : vector<8x512xf32>
    %12 = arith.addf %6, %11 : vector<8x512xf32>
    %13 = vector.extract_strided_slice %0 {offsets = [0, 2], sizes = [8, 1], strides = [1, 1]} : vector<8x4xf32> to vector<8x1xf32>
    %14 = vector.extract_strided_slice %1 {offsets = [2, 0], sizes = [1, 512], strides = [1, 1]} : vector<4x512xf32> to vector<1x512xf32>
    %15 = vector.broadcast %13 : vector<8x1xf32> to vector<8x512xf32>
    %16 = vector.broadcast %14 : vector<1x512xf32> to vector<8x512xf32>
    %17 = arith.mulf %15, %16 : vector<8x512xf32>
    %18 = arith.addf %12, %17 : vector<8x512xf32>
    %19 = vector.extract_strided_slice %0 {offsets = [0, 3], sizes = [8, 1], strides = [1, 1]} : vector<8x4xf32> to vector<8x1xf32>
    %20 = vector.extract_strided_slice %1 {offsets = [3, 0], sizes = [1, 512], strides = [1, 1]} : vector<4x512xf32> to vector<1x512xf32>
    %21 = vector.broadcast %19 : vector<8x1xf32> to vector<8x512xf32>
    %22 = vector.broadcast %20 : vector<1x512xf32> to vector<8x512xf32>
    %23 = arith.mulf %21, %22 : vector<8x512xf32>
    %24 = arith.addf %18, %23 : vector<8x512xf32>
    %c0_3 = arith.constant 0 : index
    %c0_4 = arith.constant 0 : index
    %25 = vector.load %arg4[%c0_3, %c0_4] : memref<1x512xf32, #tpu.memory_space<vmem>>, vector<1x512xf32>
    %26 = vector.broadcast %25 : vector<1x512xf32> to vector<8x512xf32>
    %27 = arith.addf %24, %26 : vector<8x512xf32>
    %cst = arith.constant 0.000000e+00 : f32
    %28 = vector.broadcast %cst : f32 to vector<8x512xf32>
    %29 = arith.maximumf %27, %28 : vector<8x512xf32>
    %30 = arith.truncf %29 : vector<8x512xf32> to vector<8x512xbf16>
    %c0_5 = arith.constant 0 : index
    %c0_6 = arith.constant 0 : index
    %31 = vector.load %arg5[%c0_5, %c0_6] : memref<512x1152xbf16, #tpu.memory_space<vmem>>, vector<512x1152xbf16>
    %cst_7 = arith.constant dense<0.000000e+00> : vector<8x1152xf32>
    %32 = tpu.matmul %30, %31, %cst_7 {dimension_numbers = #tpu.dot_dimension_numbers<[1], [0], [0], [1], [0, 0, 1, 1], [], []>} : vector<8x512xbf16>, vector<512x1152xbf16>, vector<8x1152xf32> -> vector<8x1152xf32>
    %c0_8 = arith.constant 0 : index
    %c0_9 = arith.constant 0 : index
    %33 = vector.load %arg6[%c0_8, %c0_9] : memref<1x1152xf32, #tpu.memory_space<vmem>>, vector<1x1152xf32>
    %34 = vector.broadcast %33 : vector<1x1152xf32> to vector<8x1152xf32>
    %35 = arith.addf %32, %34 : vector<8x1152xf32>
    %c0_10 = arith.constant 0 : index
    %c0_11 = arith.constant 0 : index
    %36 = vector.load %arg7[%c0_10, %c0_11] : memref<8x1152xf32, #tpu.memory_space<vmem>>, vector<8x1152xf32>
    tpu.vector_store %arg7[%c0_10, %c0_11], %35 {strides = array<i32>} : memref<8x1152xf32, #tpu.memory_space<vmem>>, vector<8x1152xf32>,
    return
  }
  func.func @transform_0(%arg0: i32, %arg1: i32) -> (i32, i32) {
    %c0_i32 = arith.constant 0 : i32
    %c0_i32_0 = arith.constant 0 : i32
    return %arg1, %c0_i32 : i32, i32
  }
  func.func @transform_1(%arg0: i32, %arg1: i32) -> (i32, i32) {
    %c0_i32 = arith.constant 0 : i32
    %c0_i32_0 = arith.constant 0 : i32
    %c0_i32_1 = arith.constant 0 : i32
    return %c0_i32, %c0_i32_0 : i32, i32
  }
  func.func @transform_2(%arg0: i32, %arg1: i32) -> (i32, i32) {
    %c0_i32 = arith.constant 0 : i32
    %c0_i32_0 = arith.constant 0 : i32
    %c0_i32_1 = arith.constant 0 : i32
    return %c0_i32, %c0_i32_0 : i32, i32
  }
  func.func @transform_3(%arg0: i32, %arg1: i32) -> (i32, i32) {
    %c0_i32 = arith.constant 0 : i32
    %c0_i32_0 = arith.constant 0 : i32
    return %c0_i32, %arg0 : i32, i32
  }
  func.func @transform_4(%arg0: i32, %arg1: i32) -> (i32, i32) {
    %c0_i32 = arith.constant 0 : i32
    %c0_i32_0 = arith.constant 0 : i32
    return %c0_i32, %arg0 : i32, i32
  }
  func.func @transform_5(%arg0: i32, %arg1: i32) -> (i32, i32) {
    %c0_i32 = arith.constant 0 : i32
    return %arg1, %arg0 : i32, i32
  }
}

</mosaic_0001>

<bundles_post_ra>
// kernel: intensity_net_forward.1
= control target key start
LH: loop header
LB: loop body
LE: loop exit
PB: predicated region body
PF: predicated region fallthrough
CT: control target
= control target key end

     0   :  { %s5821_s18 = smov 0   ;;  %s5823_s19 = smov 0   ;;  %s7738_s0 = inlined_call_operand.vmem [shape: f32[8,4], index: 0, kind: input, shape index: {}]   ;;  %s7739_s1 = inlined_call_operand.vmem [shape: f32[4,512], index: 1, kind: input, shape index: {}]   ;;  %s7740_s2 = inlined_call_operand.vmem [shape: f32[1,512], index: 2, kind: input, shape index: {}]   ;;  %s7741_s3 = inlined_call_operand.vmem [shape: bf16[512,2160], index: 3, kind: input, shape index: {}]   ;;  %s7742_s4 = inlined_call_operand.vmem [shape: f32[1,2160], index: 4, kind: input, shape index: {}]   ;;  %s7743_s5 = inlined_call_operand.vmem [shape: f32[8,2160], index: 5, kind: output, shape index: {}]  }
   0x1   :  { %s5825_s20 = smov 0   ;;  %s5827_s21 = smov 0  }
   0x2   :  { %s5829_s22 = smov 0  }
   0x3 LB: > { %s27_s23 = sadd.s32 1, %s5681_s21  ;;  %s3804_s24 = sadd.s32 4294967295, %s5685_s22   ;;  %s5685_s22 = sphi %s5829_s22, %s15_s22   ;;  %s5681_s21 = sphi %s5827_s21, %s7769_s21   ;;  %s5677_s20 = sphi %s5825_s20, %s7768_s20   ;;  %s5673_s19 = sphi %s5823_s19, %s7767_s19   ;;  %s5669_s18 = sphi %s5821_s18, %s7766_s18  }
   0x4   : > { %p29_p0 = scmp.ge.s32.totalorder %s27_s23, 2  ;;  %p109_p1 = scmp.ne.s32.totalorder %s5673_s19, %s5669_s18 }
   0x5   : > { %p110_p2 = scmp.eq.s32.totalorder %s5685_s22, 0  ;;  %p167_p4 = scmp.eq.s32.totalorder %s3804_s24, 1 }
   0x6   : > { %s7771_s23 = smov (%p29_p0, %s27_s23), 0  ;;  %s102_s26 = sadd.s32 1, %s5673_s19 }
   0x7   : > { %p111_p3 = por %p110_p2, %p109_p1  ;;  %s99_s25 = ssub.s32 %s5681_s21, %s7771_s23 }
   0x8   : > { %p100_p5 = scmp.eq.s32.totalorder %s99_s25, 0  ;;  %p5856_p6 = por %p167_p4, %p109_p1 }
   0x9   : > { %p3808_p7 = scmp.ge.s32.totalorder %s5685_s22, 2 }
   0xa   : > { %s5861_s28 = scalar_select %p100_p5, %s5673_s19, %s102_s26  }
   0xb   : > { %202 = sbr.rel (%p3808_p7) target bundleno = 312 (0x138), region = 28 }
  0x10   : > { %205 = sbr.rel (!%p111_p3) target bundleno = 312 (0x138), region = 32  ;;  %s207_s29 = sand.u32 (%p111_p3), 1, %s5673_s19  }
  0x11   : > { %s210_s30 = smul.u32 (%p111_p3), 9, %s5681_s21 }
  0x12   : > { %s5300_s6 = smul.u32 (%p111_p3), 2304, %s207_s29 }
  0x13   : > { %s211_s7 = ssub.s32 (%p111_p3), 17, %s210_s30  ;;  %s5006_s8 = smul.u32 (%p111_p3), 36, %s5681_s21 }
  0x14   : > { %p212_p8 = scmp.lt.s32.totalorder (%p111_p3), %s211_s7, 9  ;;  %s5874_s14 = scalar_lea.vmem (%p111_p3), [#allocation2], %s5300_s6  }
  0x15   : > { %s5870_s11 = scalar_lea.vmem %s7741_s3, %s5006_s8  }
  0x16   : > { %s7773_s7 = smov (!%p212_p8, %s211_s7), 9 }
  0x17   : > { %s3809_s12 = sshll.u32 %s7773_s7, 8  ;;  %s5872_s13 = sshll.u32 %s7773_s7, 2 }
  0x18   : > { %p3813_p9 = scmp.eq.s32.totalorder %s3809_s12, 0 }
  0x19   : > { %p222_p10 = scmp.lt.u32.totalorder (!%p3813_p9), %s5872_s13, 8 }
  0x1a   : > { %221 = sbr.rel (%p3813_p9) target bundleno = 312 (0x138), region = 36 }
  0x1f   : > { %225 = sbr.rel (%p222_p10) target bundleno = 240 (0xf0), region = 40  ;;  %s5878_s15 = sand.u32 (!%p222_p10), 7, %s5872_s13  }
  0x20   : > { %p368_p11 = scmp.eq.s32.totalorder (!%p222_p10), %s5878_s15, 0  ;;  %p3814_p12 = scmp.ne.s32.totalorder (!%p222_p10), %s5878_s15, 0 }
  0x24   : > { %371 = sbr.rel (%p3814_p12) target bundleno = 106 (0x6a), region = 55  ;;  %s372_s16 = sshrl.u32 (!%p3814_p12), %s5872_s13, 3 }
  0x25   : > { %s7745_s17 = smov (!%p3814_p12), %s5874_s14  ;;  %s7746_s24 = smov (!%p3814_p12), %s5870_s11 }
  0x26   : > { %s5889_s25 = smov (!%p3814_p12), 0   ;;  %s5891_s26 = smov (!%p3814_p12), 0  }
  0x29 LB: >> { %v382_v0 = vld [vmem:[%s5693_s24] sm:$0xff]  ;;  %v386_v2 = vld [vmem:[%s5693_s24 + $0x88] sm:$0xff]  ;;  %s510_s29 = sadd.s32 1, %s5697_s25  ;;  %v390_v4 = vld [vmem:[%s5693_s24 + $0x110] sm:$0xff]  ;;  %s376_s26 = sadd.s32 1, %s5701_s26   ;;  %s5701_s26 = sphi %s5891_s26, %s376_s26   ;;  %s5697_s25 = sphi %s5889_s25, %s7749_s25   ;;  %s5693_s24 = sphi %s7746_s24, %s7748_s24   ;;  %s5689_s17 = sphi %s7745_s17, %s7747_s17  }
  0x2a   : >> { %v384_v1 = vld [vmem:[%s5693_s24 + $0x44] sm:$0xff]  ;;  %383 = vst [vmem:[%s5689_s17] sm:$0xff] %v382_v0  ;;  %v388_v3 = vld [vmem:[%s5693_s24 + $0xcc] sm:$0xff]  ;;  %p511_p13 = scmp.ge.s32.totalorder %s510_s29, %s372_s16  ;;  %v392_v5 = vld [vmem:[%s5693_s24 + $0x154] sm:$0xff]  ;;  %p375_p0 = scmp.ge.s32.totalorder %s376_s26, %s372_s16 }
  0x2b   : >> { %385 = vst [vmem:[%s5689_s17 + $0x24] sm:$0xff] %v384_v1  ;;  %v394_v6 = vld [vmem:[%s5693_s24 + $0x198] sm:$0xff]  ;;  %v398_v8 = vld [vmem:[%s5693_s24 + $0x220] sm:$0xff]  ;;  %v402_v10 = vld [vmem:[%s5693_s24 + $0x2a8] sm:$0xff] }
  0x2c   : >> { %387 = vst [vmem:[%s5689_s17 + $0x48] sm:$0xff] %v386_v2  ;;  %s7775_s29 = smov (%p511_p13, %s510_s29), 0  ;;  %v396_v7 = vld [vmem:[%s5693_s24 + $0x1dc] sm:$0xff]  ;;  %v400_v9 = vld [vmem:[%s5693_s24 + $0x264] sm:$0xff]  ;;  %v404_v11 = vld [vmem:[%s5693_s24 + $0x2ec] sm:$0xff] }
  0x2d   : >> { %389 = vst [vmem:[%s5689_s17 + $0x6c] sm:$0xff] %v388_v3  ;;  %s3816_s30 = sshll.u32 %s7775_s29, 3  ;;  %v406_v12 = vld [vmem:[%s5693_s24 + $0x330] sm:$0xff]  ;;  %v410_v14 = vld [vmem:[%s5693_s24 + $0x3b8] sm:$0xff]  ;;  %v414_v16 = vld [vmem:[%s5693_s24 + $0x440] sm:$0xff]  ;;  %s7749_s25 = smov %s7775_s29 }
  0x2e   : >> { %391 = vst [vmem:[%s5689_s17 + $0x90] sm:$0xff] %v390_v4  ;;  %s5924_s6 = scalar_lea.vmem %s5870_s11, %s3816_s30   ;;  %s5927_s7 = scalar_lea.vmem %s5874_s14, %s3816_s30 [#allocation2]   ;;  %v408_v13 = vld [vmem:[%s5693_s24 + $0x374] sm:$0xff]  ;;  %v412_v15 = vld [vmem:[%s5693_s24 + $0x3fc] sm:$0xff]  ;;  %v416_v17 = vld [vmem:[%s5693_s24 + $0x484] sm:$0xff] }
  0x2f   : >> { %393 = vst [vmem:[%s5689_s17 + $0xb4] sm:$0xff] %v392_v5  ;;  %v418_v18 = vld [vmem:[%s5693_s24 + $0x4c8] sm:$0xff]  ;;  %v422_v20 = vld [vmem:[%s5693_s24 + $0x550] sm:$0xff]  ;;  %v426_v22 = vld [vmem:[%s5693_s24 + $0x5d8] sm:$0xff] }
  0x30   : >> { %395 = vst [vmem:[%s5689_s17 + $0xd8] sm:$0xff] %v394_v6  ;;  %v420_v19 = vld [vmem:[%s5693_s24 + $0x50c] sm:$0xff]  ;;  %v424_v21 = vld [vmem:[%s5693_s24 + $0x594] sm:$0xff]  ;;  %v428_v23 = vld [vmem:[%s5693_s24 + $0x61c] sm:$0xff] }
  0x31   : >> { %397 = vst [vmem:[%s5689_s17 + $0xfc] sm:$0xff] %v396_v7  ;;  %v430_v24 = vld [vmem:[%s5693_s24 + $0x660] sm:$0xff]  ;;  %v434_v26 = vld [vmem:[%s5693_s24 + $0x6e8] sm:$0xff]  ;;  %v438_v28 = vld [vmem:[%s5693_s24 + $0x770] sm:$0xff] }
  0x32   : >> { %399 = vst [vmem:[%s5689_s17 + $0x120] sm:$0xff] %v398_v8  ;;  %v432_v25 = vld [vmem:[%s5693_s24 + $0x6a4] sm:$0xff]  ;;  %v436_v27 = vld [vmem:[%s5693_s24 + $0x72c] sm:$0xff]  ;;  %v440_v29 = vld [vmem:[%s5693_s24 + $0x7b4] sm:$0xff] }
  0x33   : >> { %401 = vst [vmem:[%s5689_s17 + $0x144] sm:$0xff] %v400_v9  ;;  %v442_v30 = vld [vmem:[%s5693_s24 + $0x7f8] sm:$0xff]  ;;  %v446_v32 = vld [vmem:[%s5693_s24 + $0x880] sm:$0xff]  ;;  %v450_v34 = vld [vmem:[%s5693_s24 + $0x908] sm:$0xff] }
  0x34   : >> { %403 = vst [vmem:[%s5689_s17 + $0x168] sm:$0xff] %v402_v10  ;;  %v444_v31 = vld [vmem:[%s5693_s24 + $0x83c] sm:$0xff]  ;;  %v448_v33 = vld [vmem:[%s5693_s24 + $0x8c4] sm:$0xff]  ;;  %v452_v35 = vld [vmem:[%s5693_s24 + $0x94c] sm:$0xff] }
  0x35   : >> { %405 = vst [vmem:[%s5689_s17 + $0x18c] sm:$0xff] %v404_v11  ;;  %v454_v36 = vld [vmem:[%s5693_s24 + $0x990] sm:$0xff]  ;;  %v458_v38 = vld [vmem:[%s5693_s24 + $0xa18] sm:$0xff]  ;;  %v462_v40 = vld [vmem:[%s5693_s24 + $0xaa0] sm:$0xff] }
  0x36   : >> { %407 = vst [vmem:[%s5689_s17 + $0x1b0] sm:$0xff] %v406_v12  ;;  %v456_v37 = vld [vmem:[%s5693_s24 + $0x9d4] sm:$0xff]  ;;  %v460_v39 = vld [vmem:[%s5693_s24 + $0xa5c] sm:$0xff]  ;;  %v464_v41 = vld [vmem:[%s5693_s24 + $0xae4] sm:$0xff] }
  0x37   : >> { %409 = vst [vmem:[%s5689_s17 + $0x1d4] sm:$0xff] %v408_v13  ;;  %v466_v42 = vld [vmem:[%s5693_s24 + $0xb28] sm:$0xff]  ;;  %v470_v44 = vld [vmem:[%s5693_s24 + $0xbb0] sm:$0xff]  ;;  %v474_v46 = vld [vmem:[%s5693_s24 + $0xc38] sm:$0xff] }
  0x38   : >> { %411 = vst [vmem:[%s5689_s17 + $0x1f8] sm:$0xff] %v410_v14  ;;  %v468_v43 = vld [vmem:[%s5693_s24 + $0xb6c] sm:$0xff]  ;;  %v472_v45 = vld [vmem:[%s5693_s24 + $0xbf4] sm:$0xff]  ;;  %v476_v47 = vld [vmem:[%s5693_s24 + $0xc7c] sm:$0xff] }
  0x39   : >> { %413 = vst [vmem:[%s5689_s17 + $0x21c] sm:$0xff] %v412_v15  ;;  %v478_v48 = vld [vmem:[%s5693_s24 + $0xcc0] sm:$0xff]  ;;  %v482_v50 = vld [vmem:[%s5693_s24 + $0xd48] sm:$0xff]  ;;  %v486_v52 = vld [vmem:[%s5693_s24 + $0xdd0] sm:$0xff] }
  0x3a   : >> { %415 = vst [vmem:[%s5689_s17 + $0x240] sm:$0xff] %v414_v16  ;;  %v480_v49 = vld [vmem:[%s5693_s24 + $0xd04] sm:$0xff]  ;;  %v484_v51 = vld [vmem:[%s5693_s24 + $0xd8c] sm:$0xff]  ;;  %v488_v53 = vld [vmem:[%s5693_s24 + $0xe14] sm:$0xff] }
  0x3b   : >> { %417 = vst [vmem:[%s5689_s17 + $0x264] sm:$0xff] %v416_v17  ;;  %v490_v54 = vld [vmem:[%s5693_s24 + $0xe58] sm:$0xff]  ;;  %v494_v56 = vld [vmem:[%s5693_s24 + $0xee0] sm:$0xff]  ;;  %v498_v58 = vld [vmem:[%s5693_s24 + $0xf68] sm:$0xff] }
  0x3c   : >> { %419 = vst [vmem:[%s5689_s17 + $0x288] sm:$0xff] %v418_v18  ;;  %v492_v55 = vld [vmem:[%s5693_s24 + $0xe9c] sm:$0xff]  ;;  %v496_v57 = vld [vmem:[%s5693_s24 + $0xf24] sm:$0xff]  ;;  %v500_v59 = vld [vmem:[%s5693_s24 + $0xfac] sm:$0xff] }
  0x3d   : >> { %421 = vst [vmem:[%s5689_s17 + $0x2ac] sm:$0xff] %v420_v19  ;;  %v502_v60 = vld [vmem:[%s5693_s24 + $0xff0] sm:$0xff]  ;;  %v506_v62 = vld [vmem:[%s5693_s24 + $0x1078] sm:$0xff] }
  0x3e   : >> { %423 = vst [vmem:[%s5689_s17 + $0x2d0] sm:$0xff] %v422_v20  ;;  %v504_v61 = vld [vmem:[%s5693_s24 + $0x1034] sm:$0xff]  ;;  %v508_v63 = vld [vmem:[%s5693_s24 + $0x10bc] sm:$0xff]  ;;  %s7748_s24 = smov %s5924_s6 }
  0x3f   : >> { %425 = vst [vmem:[%s5689_s17 + $0x2f4] sm:$0xff] %v424_v21 }
  0x40   : >> { %427 = vst [vmem:[%s5689_s17 + $0x318] sm:$0xff] %v426_v22 }
  0x41   : >> { %429 = vst [vmem:[%s5689_s17 + $0x33c] sm:$0xff] %v428_v23 }
  0x42   : >> { %431 = vst [vmem:[%s5689_s17 + $0x360] sm:$0xff] %v430_v24 }
  0x43   : >> { %433 = vst [vmem:[%s5689_s17 + $0x384] sm:$0xff] %v432_v25 }
  0x44   : >> { %435 = vst [vmem:[%s5689_s17 + $0x3a8] sm:$0xff] %v434_v26 }
  0x45   : >> { %437 = vst [vmem:[%s5689_s17 + $0x3cc] sm:$0xff] %v436_v27 }
  0x46   : >> { %439 = vst [vmem:[%s5689_s17 + $0x3f0] sm:$0xff] %v438_v28 }
  0x47   : >> { %441 = vst [vmem:[%s5689_s17 + $0x414] sm:$0xff] %v440_v29 }
  0x48   : >> { %443 = vst [vmem:[%s5689_s17 + $0x438] sm:$0xff] %v442_v30 }
  0x49   : >> { %445 = vst [vmem:[%s5689_s17 + $0x45c] sm:$0xff] %v444_v31 }
  0x4a   : >> { %447 = vst [vmem:[%s5689_s17 + $0x480] sm:$0xff] %v446_v32 }
  0x4b   : >> { %449 = vst [vmem:[%s5689_s17 + $0x4a4] sm:$0xff] %v448_v33 }
  0x4c   : >> { %451 = vst [vmem:[%s5689_s17 + $0x4c8] sm:$0xff] %v450_v34 }
  0x4d   : >> { %453 = vst [vmem:[%s5689_s17 + $0x4ec] sm:$0xff] %v452_v35 }
  0x4e   : >> { %455 = vst [vmem:[%s5689_s17 + $0x510] sm:$0xff] %v454_v36 }
  0x4f   : >> { %457 = vst [vmem:[%s5689_s17 + $0x534] sm:$0xff] %v456_v37 }
  0x50   : >> { %459 = vst [vmem:[%s5689_s17 + $0x558] sm:$0xff] %v458_v38 }
  0x51   : >> { %461 = vst [vmem:[%s5689_s17 + $0x57c] sm:$0xff] %v460_v39 }
  0x52   : >> { %463 = vst [vmem:[%s5689_s17 + $0x5a0] sm:$0xff] %v462_v40 }
  0x53   : >> { %465 = vst [vmem:[%s5689_s17 + $0x5c4] sm:$0xff] %v464_v41 }
  0x54   : >> { %467 = vst [vmem:[%s5689_s17 + $0x5e8] sm:$0xff] %v466_v42 }
  0x55   : >> { %469 = vst [vmem:[%s5689_s17 + $0x60c] sm:$0xff] %v468_v43 }
  0x56   : >> { %471 = vst [vmem:[%s5689_s17 + $0x630] sm:$0xff] %v470_v44 }
  0x57   : >> { %473 = vst [vmem:[%s5689_s17 + $0x654] sm:$0xff] %v472_v45 }
  0x58   : >> { %475 = vst [vmem:[%s5689_s17 + $0x678] sm:$0xff] %v474_v46 }
  0x59   : >> { %477 = vst [vmem:[%s5689_s17 + $0x69c] sm:$0xff] %v476_v47 }
  0x5a   : >> { %479 = vst [vmem:[%s5689_s17 + $0x6c0] sm:$0xff] %v478_v48 }
  0x5b   : >> { %481 = vst [vmem:[%s5689_s17 + $0x6e4] sm:$0xff] %v480_v49 }
  0x5c   : >> { %483 = vst [vmem:[%s5689_s17 + $0x708] sm:$0xff] %v482_v50 }
  0x5d   : >> { %485 = vst [vmem:[%s5689_s17 + $0x72c] sm:$0xff] %v484_v51 }
  0x5e   : >> { %487 = vst [vmem:[%s5689_s17 + $0x750] sm:$0xff] %v486_v52 }
  0x5f   : >> { %489 = vst [vmem:[%s5689_s17 + $0x774] sm:$0xff] %v488_v53 }
  0x60   : >> { %491 = vst [vmem:[%s5689_s17 + $0x798] sm:$0xff] %v490_v54 }
  0x61   : >> { %493 = vst [vmem:[%s5689_s17 + $0x7bc] sm:$0xff] %v492_v55 }
  0x62   : >> { %495 = vst [vmem:[%s5689_s17 + $0x7e0] sm:$0xff] %v494_v56 }
  0x63   : >> { %497 = vst [vmem:[%s5689_s17 + $0x804] sm:$0xff] %v496_v57 }
  0x64   : >> { %499 = vst [vmem:[%s5689_s17 + $0x828] sm:$0xff] %v498_v58 }
  0x65   : >> { %501 = vst [vmem:[%s5689_s17 + $0x84c] sm:$0xff] %v500_v59  ;;  %378 = sbr.rel (!%p375_p0) target bundleno = 41 (0x29), region = 227 }
  0x66   : >> { %503 = vst [vmem:[%s5689_s17 + $0x870] sm:$0xff] %v502_v60 }
  0x67   : >> { %505 = vst [vmem:[%s5689_s17 + $0x894] sm:$0xff] %v504_v61 }
  0x68   : >> { %507 = vst [vmem:[%s5689_s17 + $0x8b8] sm:$0xff] %v506_v62 }
  0x69   : >> { %509 = vst [vmem:[%s5689_s17 + $0x8dc] sm:$0xff] %v508_v63  ;;  %s7747_s17 = smov %s5927_s7 }
  0x6a PF: > { %519 = sbr.rel (%p368_p11) target bundleno = 240 (0xf0), region = 66  ;;  %s521_s8 = ssub.s32 (!%p368_p11), %s5872_s13, %s5878_s15 }
  0x6b   : > { %s525_s9 = sshrl.u32 (!%p368_p11), %s5872_s13, 3  ;;  %s6062_s10 = scalar_lea.vmem (!%p368_p11), %s5870_s11, %s521_s8 }
  0x6c   : > { %s6065_s12 = scalar_lea.vmem (!%p368_p11), %s5874_s14, %s521_s8 [#allocation2]  ;;  %s7750_s26 = smov (!%p368_p11), %s5874_s14 }
  0x6d   : > { %s7751_s16 = smov (!%p368_p11), %s5870_s11  ;;  %s6073_s17 = smov (!%p368_p11), 0  }
  0x6e   : > { %s6075_s24 = smov (!%p368_p11), 0  }
  0x6f LB: >> { %v535_v0 = vld [vmem:[%s5709_s16] sm:$0xff]  ;;  %v539_v2 = vld [vmem:[%s5709_s16 + $0x88] sm:$0xff]  ;;  %s663_s25 = sadd.s32 1, %s5713_s17  ;;  %v543_v4 = vld [vmem:[%s5709_s16 + $0x110] sm:$0xff]  ;;  %s529_s24 = sadd.s32 1, %s5717_s24   ;;  %s5717_s24 = sphi %s6075_s24, %s529_s24   ;;  %s5713_s17 = sphi %s6073_s17, %s7754_s17   ;;  %s5709_s16 = sphi %s7751_s16, %s7753_s16   ;;  %s5705_s26 = sphi %s7750_s26, %s7752_s26  }
  0x70   : >> { %v537_v1 = vld [vmem:[%s5709_s16 + $0x44] sm:$0xff]  ;;  %536 = vst [vmem:[%s5705_s26] sm:$0xff] %v535_v0  ;;  %v541_v3 = vld [vmem:[%s5709_s16 + $0xcc] sm:$0xff]  ;;  %p664_p1 = scmp.ge.s32.totalorder %s663_s25, %s525_s9  ;;  %v545_v5 = vld [vmem:[%s5709_s16 + $0x154] sm:$0xff]  ;;  %p528_p2 = scmp.ge.s32.totalorder %s529_s24, %s525_s9 }
  0x71   : >> { %538 = vst [vmem:[%s5705_s26 + $0x24] sm:$0xff] %v537_v1  ;;  %v547_v6 = vld [vmem:[%s5709_s16 + $0x198] sm:$0xff]  ;;  %v551_v8 = vld [vmem:[%s5709_s16 + $0x220] sm:$0xff]  ;;  %v555_v10 = vld [vmem:[%s5709_s16 + $0x2a8] sm:$0xff]  ;;  %s5783_s7 = smov (%p528_p2), 1  }
  0x72   : >> { %540 = vst [vmem:[%s5705_s26 + $0x48] sm:$0xff] %v539_v2  ;;  %s7777_s25 = smov (%p664_p1, %s663_s25), 0  ;;  %v549_v7 = vld [vmem:[%s5709_s16 + $0x1dc] sm:$0xff]  ;;  %v553_v9 = vld [vmem:[%s5709_s16 + $0x264] sm:$0xff]  ;;  %v557_v11 = vld [vmem:[%s5709_s16 + $0x2ec] sm:$0xff]  ;;  %s670_s8 = sshll.u32 (%p528_p2), %s5783_s7, %s5878_s15 }
  0x73   : >> { %542 = vst [vmem:[%s5705_s26 + $0x6c] sm:$0xff] %v541_v3  ;;  %s3819_s29 = sshll.u32 %s7777_s25, 3  ;;  %v559_v12 = vld [vmem:[%s5709_s16 + $0x330] sm:$0xff]  ;;  %v563_v14 = vld [vmem:[%s5709_s16 + $0x3b8] sm:$0xff]  ;;  %v567_v16 = vld [vmem:[%s5709_s16 + $0x440] sm:$0xff]  ;;  %s7754_s17 = smov %s7777_s25 }
  0x74   : >> { %544 = vst [vmem:[%s5705_s26 + $0x90] sm:$0xff] %v543_v4  ;;  %s6108_s30 = scalar_lea.vmem %s5870_s11, %s3819_s29   ;;  %s6111_s6 = scalar_lea.vmem %s5874_s14, %s3819_s29 [#allocation2]   ;;  %v561_v13 = vld [vmem:[%s5709_s16 + $0x374] sm:$0xff]  ;;  %v565_v15 = vld [vmem:[%s5709_s16 + $0x3fc] sm:$0xff]  ;;  %v569_v17 = vld [vmem:[%s5709_s16 + $0x484] sm:$0xff] }
  0x75   : >> { %546 = vst [vmem:[%s5705_s26 + $0xb4] sm:$0xff] %v545_v5  ;;  %v571_v18 = vld [vmem:[%s5709_s16 + $0x4c8] sm:$0xff]  ;;  %v575_v20 = vld [vmem:[%s5709_s16 + $0x550] sm:$0xff]  ;;  %v579_v22 = vld [vmem:[%s5709_s16 + $0x5d8] sm:$0xff]  ;;  %s6241_s25 = sadd.s32 (%p528_p2), 4294967295, %s670_s8 }
  0x76   : >> { %548 = vst [vmem:[%s5705_s26 + $0xd8] sm:$0xff] %v547_v6  ;;  %v573_v19 = vld [vmem:[%s5709_s16 + $0x50c] sm:$0xff]  ;;  %v577_v21 = vld [vmem:[%s5709_s16 + $0x594] sm:$0xff]  ;;  %v581_v23 = vld [vmem:[%s5709_s16 + $0x61c] sm:$0xff] }
  0x77   : >> { %550 = vst [vmem:[%s5705_s26 + $0xfc] sm:$0xff] %v549_v7  ;;  %v583_v24 = vld [vmem:[%s5709_s16 + $0x660] sm:$0xff]  ;;  %v587_v26 = vld [vmem:[%s5709_s16 + $0x6e8] sm:$0xff]  ;;  %v591_v28 = vld [vmem:[%s5709_s16 + $0x770] sm:$0xff] }
  0x78   : >> { %552 = vst [vmem:[%s5705_s26 + $0x120] sm:$0xff] %v551_v8  ;;  %v585_v25 = vld [vmem:[%s5709_s16 + $0x6a4] sm:$0xff]  ;;  %v589_v27 = vld [vmem:[%s5709_s16 + $0x72c] sm:$0xff]  ;;  %v593_v29 = vld [vmem:[%s5709_s16 + $0x7b4] sm:$0xff] }
  0x79   : >> { %554 = vst [vmem:[%s5705_s26 + $0x144] sm:$0xff] %v553_v9  ;;  %v595_v30 = vld [vmem:[%s5709_s16 + $0x7f8] sm:$0xff]  ;;  %v599_v32 = vld [vmem:[%s5709_s16 + $0x880] sm:$0xff]  ;;  %v603_v34 = vld [vmem:[%s5709_s16 + $0x908] sm:$0xff] }
  0x7a   : >> { %556 = vst [vmem:[%s5705_s26 + $0x168] sm:$0xff] %v555_v10  ;;  %v597_v31 = vld [vmem:[%s5709_s16 + $0x83c] sm:$0xff]  ;;  %v601_v33 = vld [vmem:[%s5709_s16 + $0x8c4] sm:$0xff]  ;;  %v605_v35 = vld [vmem:[%s5709_s16 + $0x94c] sm:$0xff] }
  0x7b   : >> { %558 = vst [vmem:[%s5705_s26 + $0x18c] sm:$0xff] %v557_v11  ;;  %v607_v36 = vld [vmem:[%s5709_s16 + $0x990] sm:$0xff]  ;;  %v611_v38 = vld [vmem:[%s5709_s16 + $0xa18] sm:$0xff]  ;;  %v615_v40 = vld [vmem:[%s5709_s16 + $0xaa0] sm:$0xff] }
  0x7c   : >> { %560 = vst [vmem:[%s5705_s26 + $0x1b0] sm:$0xff] %v559_v12  ;;  %v609_v37 = vld [vmem:[%s5709_s16 + $0x9d4] sm:$0xff]  ;;  %v613_v39 = vld [vmem:[%s5709_s16 + $0xa5c] sm:$0xff]  ;;  %v617_v41 = vld [vmem:[%s5709_s16 + $0xae4] sm:$0xff] }
  0x7d   : >> { %562 = vst [vmem:[%s5705_s26 + $0x1d4] sm:$0xff] %v561_v13  ;;  %v619_v42 = vld [vmem:[%s5709_s16 + $0xb28] sm:$0xff]  ;;  %v623_v44 = vld [vmem:[%s5709_s16 + $0xbb0] sm:$0xff]  ;;  %v627_v46 = vld [vmem:[%s5709_s16 + $0xc38] sm:$0xff] }
  0x7e   : >> { %564 = vst [vmem:[%s5705_s26 + $0x1f8] sm:$0xff] %v563_v14  ;;  %v621_v43 = vld [vmem:[%s5709_s16 + $0xb6c] sm:$0xff]  ;;  %v625_v45 = vld [vmem:[%s5709_s16 + $0xbf4] sm:$0xff]  ;;  %v629_v47 = vld [vmem:[%s5709_s16 + $0xc7c] sm:$0xff] }
  0x7f   : >> { %566 = vst [vmem:[%s5705_s26 + $0x21c] sm:$0xff] %v565_v15  ;;  %v631_v48 = vld [vmem:[%s5709_s16 + $0xcc0] sm:$0xff]  ;;  %v635_v50 = vld [vmem:[%s5709_s16 + $0xd48] sm:$0xff]  ;;  %v639_v52 = vld [vmem:[%s5709_s16 + $0xdd0] sm:$0xff] }
  0x80   : >> { %568 = vst [vmem:[%s5705_s26 + $0x240] sm:$0xff] %v567_v16  ;;  %v633_v49 = vld [vmem:[%s5709_s16 + $0xd04] sm:$0xff]  ;;  %v637_v51 = vld [vmem:[%s5709_s16 + $0xd8c] sm:$0xff]  ;;  %v641_v53 = vld [vmem:[%s5709_s16 + $0xe14] sm:$0xff] }
  0x81   : >> { %570 = vst [vmem:[%s5705_s26 + $0x264] sm:$0xff] %v569_v17  ;;  %v643_v54 = vld [vmem:[%s5709_s16 + $0xe58] sm:$0xff]  ;;  %v647_v56 = vld [vmem:[%s5709_s16 + $0xee0] sm:$0xff]  ;;  %v651_v58 = vld [vmem:[%s5709_s16 + $0xf68] sm:$0xff] }
  0x82   : >> { %572 = vst [vmem:[%s5705_s26 + $0x288] sm:$0xff] %v571_v18  ;;  %v645_v55 = vld [vmem:[%s5709_s16 + $0xe9c] sm:$0xff]  ;;  %v649_v57 = vld [vmem:[%s5709_s16 + $0xf24] sm:$0xff]  ;;  %v653_v59 = vld [vmem:[%s5709_s16 + $0xfac] sm:$0xff] }
  0x83   : >> { %574 = vst [vmem:[%s5705_s26 + $0x2ac] sm:$0xff] %v573_v19  ;;  %v655_v60 = vld [vmem:[%s5709_s16 + $0xff0] sm:$0xff]  ;;  %v659_v62 = vld [vmem:[%s5709_s16 + $0x1078] sm:$0xff] }
  0x84   : >> { %576 = vst [vmem:[%s5705_s26 + $0x2d0] sm:$0xff] %v575_v20  ;;  %v657_v61 = vld [vmem:[%s5709_s16 + $0x1034] sm:$0xff]  ;;  %v661_v63 = vld [vmem:[%s5709_s16 + $0x10bc] sm:$0xff]  ;;  %s7753_s16 = smov %s6108_s30 }
  0x85   : >> { %578 = vst [vmem:[%s5705_s26 + $0x2f4] sm:$0xff] %v577_v21  ;;  %v680_v0 = vld [vmem:[%s6062_s10] sm:%s6241_s25] (%p528_p2) }
  0x86   : >> { %580 = vst [vmem:[%s5705_s26 + $0x318] sm:$0xff] %v579_v22  ;;  %v682_v1 = vld [vmem:[%s6062_s10 + $0x44] sm:%s6241_s25] (%p528_p2) }
  0x87   : >> { %582 = vst [vmem:[%s5705_s26 + $0x33c] sm:$0xff] %v581_v23  ;;  %v684_v2 = vld [vmem:[%s6062_s10 + $0x88] sm:%s6241_s25] (%p528_p2) }
  0x88   : >> { %584 = vst [vmem:[%s5705_s26 + $0x360] sm:$0xff] %v583_v24  ;;  %v686_v3 = vld [vmem:[%s6062_s10 + $0xcc] sm:%s6241_s25] (%p528_p2) }
  0x89   : >> { %586 = vst [vmem:[%s5705_s26 + $0x384] sm:$0xff] %v585_v25  ;;  %v688_v4 = vld [vmem:[%s6062_s10 + $0x110] sm:%s6241_s25] (%p528_p2) }
  0x8a   : >> { %588 = vst [vmem:[%s5705_s26 + $0x3a8] sm:$0xff] %v587_v26  ;;  %v690_v5 = vld [vmem:[%s6062_s10 + $0x154] sm:%s6241_s25] (%p528_p2) }
  0x8b   : >> { %590 = vst [vmem:[%s5705_s26 + $0x3cc] sm:$0xff] %v589_v27  ;;  %v692_v6 = vld [vmem:[%s6062_s10 + $0x198] sm:%s6241_s25] (%p528_p2) }
  0x8c   : >> { %592 = vst [vmem:[%s5705_s26 + $0x3f0] sm:$0xff] %v591_v28  ;;  %v694_v7 = vld [vmem:[%s6062_s10 + $0x1dc] sm:%s6241_s25] (%p528_p2) }
  0x8d   : >> { %594 = vst [vmem:[%s5705_s26 + $0x414] sm:$0xff] %v593_v29  ;;  %v696_v8 = vld [vmem:[%s6062_s10 + $0x220] sm:%s6241_s25] (%p528_p2) }
  0x8e   : >> { %596 = vst [vmem:[%s5705_s26 + $0x438] sm:$0xff] %v595_v30  ;;  %v698_v9 = vld [vmem:[%s6062_s10 + $0x264] sm:%s6241_s25] (%p528_p2) }
  0x8f   : >> { %598 = vst [vmem:[%s5705_s26 + $0x45c] sm:$0xff] %v597_v31  ;;  %v700_v10 = vld [vmem:[%s6062_s10 + $0x2a8] sm:%s6241_s25] (%p528_p2) }
  0x90   : >> { %600 = vst [vmem:[%s5705_s26 + $0x480] sm:$0xff] %v599_v32  ;;  %v702_v11 = vld [vmem:[%s6062_s10 + $0x2ec] sm:%s6241_s25] (%p528_p2) }
  0x91   : >> { %602 = vst [vmem:[%s5705_s26 + $0x4a4] sm:$0xff] %v601_v33  ;;  %v704_v12 = vld [vmem:[%s6062_s10 + $0x330] sm:%s6241_s25] (%p528_p2) }
  0x92   : >> { %604 = vst [vmem:[%s5705_s26 + $0x4c8] sm:$0xff] %v603_v34  ;;  %v706_v13 = vld [vmem:[%s6062_s10 + $0x374] sm:%s6241_s25] (%p528_p2) }
  0x93   : >> { %606 = vst [vmem:[%s5705_s26 + $0x4ec] sm:$0xff] %v605_v35  ;;  %v708_v14 = vld [vmem:[%s6062_s10 + $0x3b8] sm:%s6241_s25] (%p528_p2) }
  0x94   : >> { %608 = vst [vmem:[%s5705_s26 + $0x510] sm:$0xff] %v607_v36  ;;  %v710_v15 = vld [vmem:[%s6062_s10 + $0x3fc] sm:%s6241_s25] (%p528_p2) }
  0x95   : >> { %610 = vst [vmem:[%s5705_s26 + $0x534] sm:$0xff] %v609_v37  ;;  %v712_v16 = vld [vmem:[%s6062_s10 + $0x440] sm:%s6241_s25] (%p528_p2) }
  0x96   : >> { %612 = vst [vmem:[%s5705_s26 + $0x558] sm:$0xff] %v611_v38  ;;  %v714_v17 = vld [vmem:[%s6062_s10 + $0x484] sm:%s6241_s25] (%p528_p2) }
  0x97   : >> { %614 = vst [vmem:[%s5705_s26 + $0x57c] sm:$0xff] %v613_v39  ;;  %v716_v18 = vld [vmem:[%s6062_s10 + $0x4c8] sm:%s6241_s25] (%p528_p2) }
  0x98   : >> { %616 = vst [vmem:[%s5705_s26 + $0x5a0] sm:$0xff] %v615_v40  ;;  %v718_v19 = vld [vmem:[%s6062_s10 + $0x50c] sm:%s6241_s25] (%p528_p2) }
  0x99   : >> { %618 = vst [vmem:[%s5705_s26 + $0x5c4] sm:$0xff] %v617_v41  ;;  %v720_v20 = vld [vmem:[%s6062_s10 + $0x550] sm:%s6241_s25] (%p528_p2) }
  0x9a   : >> { %620 = vst [vmem:[%s5705_s26 + $0x5e8] sm:$0xff] %v619_v42  ;;  %v722_v21 = vld [vmem:[%s6062_s10 + $0x594] sm:%s6241_s25] (%p528_p2) }
  0x9b   : >> { %622 = vst [vmem:[%s5705_s26 + $0x60c] sm:$0xff] %v621_v43  ;;  %v724_v22 = vld [vmem:[%s6062_s10 + $0x5d8] sm:%s6241_s25] (%p528_p2) }
  0x9c   : >> { %624 = vst [vmem:[%s5705_s26 + $0x630] sm:$0xff] %v623_v44  ;;  %v726_v23 = vld [vmem:[%s6062_s10 + $0x61c] sm:%s6241_s25] (%p528_p2) }
  0x9d   : >> { %626 = vst [vmem:[%s5705_s26 + $0x654] sm:$0xff] %v625_v45  ;;  %v728_v24 = vld [vmem:[%s6062_s10 + $0x660] sm:%s6241_s25] (%p528_p2) }
  0x9e   : >> { %628 = vst [vmem:[%s5705_s26 + $0x678] sm:$0xff] %v627_v46  ;;  %v730_v25 = vld [vmem:[%s6062_s10 + $0x6a4] sm:%s6241_s25] (%p528_p2) }
  0x9f   : >> { %630 = vst [vmem:[%s5705_s26 + $0x69c] sm:$0xff] %v629_v47  ;;  %v732_v26 = vld [vmem:[%s6062_s10 + $0x6e8] sm:%s6241_s25] (%p528_p2) }
  0xa0   : >> { %632 = vst [vmem:[%s5705_s26 + $0x6c0] sm:$0xff] %v631_v48  ;;  %v734_v27 = vld [vmem:[%s6062_s10 + $0x72c] sm:%s6241_s25] (%p528_p2) }
  0xa1   : >> { %634 = vst [vmem:[%s5705_s26 + $0x6e4] sm:$0xff] %v633_v49  ;;  %v736_v28 = vld [vmem:[%s6062_s10 + $0x770] sm:%s6241_s25] (%p528_p2) }
  0xa2   : >> { %636 = vst [vmem:[%s5705_s26 + $0x708] sm:$0xff] %v635_v50  ;;  %v738_v29 = vld [vmem:[%s6062_s10 + $0x7b4] sm:%s6241_s25] (%p528_p2) }
  0xa3   : >> { %638 = vst [vmem:[%s5705_s26 + $0x72c] sm:$0xff] %v637_v51  ;;  %v740_v30 = vld [vmem:[%s6062_s10 + $0x7f8] sm:%s6241_s25] (%p528_p2) }
  0xa4   : >> { %640 = vst [vmem:[%s5705_s26 + $0x750] sm:$0xff] %v639_v52  ;;  %v742_v31 = vld [vmem:[%s6062_s10 + $0x83c] sm:%s6241_s25] (%p528_p2) }
  0xa5   : >> { %642 = vst [vmem:[%s5705_s26 + $0x774] sm:$0xff] %v641_v53  ;;  %v744_v32 = vld [vmem:[%s6062_s10 + $0x880] sm:%s6241_s25] (%p528_p2) }
  0xa6   : >> { %644 = vst [vmem:[%s5705_s26 + $0x798] sm:$0xff] %v643_v54  ;;  %v746_v33 = vld [vmem:[%s6062_s10 + $0x8c4] sm:%s6241_s25] (%p528_p2) }
  0xa7   : >> { %646 = vst [vmem:[%s5705_s26 + $0x7bc] sm:$0xff] %v645_v55  ;;  %v748_v34 = vld [vmem:[%s6062_s10 + $0x908] sm:%s6241_s25] (%p528_p2) }
  0xa8   : >> { %648 = vst [vmem:[%s5705_s26 + $0x7e0] sm:$0xff] %v647_v56  ;;  %v750_v35 = vld [vmem:[%s6062_s10 + $0x94c] sm:%s6241_s25] (%p528_p2) }
  0xa9   : >> { %650 = vst [vmem:[%s5705_s26 + $0x804] sm:$0xff] %v649_v57  ;;  %v752_v36 = vld [vmem:[%s6062_s10 + $0x990] sm:%s6241_s25] (%p528_p2) }
  0xaa   : >> { %652 = vst [vmem:[%s5705_s26 + $0x828] sm:$0xff] %v651_v58  ;;  %v754_v37 = vld [vmem:[%s6062_s10 + $0x9d4] sm:%s6241_s25] (%p528_p2) }
  0xab   : >> { %654 = vst [vmem:[%s5705_s26 + $0x84c] sm:$0xff] %v653_v59  ;;  %531 = sbr.rel (!%p528_p2) target bundleno = 111 (0x6f), region = 238  ;;  %v756_v38 = vld [vmem:[%s6062_s10 + $0xa18] sm:%s6241_s25] (%p528_p2) }
  0xac   : >> { %656 = vst [vmem:[%s5705_s26 + $0x870] sm:$0xff] %v655_v60  ;;  %v758_v39 = vld [vmem:[%s6062_s10 + $0xa5c] sm:%s6241_s25] (%p528_p2) }
  0xad   : >> { %658 = vst [vmem:[%s5705_s26 + $0x894] sm:$0xff] %v657_v61  ;;  %v760_v40 = vld [vmem:[%s6062_s10 + $0xaa0] sm:%s6241_s25] (%p528_p2) }
  0xae   : >> { %660 = vst [vmem:[%s5705_s26 + $0x8b8] sm:$0xff] %v659_v62  ;;  %v762_v41 = vld [vmem:[%s6062_s10 + $0xae4] sm:%s6241_s25] (%p528_p2) }
  0xaf   : >> { %662 = vst [vmem:[%s5705_s26 + $0x8dc] sm:$0xff] %v661_v63  ;;  %s7752_s26 = smov %s6111_s6  ;;  %v764_v42 = vld [vmem:[%s6062_s10 + $0xb28] sm:%s6241_s25] (%p528_p2) }
  0xb0   : > { %681 = vst [vmem:[%s6065_s12] sm:%s6241_s25] %v680_v0  ;;  %v766_v43 = vld [vmem:[%s6062_s10 + $0xb6c] sm:%s6241_s25] }
  0xb1   : > { %683 = vst [vmem:[%s6065_s12 + $0x24] sm:%s6241_s25] %v682_v1  ;;  %v768_v44 = vld [vmem:[%s6062_s10 + $0xbb0] sm:%s6241_s25] }
  0xb2   : > { %685 = vst [vmem:[%s6065_s12 + $0x48] sm:%s6241_s25] %v684_v2  ;;  %v770_v45 = vld [vmem:[%s6062_s10 + $0xbf4] sm:%s6241_s25] }
  0xb3   : > { %687 = vst [vmem:[%s6065_s12 + $0x6c] sm:%s6241_s25] %v686_v3  ;;  %v772_v46 = vld [vmem:[%s6062_s10 + $0xc38] sm:%s6241_s25] }
  0xb4   : > { %689 = vst [vmem:[%s6065_s12 + $0x90] sm:%s6241_s25] %v688_v4  ;;  %v774_v47 = vld [vmem:[%s6062_s10 + $0xc7c] sm:%s6241_s25] }
  0xb5   : > { %691 = vst [vmem:[%s6065_s12 + $0xb4] sm:%s6241_s25] %v690_v5  ;;  %v776_v48 = vld [vmem:[%s6062_s10 + $0xcc0] sm:%s6241_s25] }
  0xb6   : > { %693 = vst [vmem:[%s6065_s12 + $0xd8] sm:%s6241_s25] %v692_v6  ;;  %v778_v49 = vld [vmem:[%s6062_s10 + $0xd04] sm:%s6241_s25] }
  0xb7   : > { %695 = vst [vmem:[%s6065_s12 + $0xfc] sm:%s6241_s25] %v694_v7  ;;  %v780_v50 = vld [vmem:[%s6062_s10 + $0xd48] sm:%s6241_s25] }
  0xb8   : > { %697 = vst [vmem:[%s6065_s12 + $0x120] sm:%s6241_s25] %v696_v8  ;;  %v782_v51 = vld [vmem:[%s6062_s10 + $0xd8c] sm:%s6241_s25] }
  0xb9   : > { %699 = vst [vmem:[%s6065_s12 + $0x144] sm:%s6241_s25] %v698_v9  ;;  %v784_v52 = vld [vmem:[%s6062_s10 + $0xdd0] sm:%s6241_s25] }
  0xba   : > { %701 = vst [vmem:[%s6065_s12 + $0x168] sm:%s6241_s25] %v700_v10  ;;  %v786_v53 = vld [vmem:[%s6062_s10 + $0xe14] sm:%s6241_s25] }
  0xbb   : > { %703 = vst [vmem:[%s6065_s12 + $0x18c] sm:%s6241_s25] %v702_v11  ;;  %v788_v54 = vld [vmem:[%s6062_s10 + $0xe58] sm:%s6241_s25] }
  0xbc   : > { %705 = vst [vmem:[%s6065_s12 + $0x1b0] sm:%s6241_s25] %v704_v12  ;;  %v790_v55 = vld [vmem:[%s6062_s10 + $0xe9c] sm:%s6241_s25] }
  0xbd   : > { %707 = vst [vmem:[%s6065_s12 + $0x1d4] sm:%s6241_s25] %v706_v13  ;;  %v792_v56 = vld [vmem:[%s6062_s10 + $0xee0] sm:%s6241_s25] }
  0xbe   : > { %709 = vst [vmem:[%s6065_s12 + $0x1f8] sm:%s6241_s25] %v708_v14  ;;  %v794_v57 = vld [vmem:[%s6062_s10 + $0xf24] sm:%s6241_s25] }
  0xbf   : > { %711 = vst [vmem:[%s6065_s12 + $0x21c] sm:%s6241_s25] %v710_v15  ;;  %v796_v58 = vld [vmem:[%s6062_s10 + $0xf68] sm:%s6241_s25] }
  0xc0   : > { %713 = vst [vmem:[%s6065_s12 + $0x240] sm:%s6241_s25] %v712_v16  ;;  %v798_v59 = vld [vmem:[%s6062_s10 + $0xfac] sm:%s6241_s25] }
  0xc1   : > { %715 = vst [vmem:[%s6065_s12 + $0x264] sm:%s6241_s25] %v714_v17  ;;  %v800_v60 = vld [vmem:[%s6062_s10 + $0xff0] sm:%s6241_s25] }
  0xc2   : > { %717 = vst [vmem:[%s6065_s12 + $0x288] sm:%s6241_s25] %v716_v18  ;;  %v802_v61 = vld [vmem:[%s6062_s10 + $0x1034] sm:%s6241_s25] }
  0xc3   : > { %719 = vst [vmem:[%s6065_s12 + $0x2ac] sm:%s6241_s25] %v718_v19  ;;  %v804_v62 = vld [vmem:[%s6062_s10 + $0x1078] sm:%s6241_s25] }
  0xc4   : > { %721 = vst [vmem:[%s6065_s12 + $0x2d0] sm:%s6241_s25] %v720_v20  ;;  %v806_v63 = vld [vmem:[%s6062_s10 + $0x10bc] sm:%s6241_s25] }
  0xc5   : > { %723 = vst [vmem:[%s6065_s12 + $0x2f4] sm:%s6241_s25] %v722_v21 }
  0xc6   : > { %725 = vst [vmem:[%s6065_s12 + $0x318] sm:%s6241_s25] %v724_v22 }
  0xc7   : > { %727 = vst [vmem:[%s6065_s12 + $0x33c] sm:%s6241_s25] %v726_v23 }
  0xc8   : > { %729 = vst [vmem:[%s6065_s12 + $0x360] sm:%s6241_s25] %v728_v24 }
  0xc9   : > { %731 = vst [vmem:[%s6065_s12 + $0x384] sm:%s6241_s25] %v730_v25 }
  0xca   : > { %733 = vst [vmem:[%s6065_s12 + $0x3a8] sm:%s6241_s25] %v732_v26 }
  0xcb   : > { %735 = vst [vmem:[%s6065_s12 + $0x3cc] sm:%s6241_s25] %v734_v27 }
  0xcc   : > { %737 = vst [vmem:[%s6065_s12 + $0x3f0] sm:%s6241_s25] %v736_v28 }
  0xcd   : > { %739 = vst [vmem:[%s6065_s12 + $0x414] sm:%s6241_s25] %v738_v29 }
  0xce   : > { %741 = vst [vmem:[%s6065_s12 + $0x438] sm:%s6241_s25] %v740_v30 }
  0xcf   : > { %743 = vst [vmem:[%s6065_s12 + $0x45c] sm:%s6241_s25] %v742_v31 }
  0xd0   : > { %745 = vst [vmem:[%s6065_s12 + $0x480] sm:%s6241_s25] %v744_v32 }
  0xd1   : > { %747 = vst [vmem:[%s6065_s12 + $0x4a4] sm:%s6241_s25] %v746_v33 }
  0xd2   : > { %749 = vst [vmem:[%s6065_s12 + $0x4c8] sm:%s6241_s25] %v748_v34 }
  0xd3   : > { %751 = vst [vmem:[%s6065_s12 + $0x4ec] sm:%s6241_s25] %v750_v35 }
  0xd4   : > { %753 = vst [vmem:[%s6065_s12 + $0x510] sm:%s6241_s25] %v752_v36 }
  0xd5   : > { %755 = vst [vmem:[%s6065_s12 + $0x534] sm:%s6241_s25] %v754_v37 }
  0xd6   : > { %757 = vst [vmem:[%s6065_s12 + $0x558] sm:%s6241_s25] %v756_v38 }
  0xd7   : > { %759 = vst [vmem:[%s6065_s12 + $0x57c] sm:%s6241_s25] %v758_v39 }
  0xd8   : > { %761 = vst [vmem:[%s6065_s12 + $0x5a0] sm:%s6241_s25] %v760_v40 }
  0xd9   : > { %763 = vst [vmem:[%s6065_s12 + $0x5c4] sm:%s6241_s25] %v762_v41 }
  0xda   : > { %765 = vst [vmem:[%s6065_s12 + $0x5e8] sm:%s6241_s25] %v764_v42 }
  0xdb   : > { %767 = vst [vmem:[%s6065_s12 + $0x60c] sm:%s6241_s25] %v766_v43 }
  0xdc   : > { %769 = vst [vmem:[%s6065_s12 + $0x630] sm:%s6241_s25] %v768_v44 }
  0xdd   : > { %771 = vst [vmem:[%s6065_s12 + $0x654] sm:%s6241_s25] %v770_v45 }
  0xde   : > { %773 = vst [vmem:[%s6065_s12 + $0x678] sm:%s6241_s25] %v772_v46 }
  0xdf   : > { %775 = vst [vmem:[%s6065_s12 + $0x69c] sm:%s6241_s25] %v774_v47 }
  0xe0   : > { %777 = vst [vmem:[%s6065_s12 + $0x6c0] sm:%s6241_s25] %v776_v48 }
  0xe1   : > { %779 = vst [vmem:[%s6065_s12 + $0x6e4] sm:%s6241_s25] %v778_v49 }
  0xe2   : > { %781 = vst [vmem:[%s6065_s12 + $0x708] sm:%s6241_s25] %v780_v50 }
  0xe3   : > { %783 = vst [vmem:[%s6065_s12 + $0x72c] sm:%s6241_s25] %v782_v51 }
  0xe4   : > { %785 = vst [vmem:[%s6065_s12 + $0x750] sm:%s6241_s25] %v784_v52 }
  0xe5   : > { %787 = vst [vmem:[%s6065_s12 + $0x774] sm:%s6241_s25] %v786_v53 }
  0xe6   : > { %789 = vst [vmem:[%s6065_s12 + $0x798] sm:%s6241_s25] %v788_v54 }
  0xe7   : > { %791 = vst [vmem:[%s6065_s12 + $0x7bc] sm:%s6241_s25] %v790_v55 }
  0xe8   : > { %793 = vst [vmem:[%s6065_s12 + $0x7e0] sm:%s6241_s25] %v792_v56 }
  0xe9   : > { %795 = vst [vmem:[%s6065_s12 + $0x804] sm:%s6241_s25] %v794_v57 }
  0xea   : > { %797 = vst [vmem:[%s6065_s12 + $0x828] sm:%s6241_s25] %v796_v58 }
  0xeb   : > { %799 = vst [vmem:[%s6065_s12 + $0x84c] sm:%s6241_s25] %v798_v59 }
  0xec   : > { %801 = vst [vmem:[%s6065_s12 + $0x870] sm:%s6241_s25] %v800_v60 }
  0xed   : > { %803 = vst [vmem:[%s6065_s12 + $0x894] sm:%s6241_s25] %v802_v61 }
  0xee   : > { %805 = vst [vmem:[%s6065_s12 + $0x8b8] sm:%s6241_s25] %v804_v62 }
  0xef   : > { %807 = vst [vmem:[%s6065_s12 + $0x8dc] sm:%s6241_s25] %v806_v63 }
  0xf0 PF: > { %p3822_p3 = scmp.ge.u32.totalorder %s5872_s13, 8 }
  0xf1   : > { %s5784_s15 = smov (!%p3822_p3), 1  }
  0xf2   : > { %228 = sbr.rel (%p3822_p3) target bundleno = 312 (0x138), region = 44  ;;  %s229_s9 = sshll.u32 (!%p3822_p3), %s5784_s15, %s5872_s13 }
  0xf3   : > { %s6501_s10 = sadd.s32 (!%p3822_p3), 4294967295, %s229_s9 }
  0xf7   : > { %v239_v0 = vld [vmem:[%s5870_s11] sm:%s6501_s10]  ;;  %v243_v2 = vld [vmem:[%s5870_s11 + $0x88] sm:%s6501_s10] }
  0xf8   : > { %v241_v1 = vld [vmem:[%s5870_s11 + $0x44] sm:%s6501_s10]  ;;  %240 = vst [vmem:[%s5874_s14] sm:%s6501_s10] %v239_v0 }
  0xf9   : > { %242 = vst [vmem:[%s5874_s14 + $0x24] sm:%s6501_s10] %v241_v1  ;;  %v245_v3 = vld [vmem:[%s5870_s11 + $0xcc] sm:%s6501_s10] }
  0xfa   : > { %244 = vst [vmem:[%s5874_s14 + $0x48] sm:%s6501_s10] %v243_v2  ;;  %v247_v4 = vld [vmem:[%s5870_s11 + $0x110] sm:%s6501_s10] }
  0xfb   : > { %246 = vst [vmem:[%s5874_s14 + $0x6c] sm:%s6501_s10] %v245_v3  ;;  %v249_v5 = vld [vmem:[%s5870_s11 + $0x154] sm:%s6501_s10] }
  0xfc   : > { %248 = vst [vmem:[%s5874_s14 + $0x90] sm:%s6501_s10] %v247_v4  ;;  %v251_v6 = vld [vmem:[%s5870_s11 + $0x198] sm:%s6501_s10] }
  0xfd   : > { %250 = vst [vmem:[%s5874_s14 + $0xb4] sm:%s6501_s10] %v249_v5  ;;  %v253_v7 = vld [vmem:[%s5870_s11 + $0x1dc] sm:%s6501_s10] }
  0xfe   : > { %252 = vst [vmem:[%s5874_s14 + $0xd8] sm:%s6501_s10] %v251_v6  ;;  %v255_v8 = vld [vmem:[%s5870_s11 + $0x220] sm:%s6501_s10] }
  0xff   : > { %254 = vst [vmem:[%s5874_s14 + $0xfc] sm:%s6501_s10] %v253_v7  ;;  %v257_v9 = vld [vmem:[%s5870_s11 + $0x264] sm:%s6501_s10] }
 0x100   : > { %256 = vst [vmem:[%s5874_s14 + $0x120] sm:%s6501_s10] %v255_v8  ;;  %v259_v10 = vld [vmem:[%s5870_s11 + $0x2a8] sm:%s6501_s10] }
 0x101   : > { %258 = vst [vmem:[%s5874_s14 + $0x144] sm:%s6501_s10] %v257_v9  ;;  %v261_v11 = vld [vmem:[%s5870_s11 + $0x2ec] sm:%s6501_s10] }
 0x102   : > { %260 = vst [vmem:[%s5874_s14 + $0x168] sm:%s6501_s10] %v259_v10  ;;  %v263_v12 = vld [vmem:[%s5870_s11 + $0x330] sm:%s6501_s10] }
 0x103   : > { %262 = vst [vmem:[%s5874_s14 + $0x18c] sm:%s6501_s10] %v261_v11  ;;  %v265_v13 = vld [vmem:[%s5870_s11 + $0x374] sm:%s6501_s10] }
 0x104   : > { %264 = vst [vmem:[%s5874_s14 + $0x1b0] sm:%s6501_s10] %v263_v12  ;;  %v267_v14 = vld [vmem:[%s5870_s11 + $0x3b8] sm:%s6501_s10] }
 0x105   : > { %266 = vst [vmem:[%s5874_s14 + $0x1d4] sm:%s6501_s10] %v265_v13  ;;  %v269_v15 = vld [vmem:[%s5870_s11 + $0x3fc] sm:%s6501_s10] }
 0x106   : > { %268 = vst [vmem:[%s5874_s14 + $0x1f8] sm:%s6501_s10] %v267_v14  ;;  %v271_v16 = vld [vmem:[%s5870_s11 + $0x440] sm:%s6501_s10] }
 0x107   : > { %270 = vst [vmem:[%s5874_s14 + $0x21c] sm:%s6501_s10] %v269_v15  ;;  %v273_v17 = vld [vmem:[%s5870_s11 + $0x484] sm:%s6501_s10] }
 0x108   : > { %272 = vst [vmem:[%s5874_s14 + $0x240] sm:%s6501_s10] %v271_v16  ;;  %v275_v18 = vld [vmem:[%s5870_s11 + $0x4c8] sm:%s6501_s10] }
 0x109   : > { %274 = vst [vmem:[%s5874_s14 + $0x264] sm:%s6501_s10] %v273_v17  ;;  %v277_v19 = vld [vmem:[%s5870_s11 + $0x50c] sm:%s6501_s10] }
 0x10a   : > { %276 = vst [vmem:[%s5874_s14 + $0x288] sm:%s6501_s10] %v275_v18  ;;  %v279_v20 = vld [vmem:[%s5870_s11 + $0x550] sm:%s6501_s10] }
 0x10b   : > { %278 = vst [vmem:[%s5874_s14 + $0x2ac] sm:%s6501_s10] %v277_v19  ;;  %v281_v21 = vld [vmem:[%s5870_s11 + $0x594] sm:%s6501_s10] }
 0x10c   : > { %280 = vst [vmem:[%s5874_s14 + $0x2d0] sm:%s6501_s10] %v279_v20  ;;  %v283_v22 = vld [vmem:[%s5870_s11 + $0x5d8] sm:%s6501_s10] }
 0x10d   : > { %282 = vst [vmem:[%s5874_s14 + $0x2f4] sm:%s6501_s10] %v281_v21  ;;  %v285_v23 = vld [vmem:[%s5870_s11 + $0x61c] sm:%s6501_s10] }
 0x10e   : > { %284 = vst [vmem:[%s5874_s14 + $0x318] sm:%s6501_s10] %v283_v22  ;;  %v287_v24 = vld [vmem:[%s5870_s11 + $0x660] sm:%s6501_s10] }
 0x10f   : > { %286 = vst [vmem:[%s5874_s14 + $0x33c] sm:%s6501_s10] %v285_v23  ;;  %v289_v25 = vld [vmem:[%s5870_s11 + $0x6a4] sm:%s6501_s10] }
 0x110   : > { %288 = vst [vmem:[%s5874_s14 + $0x360] sm:%s6501_s10] %v287_v24  ;;  %v291_v26 = vld [vmem:[%s5870_s11 + $0x6e8] sm:%s6501_s10] }
 0x111   : > { %290 = vst [vmem:[%s5874_s14 + $0x384] sm:%s6501_s10] %v289_v25  ;;  %v293_v27 = vld [vmem:[%s5870_s11 + $0x72c] sm:%s6501_s10] }
 0x112   : > { %292 = vst [vmem:[%s5874_s14 + $0x3a8] sm:%s6501_s10] %v291_v26  ;;  %v295_v28 = vld [vmem:[%s5870_s11 + $0x770] sm:%s6501_s10] }
 0x113   : > { %294 = vst [vmem:[%s5874_s14 + $0x3cc] sm:%s6501_s10] %v293_v27  ;;  %v297_v29 = vld [vmem:[%s5870_s11 + $0x7b4] sm:%s6501_s10] }
 0x114   : > { %296 = vst [vmem:[%s5874_s14 + $0x3f0] sm:%s6501_s10] %v295_v28  ;;  %v299_v30 = vld [vmem:[%s5870_s11 + $0x7f8] sm:%s6501_s10] }
 0x115   : > { %298 = vst [vmem:[%s5874_s14 + $0x414] sm:%s6501_s10] %v297_v29  ;;  %v301_v31 = vld [vmem:[%s5870_s11 + $0x83c] sm:%s6501_s10] }
 0x116   : > { %300 = vst [vmem:[%s5874_s14 + $0x438] sm:%s6501_s10] %v299_v30  ;;  %v303_v32 = vld [vmem:[%s5870_s11 + $0x880] sm:%s6501_s10] }
 0x117   : > { %302 = vst [vmem:[%s5874_s14 + $0x45c] sm:%s6501_s10] %v301_v31  ;;  %v305_v33 = vld [vmem:[%s5870_s11 + $0x8c4] sm:%s6501_s10] }
 0x118   : > { %304 = vst [vmem:[%s5874_s14 + $0x480] sm:%s6501_s10] %v303_v32  ;;  %v307_v34 = vld [vmem:[%s5870_s11 + $0x908] sm:%s6501_s10] }
 0x119   : > { %306 = vst [vmem:[%s5874_s14 + $0x4a4] sm:%s6501_s10] %v305_v33  ;;  %v309_v35 = vld [vmem:[%s5870_s11 + $0x94c] sm:%s6501_s10] }
 0x11a   : > { %308 = vst [vmem:[%s5874_s14 + $0x4c8] sm:%s6501_s10] %v307_v34  ;;  %v311_v36 = vld [vmem:[%s5870_s11 + $0x990] sm:%s6501_s10] }
 0x11b   : > { %310 = vst [vmem:[%s5874_s14 + $0x4ec] sm:%s6501_s10] %v309_v35  ;;  %v313_v37 = vld [vmem:[%s5870_s11 + $0x9d4] sm:%s6501_s10] }
 0x11c   : > { %312 = vst [vmem:[%s5874_s14 + $0x510] sm:%s6501_s10] %v311_v36  ;;  %v315_v38 = vld [vmem:[%s5870_s11 + $0xa18] sm:%s6501_s10] }
 0x11d   : > { %314 = vst [vmem:[%s5874_s14 + $0x534] sm:%s6501_s10] %v313_v37  ;;  %v317_v39 = vld [vmem:[%s5870_s11 + $0xa5c] sm:%s6501_s10] }
 0x11e   : > { %316 = vst [vmem:[%s5874_s14 + $0x558] sm:%s6501_s10] %v315_v38  ;;  %v319_v40 = vld [vmem:[%s5870_s11 + $0xaa0] sm:%s6501_s10] }
 0x11f   : > { %318 = vst [vmem:[%s5874_s14 + $0x57c] sm:%s6501_s10] %v317_v39  ;;  %v321_v41 = vld [vmem:[%s5870_s11 + $0xae4] sm:%s6501_s10] }
 0x120   : > { %320 = vst [vmem:[%s5874_s14 + $0x5a0] sm:%s6501_s10] %v319_v40  ;;  %v323_v42 = vld [vmem:[%s5870_s11 + $0xb28] sm:%s6501_s10] }
 0x121   : > { %322 = vst [vmem:[%s5874_s14 + $0x5c4] sm:%s6501_s10] %v321_v41  ;;  %v325_v43 = vld [vmem:[%s5870_s11 + $0xb6c] sm:%s6501_s10] }
 0x122   : > { %324 = vst [vmem:[%s5874_s14 + $0x5e8] sm:%s6501_s10] %v323_v42  ;;  %v327_v44 = vld [vmem:[%s5870_s11 + $0xbb0] sm:%s6501_s10] }
 0x123   : > { %326 = vst [vmem:[%s5874_s14 + $0x60c] sm:%s6501_s10] %v325_v43  ;;  %v329_v45 = vld [vmem:[%s5870_s11 + $0xbf4] sm:%s6501_s10] }
 0x124   : > { %328 = vst [vmem:[%s5874_s14 + $0x630] sm:%s6501_s10] %v327_v44  ;;  %v331_v46 = vld [vmem:[%s5870_s11 + $0xc38] sm:%s6501_s10] }
 0x125   : > { %330 = vst [vmem:[%s5874_s14 + $0x654] sm:%s6501_s10] %v329_v45  ;;  %v333_v47 = vld [vmem:[%s5870_s11 + $0xc7c] sm:%s6501_s10] }
 0x126   : > { %332 = vst [vmem:[%s5874_s14 + $0x678] sm:%s6501_s10] %v331_v46  ;;  %v335_v48 = vld [vmem:[%s5870_s11 + $0xcc0] sm:%s6501_s10] }
 0x127   : > { %334 = vst [vmem:[%s5874_s14 + $0x69c] sm:%s6501_s10] %v333_v47  ;;  %v337_v49 = vld [vmem:[%s5870_s11 + $0xd04] sm:%s6501_s10] }
 0x128   : > { %336 = vst [vmem:[%s5874_s14 + $0x6c0] sm:%s6501_s10] %v335_v48  ;;  %v339_v50 = vld [vmem:[%s5870_s11 + $0xd48] sm:%s6501_s10] }
 0x129   : > { %338 = vst [vmem:[%s5874_s14 + $0x6e4] sm:%s6501_s10] %v337_v49  ;;  %v341_v51 = vld [vmem:[%s5870_s11 + $0xd8c] sm:%s6501_s10] }
 0x12a   : > { %340 = vst [vmem:[%s5874_s14 + $0x708] sm:%s6501_s10] %v339_v50  ;;  %v343_v52 = vld [vmem:[%s5870_s11 + $0xdd0] sm:%s6501_s10] }
 0x12b   : > { %342 = vst [vmem:[%s5874_s14 + $0x72c] sm:%s6501_s10] %v341_v51  ;;  %v345_v53 = vld [vmem:[%s5870_s11 + $0xe14] sm:%s6501_s10] }
 0x12c   : > { %344 = vst [vmem:[%s5874_s14 + $0x750] sm:%s6501_s10] %v343_v52  ;;  %v347_v54 = vld [vmem:[%s5870_s11 + $0xe58] sm:%s6501_s10] }
 0x12d   : > { %346 = vst [vmem:[%s5874_s14 + $0x774] sm:%s6501_s10] %v345_v53  ;;  %v349_v55 = vld [vmem:[%s5870_s11 + $0xe9c] sm:%s6501_s10] }
 0x12e   : > { %348 = vst [vmem:[%s5874_s14 + $0x798] sm:%s6501_s10] %v347_v54  ;;  %v351_v56 = vld [vmem:[%s5870_s11 + $0xee0] sm:%s6501_s10] }
 0x12f   : > { %350 = vst [vmem:[%s5874_s14 + $0x7bc] sm:%s6501_s10] %v349_v55  ;;  %v353_v57 = vld [vmem:[%s5870_s11 + $0xf24] sm:%s6501_s10] }
 0x130   : > { %352 = vst [vmem:[%s5874_s14 + $0x7e0] sm:%s6501_s10] %v351_v56  ;;  %v355_v58 = vld [vmem:[%s5870_s11 + $0xf68] sm:%s6501_s10] }
 0x131   : > { %354 = vst [vmem:[%s5874_s14 + $0x804] sm:%s6501_s10] %v353_v57  ;;  %v357_v59 = vld [vmem:[%s5870_s11 + $0xfac] sm:%s6501_s10] }
 0x132   : > { %356 = vst [vmem:[%s5874_s14 + $0x828] sm:%s6501_s10] %v355_v58  ;;  %v359_v60 = vld [vmem:[%s5870_s11 + $0xff0] sm:%s6501_s10] }
 0x133   : > { %358 = vst [vmem:[%s5874_s14 + $0x84c] sm:%s6501_s10] %v357_v59  ;;  %v361_v61 = vld [vmem:[%s5870_s11 + $0x1034] sm:%s6501_s10] }
 0x134   : > { %360 = vst [vmem:[%s5874_s14 + $0x870] sm:%s6501_s10] %v359_v60  ;;  %v363_v62 = vld [vmem:[%s5870_s11 + $0x1078] sm:%s6501_s10] }
 0x135   : > { %362 = vst [vmem:[%s5874_s14 + $0x894] sm:%s6501_s10] %v361_v61  ;;  %v365_v63 = vld [vmem:[%s5870_s11 + $0x10bc] sm:%s6501_s10] }
 0x136   : > { %364 = vst [vmem:[%s5874_s14 + $0x8b8] sm:%s6501_s10] %v363_v62 }
 0x137   : > { %366 = vst [vmem:[%s5874_s14 + $0x8dc] sm:%s6501_s10] %v365_v63 }
 0x138 PF: > { %p3824_p4 = scmp.ge.s32.totalorder %s5685_s22, 1  ;;  %p824_p5 = scmp.lt.s32.totalorder %s5685_s22, 3 }
 0x13a   : > { %p825_p7 = pnand %p3824_p4, %p824_p5 }
 0x13b   : > { %s831_s26 = sand.u32 (!%p825_p7), 1, %s5669_s18   ;;  %s6915_s7 = smul.u32 (!%p825_p7), 9, %s5677_s20 }
 0x13c   : > { %828 = sbr.rel (%p825_p7) target bundleno = 975 (0x3cf), region = 88 }
 0x13d   : > { %s5301_s11 = smul.u32 (!%p825_p7), 2304, %s831_s26  ;;  %p881_p8 = scmp.lt.s32.totalorder (!%p825_p7), %s6915_s7, 16 }
 0x13e   : > { %s7244_s10 = smul.u32 (!%p825_p7), 72, %s831_s26 }
 0x13f   : > { %s6767_s14 = scalar_lea.vmem (!%p825_p7), [#allocation2], %s5301_s11 }
 0x140   : > { %s7263_s18 = scalar_lea.vmem (!%p825_p7), [#allocation3], %s7244_s10  }
 0x141   : > { %v893_v0 = vld [vmem:[%s7738_s0] sm:$0xff]  ;;  %v5785_v1 = vmov 0   ;;  %v5786_v2 = vmov 2   ;;  %v4079_v3 = vld [vmem:[%s6767_s14 + $0x1f8] sm:$0xf]  ;;  %v5787_v28 = vmov 1  }
 0x142   : > { %5543 = vset.pattern.permute.xlu0 %v5785_v1  ;;  %5545 = vset.pattern.permute.xlu1 %v5786_v2  ;;  %v5074_v4 = vld [vmem:[%s6767_s14 + $0x218] sm:$0xf0]  ;;  %v4367_v5 = vld [vmem:[%s6767_s14 + $0x438] sm:$0xf]  ;;  %v4043_v14 = vld [vmem:[%s6767_s14 + $0x1b0] sm:$0xf] }
 0x143   : > { %898 = vperm.xlu0 %5543, %v893_v0   ;;  %944 = vperm.xlu1 %5545, %v893_v0   ;;  %v4080_v6 = vor.u32 %v5074_v4, %v4079_v3  ;;  %v5146_v7 = vld [vmem:[%s6767_s14 + $0x458] sm:$0xf0]  ;;  %v4655_v8 = vld [vmem:[%s6767_s14 + $0x678] sm:$0xf]  ;;  %v5065_v16 = vld [vmem:[%s6767_s14 + $0x1d0] sm:$0xf0] }
 0x144   : > { %v5218_v9 = vld [vmem:[%s6767_s14 + $0x698] sm:$0xf0]  ;;  %v4368_v10 = vor.u32 %v5146_v7, %v4367_v5  ;;  %v4943_v12 = vld [vmem:[%s6767_s14 + $0x8b8] sm:$0xf]  ;;  %v4331_v17 = vld [vmem:[%s6767_s14 + $0x3f0] sm:$0xf]  ;;  %v4044_v19 = vor.u32 %v5065_v16, %v4043_v14 }
 0x145   : > { %v4656_v11 = vor.u32 %v5218_v9, %v4655_v8  ;;  %v5290_v13 = vld [vmem:[%s6767_s14 + $0x8d8] sm:$0xf0]  ;;  %2827 = vmatpush.bf16.msra.mxu0 %v4080_v6  ;;  %v5137_v18 = vld [vmem:[%s6767_s14 + $0x410] sm:$0xf0]  ;;  %v4619_v21 = vld [vmem:[%s6767_s14 + $0x630] sm:$0xf] }
 0x146   : > { %v4944_v15 = vor.u32 %v5290_v13, %v4943_v12  ;;  %2840 = vmatpush.bf16.msra.mxu1 %v4368_v10  ;;  %v4332_v20 = vor.u32 %v5137_v18, %v4331_v17  ;;  %v5209_v22 = vld [vmem:[%s6767_s14 + $0x650] sm:$0xf0]  ;;  %v4907_v23 = vld [vmem:[%s6767_s14 + $0x870] sm:$0xf]  ;;  %v4007_v26 = vld [vmem:[%s6767_s14 + $0x168] sm:$0xf] }
 0x147   : > { %2853 = vmatpush.bf16.msra.mxu2 %v4656_v11  ;;  %v4620_v24 = vor.u32 %v5209_v22, %v4619_v21  ;;  %v5281_v25 = vld [vmem:[%s6767_s14 + $0x890] sm:$0xf0]  ;;  %v5056_v27 = vld [vmem:[%s6767_s14 + $0x188] sm:$0xf0]  ;;  %v5788_v29 = vmov 3   ;;  %s882_s8 = scalar_select %p881_p8, %s6915_s7, 16 }
 0x148   : > { %2866 = vmatpush.bf16.msra.mxu3 %v4944_v15  ;;  %v4908_v30 = vor.u32 %v5281_v25, %v4907_v23  ;;  %v4295_v31 = vld [vmem:[%s6767_s14 + $0x3a8] sm:$0xf]  ;;  %v5128_v32 = vld [vmem:[%s6767_s14 + $0x3c8] sm:$0xf0]  ;;  %v4008_v37 = vor.u32 %v5056_v27, %v4007_v26  ;;  %v3971_v39 = vld [vmem:[%s6767_s14 + $0x120] sm:$0xf] }
 0x149   : > { %v4583_v33 = vld [vmem:[%s6767_s14 + $0x5e8] sm:$0xf]  ;;  %v5200_v34 = vld [vmem:[%s6767_s14 + $0x608] sm:$0xf0]  ;;  %2828 = vmatpush.bf16.msra.mxu0 %v4044_v19  ;;  %v4296_v38 = vor.u32 %v5128_v32, %v4295_v31  ;;  %v5047_v40 = vld [vmem:[%s6767_s14 + $0x140] sm:$0xf0]  ;;  %s6958_s9 = scalar_lea.vmem %s7742_s4, %s882_s8 }
 0x14a   : > { %v4871_v35 = vld [vmem:[%s6767_s14 + $0x828] sm:$0xf]  ;;  %v5272_v36 = vld [vmem:[%s6767_s14 + $0x848] sm:$0xf0]  ;;  %2841 = vmatpush.bf16.msra.mxu1 %v4332_v20  ;;  %v4584_v41 = vor.u32 %v5200_v34, %v4583_v33  ;;  %v4259_v43 = vld [vmem:[%s6767_s14 + $0x360] sm:$0xf]  ;;  %v3972_v49 = vor.u32 %v5047_v40, %v3971_v39 }
 0x14b   : > { %5544 = vset.pattern.permute.xlu0 %v5787_v28  ;;  %5546 = vset.pattern.permute.xlu1 %v5788_v29  ;;  %v4872_v42 = vor.u32 %v5272_v36, %v4871_v35  ;;  %v5119_v44 = vld [vmem:[%s6767_s14 + $0x380] sm:$0xf0]  ;;  %v4547_v45 = vld [vmem:[%s6767_s14 + $0x5a0] sm:$0xf]  ;;  %v3935_v51 = vld [vmem:[%s6767_s14 + $0xd8] sm:$0xf] }
 0x14c   : > { %920 = vperm.xlu0 %5544, %v893_v0   ;;  %968 = vperm.xlu1 %5546, %v893_v0   ;;  %v5191_v46 = vld [vmem:[%s6767_s14 + $0x5c0] sm:$0xf0]  ;;  %v4835_v47 = vld [vmem:[%s6767_s14 + $0x7e0] sm:$0xf]  ;;  %v4260_v50 = vor.u32 %v5119_v44, %v4259_v43  ;;  %v5038_v52 = vld [vmem:[%s6767_s14 + $0xf8] sm:$0xf0] }
 0x14d   : > { %2854 = vmatpush.bf16.msra.mxu2 %v4620_v24  ;;  %2867 = vmatpush.bf16.msra.mxu3 %v4908_v30  ;;  %v5263_v48 = vld [vmem:[%s6767_s14 + $0x800] sm:$0xf0]  ;;  %v4548_v53 = vor.u32 %v5191_v46, %v4547_v45  ;;  %v4223_v55 = vld [vmem:[%s6767_s14 + $0x318] sm:$0xf]  ;;  %v5110_v56 = vld [vmem:[%s6767_s14 + $0x338] sm:$0xf0]  ;;  %v3936_v61 = vor.u32 %v5038_v52, %v3935_v51 }
 0x14e   : > { %2829 = vmatpush.bf16.msra.mxu0 %v4008_v37  ;;  %2842 = vmatpush.bf16.msra.mxu1 %v4296_v38  ;;  %v4836_v54 = vor.u32 %v5263_v48, %v4835_v47  ;;  %v4511_v57 = vld [vmem:[%s6767_s14 + $0x558] sm:$0xf]  ;;  %v5182_v58 = vld [vmem:[%s6767_s14 + $0x578] sm:$0xf0]  ;;  %v4224_v62 = vor.u32 %v5110_v56, %v4223_v55  ;;  %v3899_v63 = vld [vmem:[%s6767_s14 + $0x90] sm:$0xf] }
 0x14f   : > { %v4799_v59 = vld [vmem:[%s6767_s14 + $0x798] sm:$0xf]  ;;  %v5254_v60 = vld [vmem:[%s6767_s14 + $0x7b8] sm:$0xf0]  ;;  %v5029_v0 = vld [vmem:[%s6767_s14 + $0xb0] sm:$0xf0]  ;;  %v4512_v1 = vor.u32 %v5182_v58, %v4511_v57 }
 0x150   : > { %v4800_v2 = vor.u32 %v5254_v60, %v4799_v59  ;;  %v4187_v3 = vld [vmem:[%s6767_s14 + $0x2d0] sm:$0xf]  ;;  %v5101_v4 = vld [vmem:[%s6767_s14 + $0x2f0] sm:$0xf0]  ;;  %v3900_v9 = vor.u32 %v5029_v0, %v3899_v63  ;;  %v3863_v11 = vld [vmem:[%s6767_s14 + $0x48] sm:$0xf] }
 0x151   : > { %2855 = vmatpush.bf16.msra.mxu2 %v4584_v41  ;;  %2868 = vmatpush.bf16.msra.mxu3 %v4872_v42  ;;  %v4475_v5 = vld [vmem:[%s6767_s14 + $0x510] sm:$0xf]  ;;  %v5173_v6 = vld [vmem:[%s6767_s14 + $0x530] sm:$0xf0]  ;;  %v4188_v10 = vor.u32 %v5101_v4, %v4187_v3  ;;  %v5020_v12 = vld [vmem:[%s6767_s14 + $0x68] sm:$0xf0] }
 0x152   : > { %2830 = vmatpush.bf16.msra.mxu0 %v3972_v49  ;;  %2843 = vmatpush.bf16.msra.mxu1 %v4260_v50  ;;  %v4763_v7 = vld [vmem:[%s6767_s14 + $0x750] sm:$0xf]  ;;  %v5245_v8 = vld [vmem:[%s6767_s14 + $0x770] sm:$0xf0]  ;;  %v4476_v13 = vor.u32 %v5173_v6, %v4475_v5  ;;  %v4151_v15 = vld [vmem:[%s6767_s14 + $0x288] sm:$0xf]  ;;  %v3864_v22 = vor.u32 %v5020_v12, %v3863_v11 }
 0x153   : > { %v4764_v14 = vor.u32 %v5245_v8, %v4763_v7  ;;  %v5092_v16 = vld [vmem:[%s6767_s14 + $0x2a8] sm:$0xf0]  ;;  %v4439_v17 = vld [vmem:[%s6767_s14 + $0x4c8] sm:$0xf]  ;;  %v3827_v21 = vld [vmem:[%s6767_s14] sm:$0xf] }
 0x154   : > { %5547 = vset.pattern.permute.xlu0 %v5788_v29  ;;  %v5164_v18 = vld [vmem:[%s6767_s14 + $0x4e8] sm:$0xf0]  ;;  %v4727_v19 = vld [vmem:[%s6767_s14 + $0x708] sm:$0xf]  ;;  %v4152_v23 = vor.u32 %v5092_v16, %v4151_v15  ;;  %v5011_v24 = vld [vmem:[%s6767_s14 + $0x20] sm:$0xf0] }
 0x155   : > { %2856 = vmatpush.bf16.msra.mxu2 %v4548_v53  ;;  %2869 = vmatpush.bf16.msra.mxu3 %v4836_v54  ;;  %v5236_v20 = vld [vmem:[%s6767_s14 + $0x728] sm:$0xf0]  ;;  %v4115_v25 = vld [vmem:[%s6767_s14 + $0x240] sm:$0xf]  ;;  %v5083_v26 = vld [vmem:[%s6767_s14 + $0x260] sm:$0xf0]  ;;  %v4440_v27 = vor.u32 %v5164_v18, %v4439_v17  ;;  %v3828_v38 = vor.u32 %v5011_v24, %v3827_v21 }
 0x156   : > { %2831 = vmatpush.bf16.msra.mxu0 %v3936_v61  ;;  %2844 = vmatpush.bf16.msra.mxu1 %v4224_v62  ;;  %v4728_v28 = vor.u32 %v5236_v20, %v4727_v19  ;;  %v4403_v29 = vld [vmem:[%s6767_s14 + $0x480] sm:$0xf]  ;;  %v5155_v30 = vld [vmem:[%s6767_s14 + $0x4a0] sm:$0xf0]  ;;  %v5070_v33 = vld [vmem:[%s6767_s14 + $0x1fc] sm:$0xf]  ;;  %v4116_v39 = vor.u32 %v5083_v26, %v4115_v25 }
 0x157   : > { %v4691_v31 = vld [vmem:[%s6767_s14 + $0x6c0] sm:$0xf]  ;;  %v5227_v32 = vld [vmem:[%s6767_s14 + $0x6e0] sm:$0xf0]  ;;  %v5142_v35 = vld [vmem:[%s6767_s14 + $0x43c] sm:$0xf]  ;;  %v4404_v43 = vor.u32 %v5155_v30, %v4403_v29 }
 0x158   : > { %v4081_v34 = vld [vmem:[%s6767_s14 + $0x21c] sm:$0xf0]  ;;  %v5214_v37 = vld [vmem:[%s6767_s14 + $0x67c] sm:$0xf]  ;;  %v4692_v44 = vor.u32 %v5227_v32, %v4691_v31  ;;  %v5061_v47 = vld [vmem:[%s6767_s14 + $0x1b4] sm:$0xf] }
 0x159   : > { %2857 = vmatpush.bf16.msra.mxu2 %v4512_v1  ;;  %2870 = vmatpush.bf16.msra.mxu3 %v4800_v2  ;;  %v4369_v36 = vld [vmem:[%s6767_s14 + $0x45c] sm:$0xf0]  ;;  %v5286_v41 = vld [vmem:[%s6767_s14 + $0x8bc] sm:$0xf]  ;;  %v4084_v45 = vor.u32 %v5070_v33, %v4081_v34  ;;  %v4045_v48 = vld [vmem:[%s6767_s14 + $0x1d4] sm:$0xf0] }
 0x15a   : > { %2832 = vmatpush.bf16.msra.mxu0 %v3900_v9  ;;  %2845 = vmatpush.bf16.msra.mxu1 %v4188_v10  ;;  %v4657_v40 = vld [vmem:[%s6767_s14 + $0x69c] sm:$0xf0]  ;;  %v4372_v46 = vor.u32 %v5142_v35, %v4369_v36  ;;  %v5133_v51 = vld [vmem:[%s6767_s14 + $0x3f4] sm:$0xf]  ;;  %v4333_v52 = vld [vmem:[%s6767_s14 + $0x414] sm:$0xf0]  ;;  %v4048_v57 = vor.u32 %v5061_v47, %v4045_v48 }
 0x15b   : > { %v4945_v42 = vld [vmem:[%s6767_s14 + $0x8dc] sm:$0xf0]  ;;  %v4660_v49 = vor.u32 %v5214_v37, %v4657_v40  ;;  %v5205_v53 = vld [vmem:[%s6767_s14 + $0x634] sm:$0xf]  ;;  %v4621_v54 = vld [vmem:[%s6767_s14 + $0x654] sm:$0xf0]  ;;  %v4336_v58 = vor.u32 %v5133_v51, %v4333_v52 }
 0x15c   : > { %v4948_v50 = vor.u32 %v5286_v41, %v4945_v42  ;;  %v5277_v55 = vld [vmem:[%s6767_s14 + $0x874] sm:$0xf]  ;;  %v4909_v56 = vld [vmem:[%s6767_s14 + $0x894] sm:$0xf0]  ;;  %v4624_v59 = vor.u32 %v5205_v53, %v4621_v54  ;;  %v5052_v61 = vld [vmem:[%s6767_s14 + $0x16c] sm:$0xf] }
 0x15d   : > { %2858 = vmatpush.bf16.msra.mxu2 %v4476_v13  ;;  %2871 = vmatpush.bf16.msra.mxu3 %v4764_v14  ;;  %v4912_v60 = vor.u32 %v5277_v55, %v4909_v56  ;;  %v4009_v62 = vld [vmem:[%s6767_s14 + $0x18c] sm:$0xf0]  ;;  %v5124_v63 = vld [vmem:[%s6767_s14 + $0x3ac] sm:$0xf]  ;;  %v5043_v9 = vld [vmem:[%s6767_s14 + $0x124] sm:$0xf] }
 0x15e   : > { %2833 = vmatpush.bf16.msra.mxu0 %v3864_v22  ;;  %2846 = vmatpush.bf16.msra.mxu1 %v4152_v23  ;;  %v4012_v0 = vor.u32 %v5052_v61, %v4009_v62  ;;  %v4297_v1 = vld [vmem:[%s6767_s14 + $0x3cc] sm:$0xf0]  ;;  %v5196_v2 = vld [vmem:[%s6767_s14 + $0x5ec] sm:$0xf]  ;;  %v3973_v10 = vld [vmem:[%s6767_s14 + $0x144] sm:$0xf0] }
 0x15f   : > { %v4585_v3 = vld [vmem:[%s6767_s14 + $0x60c] sm:$0xf0]  ;;  %v4300_v4 = vor.u32 %v5124_v63, %v4297_v1  ;;  %v5268_v6 = vld [vmem:[%s6767_s14 + $0x82c] sm:$0xf]  ;;  %v3976_v11 = vor.u32 %v5043_v9, %v3973_v10  ;;  %v5115_v12 = vld [vmem:[%s6767_s14 + $0x364] sm:$0xf] }
 0x160   : > { %v4588_v5 = vor.u32 %v5196_v2, %v4585_v3  ;;  %v4873_v7 = vld [vmem:[%s6767_s14 + $0x84c] sm:$0xf0]  ;;  %v4261_v13 = vld [vmem:[%s6767_s14 + $0x384] sm:$0xf0]  ;;  %v5187_v15 = vld [vmem:[%s6767_s14 + $0x5a4] sm:$0xf] }
 0x161   : > { %2859 = vmatpush.bf16.msra.mxu2 %v4440_v27  ;;  %2872 = vmatpush.bf16.msra.mxu3 %v4728_v28  ;;  %v4876_v8 = vor.u32 %v5268_v6, %v4873_v7  ;;  %v4264_v14 = vor.u32 %v5115_v12, %v4261_v13  ;;  %v4549_v16 = vld [vmem:[%s6767_s14 + $0x5c4] sm:$0xf0]  ;;  %v5259_v18 = vld [vmem:[%s6767_s14 + $0x7e4] sm:$0xf]  ;;  %v5034_v21 = vld [vmem:[%s6767_s14 + $0xdc] sm:$0xf] }
 0x162   : > { %2834 = vmatpush.bf16.msra.mxu0 %v3828_v38  ;;  %2847 = vmatpush.bf16.msra.mxu1 %v4116_v39  ;;  %v4552_v17 = vor.u32 %v5187_v15, %v4549_v16  ;;  %v4837_v19 = vld [vmem:[%s6767_s14 + $0x804] sm:$0xf0]  ;;  %v3937_v22 = vld [vmem:[%s6767_s14 + $0xfc] sm:$0xf0]  ;;  %v5106_v24 = vld [vmem:[%s6767_s14 + $0x31c] sm:$0xf] }
 0x163   : > { %v4840_v20 = vor.u32 %v5259_v18, %v4837_v19  ;;  %v3940_v23 = vor.u32 %v5034_v21, %v3937_v22  ;;  %v4225_v25 = vld [vmem:[%s6767_s14 + $0x33c] sm:$0xf0]  ;;  %v5178_v27 = vld [vmem:[%s6767_s14 + $0x55c] sm:$0xf]  ;;  %v5025_v33 = vld [vmem:[%s6767_s14 + $0x94] sm:$0xf] }
 0x164   : > { %v4228_v26 = vor.u32 %v5106_v24, %v4225_v25  ;;  %v4513_v28 = vld [vmem:[%s6767_s14 + $0x57c] sm:$0xf0]  ;;  %v5250_v29 = vld [vmem:[%s6767_s14 + $0x79c] sm:$0xf]  ;;  %v3901_v34 = vld [vmem:[%s6767_s14 + $0xb4] sm:$0xf0] }
 0x165   : > { %2860 = vmatpush.bf16.msra.mxu2 %v4404_v43  ;;  %2873 = vmatpush.bf16.msra.mxu3 %v4692_v44  ;;  %v4516_v30 = vor.u32 %v5178_v27, %v4513_v28  ;;  %v4801_v31 = vld [vmem:[%s6767_s14 + $0x7bc] sm:$0xf0]  ;;  %v5097_v35 = vld [vmem:[%s6767_s14 + $0x2d4] sm:$0xf]  ;;  %v3904_v36 = vor.u32 %v5025_v33, %v3901_v34  ;;  %v4189_v37 = vld [vmem:[%s6767_s14 + $0x2f4] sm:$0xf0] }
 0x166   : > { %2879 = vmatpush.bf16.msrb.mxu0 %v4084_v45  ;;  %2892 = vmatpush.bf16.msrb.mxu1 %v4372_v46  ;;  %v4804_v32 = vor.u32 %v5250_v29, %v4801_v31  ;;  %v5169_v38 = vld [vmem:[%s6767_s14 + $0x514] sm:$0xf]  ;;  %v4477_v39 = vld [vmem:[%s6767_s14 + $0x534] sm:$0xf0]  ;;  %v4192_v40 = vor.u32 %v5097_v35, %v4189_v37  ;;  %v5016_v44 = vld [vmem:[%s6767_s14 + $0x4c] sm:$0xf] }
 0x167   : > { %v4480_v41 = vor.u32 %v5169_v38, %v4477_v39  ;;  %v5241_v42 = vld [vmem:[%s6767_s14 + $0x754] sm:$0xf]  ;;  %v4765_v43 = vld [vmem:[%s6767_s14 + $0x774] sm:$0xf0]  ;;  %v3865_v46 = vld [vmem:[%s6767_s14 + $0x6c] sm:$0xf0] }
 0x168   : > { %v4768_v45 = vor.u32 %v5241_v42, %v4765_v43  ;;  %v5088_v47 = vld [vmem:[%s6767_s14 + $0x28c] sm:$0xf]  ;;  %v4153_v48 = vld [vmem:[%s6767_s14 + $0x2ac] sm:$0xf0]  ;;  %v4117_v61 = vld [vmem:[%s6767_s14 + $0x264] sm:$0xf0] }
 0x169   : > { %2905 = vmatpush.bf16.msrb.mxu2 %v4660_v49  ;;  %2918 = vmatpush.bf16.msrb.mxu3 %v4948_v50  ;;  %v3868_v49 = vor.u32 %v5016_v44, %v3865_v46  ;;  %v4156_v50 = vor.u32 %v5088_v47, %v4153_v48  ;;  %v5160_v51 = vld [vmem:[%s6767_s14 + $0x4cc] sm:$0xf]  ;;  %v4441_v52 = vld [vmem:[%s6767_s14 + $0x4ec] sm:$0xf0]  ;;  %v5151_v62 = vld [vmem:[%s6767_s14 + $0x484] sm:$0xf] }
 0x16a   : > { %2880 = vmatpush.bf16.msrb.mxu0 %v4048_v57  ;;  %2893 = vmatpush.bf16.msrb.mxu1 %v4336_v58  ;;  %v5232_v53 = vld [vmem:[%s6767_s14 + $0x70c] sm:$0xf]  ;;  %v4444_v54 = vor.u32 %v5160_v51, %v4441_v52  ;;  %v4729_v55 = vld [vmem:[%s6767_s14 + $0x72c] sm:$0xf0]  ;;  %v5007_v57 = vld [vmem:[%s6767_s14 + $0x4] sm:$0xf] }
 0x16b   : > { %v4732_v56 = vor.u32 %v5232_v53, %v4729_v55  ;;  %v3829_v58 = vld [vmem:[%s6767_s14 + $0x24] sm:$0xf0]  ;;  %v5223_v2 = vld [vmem:[%s6767_s14 + $0x6c4] sm:$0xf]  ;;  %v895_v6 = vld [vmem:[%s7739_s1 + $0x8] sm:$0xff]  ;;  %s3312_s13 = ssub.s32 (%p5856_p6), 17, %s6915_s7 }
 0x16c   : > { %v4405_v63 = vld [vmem:[%s6767_s14 + $0x4a4] sm:$0xf0]  ;;  %v905_v9 = vperm.slane %v895_v6, 0  ;;  %v906_v10 = vperm.slane %v895_v6, 4  ;;  %v949_v15 = vperm.slane %v895_v6, 2  ;;  %v950_v16 = vperm.slane %v895_v6, 6 }
 0x16d   : > { %2906 = vmatpush.bf16.msrb.mxu2 %v4624_v59  ;;  %2919 = vmatpush.bf16.msrb.mxu3 %v4912_v60  ;;  %v5079_v59 = vld [vmem:[%s6767_s14 + $0x244] sm:$0xf]  ;;  %v3832_v60 = vor.u32 %v5007_v57, %v3829_v58  ;;  %v4408_v1 = vor.u32 %v5151_v62, %v4405_v63  ;;  %v4693_v3 = vld [vmem:[%s6767_s14 + $0x6e4] sm:$0xf0]  ;;  %v925_v19 = vperm.slane %v895_v6, 1  ;;  %v974_v24 = vperm.slane %v895_v6, 7 }
 0x16e   : > { %2881 = vmatpush.bf16.msrb.mxu0 %v4012_v0  ;;  %2894 = vmatpush.bf16.msrb.mxu1 %v4300_v4  ;;  %v4120_v0 = vor.u32 %v5079_v59, %v4117_v61  ;;  %v4696_v4 = vor.u32 %v5223_v2, %v4693_v3  ;;  %v913_v27 = vperm.slane %v905_v9, 0  ;;  %v914_v28 = vperm.slane %v906_v10, 0  ;;  %v991_v55 = vld [vmem:[%s7740_s2] sm:$0xf]  ;;  %s5295_s12 = smul.u32 (%p5856_p6), 72, %s5677_s20  ;;  %p3313_p9 = scmp.lt.s32.totalorder (%p5856_p6), %s3312_s13, 9 }
 0x16f   : > { %v957_v31 = vperm.slane %v949_v15, 2  ;;  %v933_v35 = vperm.slane %v925_v19, 1  ;;  %v995_v2 = vperm.slane %v991_v55, 2  ;;  %v996_v3 = vperm.slane %v991_v55, 3  ;;  %v5147_v19 = vld [vmem:[%s6767_s14 + $0x460] sm:$0xf0] }
 0x171   : > { %2907 = vmatpush.bf16.msrb.mxu2 %v4588_v5  ;;  %2920 = vmatpush.bf16.msrb.mxu3 %v4876_v8  ;;  %v894_v5 = vld [vmem:[%s7739_s1] sm:$0xff] }
 0x172   : > { %2882 = vmatpush.bf16.msrb.mxu0 %v3976_v11  ;;  %2895 = vmatpush.bf16.msrb.mxu1 %v4264_v14  ;;  %v903_v7 = vperm.slane %v894_v5, 0  ;;  %v904_v8 = vperm.slane %v894_v5, 4  ;;  %v947_v13 = vperm.slane %v894_v5, 2  ;;  %v948_v14 = vperm.slane %v894_v5, 6 }
 0x173   : > { %v924_v18 = vperm.slane %v894_v5, 5  ;;  %v971_v21 = vperm.slane %v894_v5, 3  ;;  %v972_v22 = vperm.slane %v894_v5, 7 }
 0x174   : > { %v911_v25 = vperm.slane %v903_v7, 0  ;;  %v955_v29 = vperm.slane %v947_v13, 2 }
 0x175   : > { %2908 = vmatpush.bf16.msrb.mxu2 %v4552_v17  ;;  %2921 = vmatpush.bf16.msrb.mxu3 %v4840_v20  ;;  %v923_v17 = vperm.slane %v894_v5, 1  ;;  %v926_v20 = vperm.slane %v895_v6, 5  ;;  %v932_v34 = vperm.slane %v924_v18, 1  ;;  %v979_v37 = vperm.slane %v971_v21, 3  ;;  %v4375_v18 = vld [vmem:[%s6767_s14 + $0x440] sm:$0xf] }
 0x176   : > { %2883 = vmatpush.bf16.msrb.mxu0 %v3940_v23  ;;  %2896 = vmatpush.bf16.msrb.mxu1 %v4228_v26  ;;  %v973_v23 = vperm.slane %v895_v6, 3  ;;  %v912_v26 = vperm.slane %v904_v8, 0  ;;  %v980_v38 = vperm.slane %v972_v22, 3  ;;  %v5219_v21 = vld [vmem:[%s6767_s14 + $0x6a0] sm:$0xf0] }
 0x177   : > { %v931_v33 = vperm.slane %v923_v17, 1  ;;  %v5075_v17 = vld [vmem:[%s6767_s14 + $0x220] sm:$0xf0]  ;;  %v4951_v22 = vld [vmem:[%s6767_s14 + $0x8c0] sm:$0xf] }
 0x178   : > { %v981_v39 = vperm.slane %v973_v23, 3 }
 0x179   : > { %2909 = vmatpush.bf16.msrb.mxu2 %v4516_v30  ;;  %2922 = vmatpush.bf16.msrb.mxu3 %v4804_v32  ;;  %v956_v30 = vperm.slane %v948_v14, 2  ;;  %v958_v32 = vperm.slane %v950_v16, 2 }
 0x17a   : > { %2884 = vmatpush.bf16.msrb.mxu0 %v3904_v36  ;;  %2897 = vmatpush.bf16.msrb.mxu1 %v4192_v40  ;;  %v934_v36 = vperm.slane %v926_v20, 1  ;;  %v982_v40 = vperm.slane %v974_v24, 3  ;;  %v4663_v20 = vld [vmem:[%s6767_s14 + $0x680] sm:$0xf] }
 0x17d   : > { %2910 = vmatpush.bf16.msrb.mxu2 %v4480_v41  ;;  %2923 = vmatpush.bf16.msrb.mxu3 %v4768_v45 }
 0x17e   : > { %2885 = vmatpush.bf16.msrb.mxu0 %v3868_v49  ;;  %2898 = vmatpush.bf16.msrb.mxu1 %v4156_v50 }
 0x181   : > { %2911 = vmatpush.bf16.msrb.mxu2 %v4444_v54  ;;  %2924 = vmatpush.bf16.msrb.mxu3 %v4732_v56 }
 0x182   : > { %2886 = vmatpush.bf16.msrb.mxu0 %v3832_v60  ;;  %2899 = vmatpush.bf16.msrb.mxu1 %v4120_v0  ;;  %v993_v0 = vperm.slane %v991_v55, 0 }
 0x185   : > { %2912 = vmatpush.bf16.msrb.mxu2 %v4408_v1  ;;  %2925 = vmatpush.bf16.msrb.mxu3 %v4696_v4  ;;  %v994_v1 = vperm.slane %v991_v55, 1  ;;  %v5273_v55 = vld [vmem:[%s6767_s14 + $0x850] sm:$0xf0] }
 0x1b5   : > { %v899_v11 = vpop.permute.xlu0 %898  ;;  %v945_v12 = vpop.permute.xlu1 %944 }
 0x1b6   : > { %v915_v41 = vmul.f32 %v911_v25, %v899_v11  ;;  %v916_v42 = vmul.f32 %v912_v26, %v899_v11  ;;  %v917_v43 = vmul.f32 %v913_v27, %v899_v11  ;;  %v918_v44 = vmul.f32 %v914_v28, %v899_v11  ;;  %v5291_v27 = vld [vmem:[%s6767_s14 + $0x8e0] sm:$0xf0] }
 0x1b7   : > { %v959_v45 = vmul.f32 %v955_v29, %v945_v12  ;;  %v960_v46 = vmul.f32 %v956_v30, %v945_v12  ;;  %v961_v47 = vmul.f32 %v957_v31, %v945_v12  ;;  %v962_v48 = vmul.f32 %v958_v32, %v945_v12  ;;  %v4087_v12 = vld [vmem:[%s6767_s14 + $0x200] sm:$0xf] }
 0x1b8   : > { %v4088_v28 = vor.u32 %v5075_v17, %v4087_v12  ;;  %v4376_v29 = vor.u32 %v5147_v19, %v4375_v18  ;;  %v4519_v12 = vld [vmem:[%s6767_s14 + $0x560] sm:$0xf]  ;;  %v3907_v18 = vld [vmem:[%s6767_s14 + $0x98] sm:$0xf]  ;;  %v5030_v19 = vld [vmem:[%s6767_s14 + $0xb8] sm:$0xf0] }
 0x1be   : > { %v921_v49 = vpop.permute.xlu0 %920  ;;  %v969_v50 = vpop.permute.xlu1 %968 }
 0x1bf   : > { %v935_v51 = vmul.f32 %v931_v33, %v921_v49  ;;  %v936_v52 = vmul.f32 %v932_v34, %v921_v49  ;;  %v937_v53 = vmul.f32 %v933_v35, %v921_v49  ;;  %v938_v54 = vmul.f32 %v934_v36, %v921_v49  ;;  %v4051_v34 = vld [vmem:[%s6767_s14 + $0x1b8] sm:$0xf]  ;;  %v5066_v35 = vld [vmem:[%s6767_s14 + $0x1d8] sm:$0xf0] }
 0x1c0   : > { %v983_v56 = vmul.f32 %v979_v37, %v969_v50  ;;  %v984_v57 = vmul.f32 %v980_v38, %v969_v50  ;;  %v985_v58 = vmul.f32 %v981_v39, %v969_v50  ;;  %v986_v59 = vmul.f32 %v982_v40, %v969_v50  ;;  %v4339_v38 = vld [vmem:[%s6767_s14 + $0x3f8] sm:$0xf]  ;;  %v5138_v39 = vld [vmem:[%s6767_s14 + $0x418] sm:$0xf0] }
 0x1c1   : > { %v939_v60 = vadd.f32 %v935_v51, %v915_v41  ;;  %v940_v61 = vadd.f32 %v936_v52, %v916_v42  ;;  %v941_v62 = vadd.f32 %v937_v53, %v917_v43  ;;  %v942_v63 = vadd.f32 %v938_v54, %v918_v44  ;;  %v4627_v40 = vld [vmem:[%s6767_s14 + $0x638] sm:$0xf]  ;;  %v5210_v41 = vld [vmem:[%s6767_s14 + $0x658] sm:$0xf0]  ;;  %v5129_v51 = vld [vmem:[%s6767_s14 + $0x3d0] sm:$0xf0] }
 0x1c2   : > { %v4664_v36 = vor.u32 %v5219_v21, %v4663_v20  ;;  %v4952_v37 = vor.u32 %v5291_v27, %v4951_v22  ;;  %v4915_v42 = vld [vmem:[%s6767_s14 + $0x878] sm:$0xf]  ;;  %v5282_v43 = vld [vmem:[%s6767_s14 + $0x898] sm:$0xf0]  ;;  %v4052_v44 = vor.u32 %v5066_v35, %v4051_v34  ;;  %v4628_v49 = vor.u32 %v5210_v41, %v4627_v40  ;;  %v4591_v52 = vld [vmem:[%s6767_s14 + $0x5f0] sm:$0xf] }
 0x1c3   : > { %v963_v4 = vadd.f32 %v959_v45, %v939_v60  ;;  %v964_v5 = vadd.f32 %v960_v46, %v940_v61  ;;  %v965_v6 = vadd.f32 %v961_v47, %v941_v62  ;;  %v966_v7 = vadd.f32 %v962_v48, %v942_v63  ;;  %v4015_v46 = vld [vmem:[%s6767_s14 + $0x170] sm:$0xf]  ;;  %v5057_v47 = vld [vmem:[%s6767_s14 + $0x190] sm:$0xf0]  ;;  %v4267_v60 = vld [vmem:[%s6767_s14 + $0x368] sm:$0xf] }
 0x1c4   : > { %v4340_v45 = vor.u32 %v5138_v39, %v4339_v38  ;;  %v4303_v48 = vld [vmem:[%s6767_s14 + $0x3b0] sm:$0xf]  ;;  %v4916_v50 = vor.u32 %v5282_v43, %v4915_v42  ;;  %v5201_v53 = vld [vmem:[%s6767_s14 + $0x610] sm:$0xf0]  ;;  %v5120_v63 = vld [vmem:[%s6767_s14 + $0x388] sm:$0xf0] }
 0x1c5   : > { %v987_v8 = vadd.f32 %v983_v56, %v963_v4  ;;  %v988_v9 = vadd.f32 %v984_v57, %v964_v5  ;;  %v989_v10 = vadd.f32 %v985_v58, %v965_v6  ;;  %v990_v11 = vadd.f32 %v986_v59, %v966_v7  ;;  %v4879_v54 = vld [vmem:[%s6767_s14 + $0x830] sm:$0xf]  ;;  %v3979_v58 = vld [vmem:[%s6767_s14 + $0x128] sm:$0xf]  ;;  %v5048_v59 = vld [vmem:[%s6767_s14 + $0x148] sm:$0xf0] }
 0x1c6   : > { %v4016_v56 = vor.u32 %v5057_v47, %v4015_v46  ;;  %v4304_v57 = vor.u32 %v5129_v51, %v4303_v48  ;;  %v4592_v61 = vor.u32 %v5201_v53, %v4591_v52  ;;  %v4880_v62 = vor.u32 %v5273_v55, %v4879_v54  ;;  %v3943_v6 = vld [vmem:[%s6767_s14 + $0xe0] sm:$0xf]  ;;  %v5039_v7 = vld [vmem:[%s6767_s14 + $0x100] sm:$0xf0]  ;;  %v4195_v22 = vld [vmem:[%s6767_s14 + $0x2d8] sm:$0xf] }
 0x1c7   : > { %v1001_v13 = vadd.f32 %v993_v0, %v987_v8  ;;  %v1002_v14 = vadd.f32 %v994_v1, %v988_v9  ;;  %v1003_v15 = vadd.f32 %v995_v2, %v989_v10  ;;  %v1004_v16 = vadd.f32 %v996_v3, %v990_v11  ;;  %v4555_v0 = vld [vmem:[%s6767_s14 + $0x5a8] sm:$0xf]  ;;  %v5192_v1 = vld [vmem:[%s6767_s14 + $0x5c8] sm:$0xf0]  ;;  %v4231_v10 = vld [vmem:[%s6767_s14 + $0x320] sm:$0xf] }
 0x1c8   : > { %v4843_v2 = vld [vmem:[%s6767_s14 + $0x7e8] sm:$0xf]  ;;  %v5264_v3 = vld [vmem:[%s6767_s14 + $0x808] sm:$0xf0]  ;;  %v3980_v4 = vor.u32 %v5048_v59, %v3979_v58  ;;  %v4268_v5 = vor.u32 %v5120_v63, %v4267_v60  ;;  %v4556_v8 = vor.u32 %v5192_v1, %v4555_v0  ;;  %v5111_v11 = vld [vmem:[%s6767_s14 + $0x340] sm:$0xf0] }
 0x1c9   : > { %v1005_v23 = vmax.f32 %v1001_v13, 0.0  ;;  %v1006_v24 = vmax.f32 %v1002_v14, 0.0  ;;  %v1007_v25 = vmax.f32 %v1003_v15, 0.0  ;;  %v1008_v26 = vmax.f32 %v1004_v16, 0.0  ;;  %v5183_v13 = vld [vmem:[%s6767_s14 + $0x580] sm:$0xf0] }
 0x1ca   : > { %v4844_v9 = vor.u32 %v5264_v3, %v4843_v2  ;;  %v4807_v14 = vld [vmem:[%s6767_s14 + $0x7a0] sm:$0xf]  ;;  %v5255_v15 = vld [vmem:[%s6767_s14 + $0x7c0] sm:$0xf0]  ;;  %v3944_v16 = vor.u32 %v5039_v7, %v3943_v6  ;;  %v4232_v17 = vor.u32 %v5111_v11, %v4231_v10  ;;  %v4520_v20 = vor.u32 %v5183_v13, %v4519_v12  ;;  %v5246_v27 = vld [vmem:[%s6767_s14 + $0x778] sm:$0xf0] }
 0x1cb   : > { %v6917_v30 = vpack.c.bf16 %v1005_v23, %v1005_v23  ;;  %v6919_v31 = vpack.c.bf16 %v1006_v24, %v1006_v24  ;;  %v6921_v32 = vpack.c.bf16 %v1007_v25, %v1007_v25  ;;  %v6923_v33 = vpack.c.bf16 %v1008_v26, %v1008_v26  ;;  %v5102_v23 = vld [vmem:[%s6767_s14 + $0x2f8] sm:$0xf0]  ;;  %v4483_v24 = vld [vmem:[%s6767_s14 + $0x518] sm:$0xf]  ;;  %v3871_v34 = vld [vmem:[%s6767_s14 + $0x50] sm:$0xf] }
 0x1cc   : > { %v4808_v21 = vor.u32 %v5255_v15, %v4807_v14  ;;  %v5174_v25 = vld [vmem:[%s6767_s14 + $0x538] sm:$0xf0]  ;;  %v4771_v26 = vld [vmem:[%s6767_s14 + $0x758] sm:$0xf]  ;;  %v5021_v35 = vld [vmem:[%s6767_s14 + $0x70] sm:$0xf0] }
 0x1cd   : > { %2835 = vmatmul.bf16.vlgmr.msra.gmra.mxu0 %v6917_v30  ;;  %2848 = vmatmul.bf16.vlgmr.msra.gmra.mxu1 %v6919_v31  ;;  %v4159_v38 = vld [vmem:[%s6767_s14 + $0x290] sm:$0xf]  ;;  %v5093_v39 = vld [vmem:[%s6767_s14 + $0x2b0] sm:$0xf0]  ;;  %v5012_v47 = vld [vmem:[%s6767_s14 + $0x28] sm:$0xf0] }
 0x1ce   : > { %2861 = vmatmul.bf16.vlgmr.msra.gmra.mxu2 %v6921_v32  ;;  %2874 = vmatmul.bf16.vlgmr.msra.gmra.mxu3 %v6923_v33  ;;  %v4447_v40 = vld [vmem:[%s6767_s14 + $0x4d0] sm:$0xf]  ;;  %v5165_v41 = vld [vmem:[%s6767_s14 + $0x4f0] sm:$0xf0]  ;;  %v4160_v46 = vor.u32 %v5093_v39, %v4159_v38  ;;  %v4123_v48 = vld [vmem:[%s6767_s14 + $0x248] sm:$0xf] }
 0x1cf   : > { %2931 = vmatpush.bf16.msra.mxu0 %v4088_v28  ;;  %2944 = vmatpush.bf16.msra.mxu1 %v4376_v29  ;;  %v3908_v28 = vor.u32 %v5030_v19, %v3907_v18  ;;  %v4196_v29 = vor.u32 %v5102_v23, %v4195_v22  ;;  %v4735_v42 = vld [vmem:[%s6767_s14 + $0x710] sm:$0xf]  ;;  %v5237_v43 = vld [vmem:[%s6767_s14 + $0x730] sm:$0xf0]  ;;  %v4411_v52 = vld [vmem:[%s6767_s14 + $0x488] sm:$0xf] }
 0x1d0   : > { %2957 = vmatpush.bf16.msra.mxu2 %v4664_v36  ;;  %2970 = vmatpush.bf16.msra.mxu3 %v4952_v37  ;;  %v4484_v36 = vor.u32 %v5174_v25, %v4483_v24  ;;  %v4772_v37 = vor.u32 %v5246_v27, %v4771_v26  ;;  %v4736_v51 = vor.u32 %v5237_v43, %v4735_v42  ;;  %v5156_v53 = vld [vmem:[%s6767_s14 + $0x4a8] sm:$0xf0]  ;;  %v4699_v54 = vld [vmem:[%s6767_s14 + $0x6c8] sm:$0xf]  ;;  %v5143_v58 = vld [vmem:[%s6767_s14 + $0x444] sm:$0xf] }
 0x1d1   : > { %v5228_v55 = vld [vmem:[%s6767_s14 + $0x6e8] sm:$0xf0]  ;;  %v4377_v59 = vld [vmem:[%s6767_s14 + $0x464] sm:$0xf0]  ;;  %v5215_v60 = vld [vmem:[%s6767_s14 + $0x684] sm:$0xf]  ;;  %v4412_v2 = vor.u32 %v5156_v53, %v4411_v52 }
 0x1d2   : > { %v4665_v63 = vld [vmem:[%s6767_s14 + $0x6a4] sm:$0xf0]  ;;  %v5287_v0 = vld [vmem:[%s6767_s14 + $0x8c4] sm:$0xf]  ;;  %v4700_v3 = vor.u32 %v5228_v55, %v4699_v54  ;;  %v5062_v6 = vld [vmem:[%s6767_s14 + $0x1bc] sm:$0xf] }
 0x1d3   : > { %2932 = vmatpush.bf16.msra.mxu0 %v4052_v44  ;;  %2945 = vmatpush.bf16.msra.mxu1 %v4340_v45  ;;  %v3835_v44 = vld [vmem:[%s6767_s14 + $0x8] sm:$0xf]  ;;  %v3872_v45 = vor.u32 %v5021_v35, %v3871_v34  ;;  %v4053_v7 = vld [vmem:[%s6767_s14 + $0x1dc] sm:$0xf0]  ;;  %v5134_v10 = vld [vmem:[%s6767_s14 + $0x3fc] sm:$0xf] }
 0x1d4   : > { %2958 = vmatpush.bf16.msra.mxu2 %v4628_v49  ;;  %2971 = vmatpush.bf16.msra.mxu3 %v4916_v50  ;;  %v5084_v49 = vld [vmem:[%s6767_s14 + $0x268] sm:$0xf0]  ;;  %v4448_v50 = vor.u32 %v5165_v41, %v4447_v40  ;;  %v4953_v1 = vld [vmem:[%s6767_s14 + $0x8e4] sm:$0xf0]  ;;  %v4341_v11 = vld [vmem:[%s6767_s14 + $0x41c] sm:$0xf0] }
 0x1d5   : > { %v5206_v12 = vld [vmem:[%s6767_s14 + $0x63c] sm:$0xf]  ;;  %v4629_v13 = vld [vmem:[%s6767_s14 + $0x65c] sm:$0xf0]  ;;  %v5053_v18 = vld [vmem:[%s6767_s14 + $0x174] sm:$0xf] }
 0x1d6   : > { %v5278_v14 = vld [vmem:[%s6767_s14 + $0x87c] sm:$0xf]  ;;  %v4917_v15 = vld [vmem:[%s6767_s14 + $0x89c] sm:$0xf0]  ;;  %v4017_v19 = vld [vmem:[%s6767_s14 + $0x194] sm:$0xf0] }
 0x1d7   : > { %2933 = vmatpush.bf16.msra.mxu0 %v4016_v56  ;;  %2946 = vmatpush.bf16.msra.mxu1 %v4304_v57  ;;  %v5071_v56 = vld [vmem:[%s6767_s14 + $0x204] sm:$0xf]  ;;  %v4089_v57 = vld [vmem:[%s6767_s14 + $0x224] sm:$0xf0]  ;;  %v5125_v22 = vld [vmem:[%s6767_s14 + $0x3b4] sm:$0xf] }
 0x1d8   : > { %2959 = vmatpush.bf16.msra.mxu2 %v4592_v61  ;;  %2972 = vmatpush.bf16.msra.mxu3 %v4880_v62  ;;  %v3836_v61 = vor.u32 %v5012_v47, %v3835_v44  ;;  %v4124_v62 = vor.u32 %v5084_v49, %v4123_v48  ;;  %v4305_v23 = vld [vmem:[%s6767_s14 + $0x3d4] sm:$0xf0]  ;;  %v5197_v24 = vld [vmem:[%s6767_s14 + $0x5f4] sm:$0xf]  ;;  %v5044_v34 = vld [vmem:[%s6767_s14 + $0x12c] sm:$0xf] }
 0x1d9   : > { %v4593_v25 = vld [vmem:[%s6767_s14 + $0x614] sm:$0xf0]  ;;  %v5269_v26 = vld [vmem:[%s6767_s14 + $0x834] sm:$0xf]  ;;  %v3981_v35 = vld [vmem:[%s6767_s14 + $0x14c] sm:$0xf0] }
 0x1da   : > { %v4881_v27 = vld [vmem:[%s6767_s14 + $0x854] sm:$0xf0]  ;;  %v5116_v38 = vld [vmem:[%s6767_s14 + $0x36c] sm:$0xf]  ;;  %v4269_v39 = vld [vmem:[%s6767_s14 + $0x38c] sm:$0xf0]  ;;  %v3984_v44 = vor.u32 %v5044_v34, %v3981_v35 }
 0x1db   : > { %2934 = vmatpush.bf16.msra.mxu0 %v3980_v4  ;;  %2947 = vmatpush.bf16.msra.mxu1 %v4268_v5  ;;  %v4092_v4 = vor.u32 %v5071_v56, %v4089_v57  ;;  %v4380_v5 = vor.u32 %v5143_v58, %v4377_v59  ;;  %v5188_v40 = vld [vmem:[%s6767_s14 + $0x5ac] sm:$0xf]  ;;  %v4557_v41 = vld [vmem:[%s6767_s14 + $0x5cc] sm:$0xf0]  ;;  %v3945_v47 = vld [vmem:[%s6767_s14 + $0x104] sm:$0xf0] }
 0x1dc   : > { %2960 = vmatpush.bf16.msra.mxu2 %v4556_v8  ;;  %2973 = vmatpush.bf16.msra.mxu3 %v4844_v9  ;;  %v4668_v8 = vor.u32 %v5215_v60, %v4665_v63  ;;  %v4956_v9 = vor.u32 %v5287_v0, %v4953_v1  ;;  %v5260_v42 = vld [vmem:[%s6767_s14 + $0x7ec] sm:$0xf]  ;;  %v4845_v43 = vld [vmem:[%s6767_s14 + $0x80c] sm:$0xf0]  ;;  %v4560_v48 = vor.u32 %v5188_v40, %v4557_v41  ;;  %v5179_v52 = vld [vmem:[%s6767_s14 + $0x564] sm:$0xf] }
 0x1dd   : > { %2887 = vmatmul.bf16.vlgmr.msrb.gmra.mxu0 %v6917_v30  ;;  %2900 = vmatmul.bf16.vlgmr.msrb.gmra.mxu1 %v6919_v31  ;;  %v4848_v49 = vor.u32 %v5260_v42, %v4845_v43  ;;  %v4521_v53 = vld [vmem:[%s6767_s14 + $0x584] sm:$0xf0]  ;;  %v5251_v54 = vld [vmem:[%s6767_s14 + $0x7a4] sm:$0xf]  ;;  %v5026_v58 = vld [vmem:[%s6767_s14 + $0x9c] sm:$0xf] }
 0x1de   : > { %2913 = vmatmul.bf16.vlgmr.msrb.gmra.mxu2 %v6921_v32  ;;  %2926 = vmatmul.bf16.vlgmr.msrb.gmra.mxu3 %v6923_v33  ;;  %v4809_v55 = vld [vmem:[%s6767_s14 + $0x7c4] sm:$0xf0]  ;;  %v3909_v59 = vld [vmem:[%s6767_s14 + $0xbc] sm:$0xf0]  ;;  %v4524_v60 = vor.u32 %v5179_v52, %v4521_v53  ;;  %v5170_v0 = vld [vmem:[%s6767_s14 + $0x51c] sm:$0xf] }
 0x1df   : > { %2935 = vmatpush.bf16.msra.mxu0 %v3944_v16  ;;  %2948 = vmatpush.bf16.msra.mxu1 %v4232_v17  ;;  %v4056_v16 = vor.u32 %v5062_v6, %v4053_v7  ;;  %v4344_v17 = vor.u32 %v5134_v10, %v4341_v11  ;;  %v4197_v63 = vld [vmem:[%s6767_s14 + $0x2fc] sm:$0xf0]  ;;  %v5017_v6 = vld [vmem:[%s6767_s14 + $0x54] sm:$0xf]  ;;  %v3873_v7 = vld [vmem:[%s6767_s14 + $0x74] sm:$0xf0] }
 0x1e0   : > { %2961 = vmatpush.bf16.msra.mxu2 %v4520_v20  ;;  %2974 = vmatpush.bf16.msra.mxu3 %v4808_v21  ;;  %v4632_v20 = vor.u32 %v5206_v12, %v4629_v13  ;;  %v4920_v21 = vor.u32 %v5278_v14, %v4917_v15  ;;  %v4485_v1 = vld [vmem:[%s6767_s14 + $0x53c] sm:$0xf0]  ;;  %v5089_v10 = vld [vmem:[%s6767_s14 + $0x294] sm:$0xf]  ;;  %v4161_v11 = vld [vmem:[%s6767_s14 + $0x2b4] sm:$0xf0] }
 0x1e1   : > { %v5161_v12 = vld [vmem:[%s6767_s14 + $0x4d4] sm:$0xf]  ;;  %v4449_v13 = vld [vmem:[%s6767_s14 + $0x4f4] sm:$0xf0]  ;;  %v4383_v34 = vld [vmem:[%s6767_s14 + $0x448] sm:$0xf] }
 0x1e2   : > { %v5233_v14 = vld [vmem:[%s6767_s14 + $0x714] sm:$0xf]  ;;  %v4737_v15 = vld [vmem:[%s6767_s14 + $0x734] sm:$0xf0]  ;;  %v5148_v35 = vld [vmem:[%s6767_s14 + $0x468] sm:$0xf0] }
 0x1e3   : > { %2936 = vmatpush.bf16.msra.mxu0 %v3908_v28  ;;  %2949 = vmatpush.bf16.msra.mxu1 %v4196_v29  ;;  %v4020_v28 = vor.u32 %v5053_v18, %v4017_v19  ;;  %v4308_v29 = vor.u32 %v5125_v22, %v4305_v23  ;;  %v4164_v18 = vor.u32 %v5089_v10, %v4161_v11  ;;  %v3837_v19 = vld [vmem:[%s6767_s14 + $0x2c] sm:$0xf0]  ;;  %v4959_v40 = vld [vmem:[%s6767_s14 + $0x8c8] sm:$0xf]  ;;  %v5292_v41 = vld [vmem:[%s6767_s14 + $0x8e8] sm:$0xf0] }
 0x1e4   : > { %2962 = vmatpush.bf16.msra.mxu2 %v4484_v36  ;;  %2975 = vmatpush.bf16.msra.mxu3 %v4772_v37  ;;  %v4596_v36 = vor.u32 %v5197_v24, %v4593_v25  ;;  %v4884_v37 = vor.u32 %v5269_v26, %v4881_v27  ;;  %v4452_v22 = vor.u32 %v5161_v12, %v4449_v13  ;;  %v5152_v24 = vld [vmem:[%s6767_s14 + $0x48c] sm:$0xf]  ;;  %v4413_v25 = vld [vmem:[%s6767_s14 + $0x4ac] sm:$0xf0]  ;;  %v4635_v52 = vld [vmem:[%s6767_s14 + $0x640] sm:$0xf] }
 0x1e5   : > { %v4740_v23 = vor.u32 %v5233_v14, %v4737_v15  ;;  %v5224_v26 = vld [vmem:[%s6767_s14 + $0x6cc] sm:$0xf]  ;;  %v4701_v27 = vld [vmem:[%s6767_s14 + $0x6ec] sm:$0xf0]  ;;  %v4416_v42 = vor.u32 %v5152_v24, %v4413_v25  ;;  %v5211_v53 = vld [vmem:[%s6767_s14 + $0x660] sm:$0xf0] }
 0x1e6   : > { %v4704_v43 = vor.u32 %v5224_v26, %v4701_v27  ;;  %v4275_v10 = vld [vmem:[%s6767_s14 + $0x370] sm:$0xf]  ;;  %v5121_v11 = vld [vmem:[%s6767_s14 + $0x390] sm:$0xf0]  ;;  %v4527_v24 = vld [vmem:[%s6767_s14 + $0x568] sm:$0xf] }
 0x1e7   : > { %2937 = vmatpush.bf16.msra.mxu0 %v3872_v45  ;;  %2950 = vmatpush.bf16.msra.mxu1 %v4160_v46  ;;  %v4272_v45 = vor.u32 %v5116_v38, %v4269_v39  ;;  %v5035_v46 = vld [vmem:[%s6767_s14 + $0xe4] sm:$0xf]  ;;  %v5220_v39 = vld [vmem:[%s6767_s14 + $0x6a8] sm:$0xf0]  ;;  %v4563_v12 = vld [vmem:[%s6767_s14 + $0x5b0] sm:$0xf] }
 0x1e8   : > { %2963 = vmatpush.bf16.msra.mxu2 %v4448_v50  ;;  %2976 = vmatpush.bf16.msra.mxu3 %v4736_v51  ;;  %v5107_v50 = vld [vmem:[%s6767_s14 + $0x324] sm:$0xf]  ;;  %v4233_v51 = vld [vmem:[%s6767_s14 + $0x344] sm:$0xf0]  ;;  %v3948_v56 = vor.u32 %v5035_v46, %v3945_v47  ;;  %v4059_v46 = vld [vmem:[%s6767_s14 + $0x1c0] sm:$0xf] }
 0x1e9   : > { %v4236_v57 = vor.u32 %v5107_v50, %v4233_v51  ;;  %v5067_v47 = vld [vmem:[%s6767_s14 + $0x1e0] sm:$0xf0]  ;;  %v4347_v50 = vld [vmem:[%s6767_s14 + $0x400] sm:$0xf]  ;;  %v5193_v13 = vld [vmem:[%s6767_s14 + $0x5d0] sm:$0xf0] }
 0x1ea   : > { %v5139_v51 = vld [vmem:[%s6767_s14 + $0x420] sm:$0xf0]  ;;  %v4851_v14 = vld [vmem:[%s6767_s14 + $0x7f0] sm:$0xf]  ;;  %v5265_v15 = vld [vmem:[%s6767_s14 + $0x810] sm:$0xf0] }
 0x1eb   : > { %2938 = vmatpush.bf16.msra.mxu0 %v3836_v61  ;;  %2951 = vmatpush.bf16.msra.mxu1 %v4124_v62  ;;  %v4812_v61 = vor.u32 %v5251_v54, %v4809_v55  ;;  %v5098_v62 = vld [vmem:[%s6767_s14 + $0x2dc] sm:$0xf]  ;;  %v4923_v54 = vld [vmem:[%s6767_s14 + $0x880] sm:$0xf]  ;;  %v5283_v55 = vld [vmem:[%s6767_s14 + $0x8a0] sm:$0xf0] }
 0x1ec   : > { %2964 = vmatpush.bf16.msra.mxu2 %v4412_v2  ;;  %2977 = vmatpush.bf16.msra.mxu3 %v4700_v3  ;;  %v5242_v2 = vld [vmem:[%s6767_s14 + $0x75c] sm:$0xf]  ;;  %v4773_v3 = vld [vmem:[%s6767_s14 + $0x77c] sm:$0xf0]  ;;  %v5184_v25 = vld [vmem:[%s6767_s14 + $0x588] sm:$0xf0] }
 0x1ed   : > { %v4815_v26 = vld [vmem:[%s6767_s14 + $0x7a8] sm:$0xf]  ;;  %v5256_v27 = vld [vmem:[%s6767_s14 + $0x7c8] sm:$0xf0] }
 0x1ee   : > { %2939 = vmatmul.bf16.vlgmr.msra.gmra.mxu0 %v6917_v30  ;;  %2952 = vmatmul.bf16.vlgmr.msra.gmra.mxu1 %v6919_v31 }
 0x1ef   : > { %2983 = vmatpush.bf16.msrb.mxu0 %v4092_v4  ;;  %2996 = vmatpush.bf16.msrb.mxu1 %v4380_v5  ;;  %v3912_v4 = vor.u32 %v5026_v58, %v3909_v59  ;;  %v4200_v5 = vor.u32 %v5098_v62, %v4197_v63  ;;  %v4023_v58 = vld [vmem:[%s6767_s14 + $0x178] sm:$0xf]  ;;  %v5058_v59 = vld [vmem:[%s6767_s14 + $0x198] sm:$0xf0] }
 0x1f0   : > { %3009 = vmatpush.bf16.msrb.mxu2 %v4668_v8  ;;  %3022 = vmatpush.bf16.msrb.mxu3 %v4956_v9  ;;  %v4488_v8 = vor.u32 %v5170_v0, %v4485_v1  ;;  %v4776_v9 = vor.u32 %v5242_v2, %v4773_v3  ;;  %v4311_v62 = vld [vmem:[%s6767_s14 + $0x3b8] sm:$0xf]  ;;  %v5130_v63 = vld [vmem:[%s6767_s14 + $0x3d8] sm:$0xf0] }
 0x1f1   : > { %2965 = vmatmul.bf16.vlgmr.msra.gmra.mxu2 %v6921_v32  ;;  %2978 = vmatmul.bf16.vlgmr.msra.gmra.mxu3 %v6923_v33  ;;  %v4599_v0 = vld [vmem:[%s6767_s14 + $0x5f8] sm:$0xf]  ;;  %v5202_v1 = vld [vmem:[%s6767_s14 + $0x618] sm:$0xf0] }
 0x1f2   : > { %v4887_v2 = vld [vmem:[%s6767_s14 + $0x838] sm:$0xf]  ;;  %v5274_v3 = vld [vmem:[%s6767_s14 + $0x858] sm:$0xf0] }
 0x1f3   : > { %2984 = vmatpush.bf16.msrb.mxu0 %v4056_v16  ;;  %2997 = vmatpush.bf16.msrb.mxu1 %v4344_v17  ;;  %v5008_v16 = vld [vmem:[%s6767_s14 + $0xc] sm:$0xf]  ;;  %v3876_v17 = vor.u32 %v5017_v6, %v3873_v7  ;;  %v3987_v6 = vld [vmem:[%s6767_s14 + $0x130] sm:$0xf]  ;;  %v5049_v7 = vld [vmem:[%s6767_s14 + $0x150] sm:$0xf0] }
 0x1f4   : > { %3010 = vmatpush.bf16.msrb.mxu2 %v4632_v20  ;;  %3023 = vmatpush.bf16.msrb.mxu3 %v4920_v21  ;;  %v5080_v20 = vld [vmem:[%s6767_s14 + $0x24c] sm:$0xf]  ;;  %v4125_v21 = vld [vmem:[%s6767_s14 + $0x26c] sm:$0xf0] }
 0x1f5   : > { %v4128_v38 = vor.u32 %v5080_v20, %v4125_v21  ;;  %v4564_v20 = vor.u32 %v5193_v13, %v4563_v12  ;;  %v4852_v21 = vor.u32 %v5265_v15, %v4851_v14  ;;  %v5288_v12 = vld [vmem:[%s6767_s14 + $0x8cc] sm:$0xf]  ;;  %v4961_v13 = vld [vmem:[%s6767_s14 + $0x8ec] sm:$0xf0] }
 0x1f7   : > { %2985 = vmatpush.bf16.msrb.mxu0 %v4020_v28  ;;  %2998 = vmatpush.bf16.msrb.mxu1 %v4308_v29  ;;  %v4095_v28 = vld [vmem:[%s6767_s14 + $0x208] sm:$0xf]  ;;  %v5076_v29 = vld [vmem:[%s6767_s14 + $0x228] sm:$0xf0] }
 0x1f8   : > { %3011 = vmatpush.bf16.msrb.mxu2 %v4596_v36  ;;  %3024 = vmatpush.bf16.msrb.mxu3 %v4884_v37  ;;  %v4671_v36 = vld [vmem:[%s6767_s14 + $0x688] sm:$0xf]  ;;  %v3840_v37 = vor.u32 %v5008_v16, %v3837_v19  ;;  %v3988_v16 = vor.u32 %v5049_v7, %v3987_v6  ;;  %v5040_v19 = vld [vmem:[%s6767_s14 + $0x108] sm:$0xf0]  ;;  %v4385_v7 = vld [vmem:[%s6767_s14 + $0x46c] sm:$0xf0] }
 0x1f9   : > { %v5144_v6 = vld [vmem:[%s6767_s14 + $0x44c] sm:$0xf] }
 0x1fb   : > { %2986 = vmatpush.bf16.msrb.mxu0 %v3984_v44  ;;  %2999 = vmatpush.bf16.msrb.mxu1 %v4272_v45  ;;  %v4096_v44 = vor.u32 %v5076_v29, %v4095_v28  ;;  %v4384_v45 = vor.u32 %v5148_v35, %v4383_v34  ;;  %v3915_v34 = vld [vmem:[%s6767_s14 + $0xa0] sm:$0xf]  ;;  %v5031_v35 = vld [vmem:[%s6767_s14 + $0xc0] sm:$0xf0] }
 0x1fc   : > { %3012 = vmatpush.bf16.msrb.mxu2 %v4560_v48  ;;  %3025 = vmatpush.bf16.msrb.mxu3 %v4848_v49  ;;  %v4672_v48 = vor.u32 %v5220_v39, %v4671_v36  ;;  %v4960_v49 = vor.u32 %v5292_v41, %v4959_v40  ;;  %v4528_v36 = vor.u32 %v5184_v25, %v4527_v24  ;;  %v5103_v39 = vld [vmem:[%s6767_s14 + $0x300] sm:$0xf0]  ;;  %v4491_v40 = vld [vmem:[%s6767_s14 + $0x520] sm:$0xf]  ;;  %v4637_v25 = vld [vmem:[%s6767_s14 + $0x664] sm:$0xf0] }
 0x1fd   : > { %v5175_v41 = vld [vmem:[%s6767_s14 + $0x540] sm:$0xf0] }
 0x1fe   : > { %v5207_v24 = vld [vmem:[%s6767_s14 + $0x644] sm:$0xf] }
 0x1ff   : > { %2987 = vmatpush.bf16.msrb.mxu0 %v3948_v56  ;;  %3000 = vmatpush.bf16.msrb.mxu1 %v4236_v57  ;;  %v4060_v56 = vor.u32 %v5067_v47, %v4059_v46  ;;  %v4348_v57 = vor.u32 %v5139_v51, %v4347_v50  ;;  %v3879_v46 = vld [vmem:[%s6767_s14 + $0x58] sm:$0xf]  ;;  %v5022_v47 = vld [vmem:[%s6767_s14 + $0x78] sm:$0xf0] }
 0x200   : > { %3013 = vmatpush.bf16.msrb.mxu2 %v4524_v60  ;;  %3026 = vmatpush.bf16.msrb.mxu3 %v4812_v61  ;;  %v4636_v60 = vor.u32 %v5211_v53, %v4635_v52  ;;  %v4924_v61 = vor.u32 %v5283_v55, %v4923_v54  ;;  %v4167_v50 = vld [vmem:[%s6767_s14 + $0x298] sm:$0xf]  ;;  %v5094_v51 = vld [vmem:[%s6767_s14 + $0x2b8] sm:$0xf0] }
 0x201   : > { %v4455_v52 = vld [vmem:[%s6767_s14 + $0x4d8] sm:$0xf]  ;;  %v5166_v53 = vld [vmem:[%s6767_s14 + $0x4f8] sm:$0xf0] }
 0x202   : > { %v4743_v54 = vld [vmem:[%s6767_s14 + $0x718] sm:$0xf]  ;;  %v5238_v55 = vld [vmem:[%s6767_s14 + $0x738] sm:$0xf0] }
 0x203   : > { %2988 = vmatpush.bf16.msrb.mxu0 %v3912_v4  ;;  %3001 = vmatpush.bf16.msrb.mxu1 %v4200_v5  ;;  %v4024_v4 = vor.u32 %v5058_v59, %v4023_v58  ;;  %v4312_v5 = vor.u32 %v5130_v63, %v4311_v62  ;;  %v4168_v58 = vor.u32 %v5094_v51, %v4167_v50  ;;  %v5013_v59 = vld [vmem:[%s6767_s14 + $0x30] sm:$0xf0]  ;;  %v4277_v51 = vld [vmem:[%s6767_s14 + $0x394] sm:$0xf0] }
 0x204   : > { %3014 = vmatpush.bf16.msrb.mxu2 %v4488_v8  ;;  %3027 = vmatpush.bf16.msrb.mxu3 %v4776_v9  ;;  %v4600_v8 = vor.u32 %v5202_v1, %v4599_v0  ;;  %v4888_v9 = vor.u32 %v5274_v3, %v4887_v2  ;;  %v4456_v62 = vor.u32 %v5166_v53, %v4455_v52  ;;  %v4419_v0 = vld [vmem:[%s6767_s14 + $0x490] sm:$0xf]  ;;  %v5157_v1 = vld [vmem:[%s6767_s14 + $0x4b0] sm:$0xf0]  ;;  %v4565_v53 = vld [vmem:[%s6767_s14 + $0x5d4] sm:$0xf0] }
 0x205   : > { %v4744_v63 = vor.u32 %v5238_v55, %v4743_v54  ;;  %v4707_v2 = vld [vmem:[%s6767_s14 + $0x6d0] sm:$0xf]  ;;  %v5229_v3 = vld [vmem:[%s6767_s14 + $0x6f0] sm:$0xf0]  ;;  %v4420_v14 = vor.u32 %v5157_v1, %v4419_v0  ;;  %v4853_v55 = vld [vmem:[%s6767_s14 + $0x814] sm:$0xf0] }
 0x206   : > { %v4708_v15 = vor.u32 %v5229_v3, %v4707_v2  ;;  %v5117_v50 = vld [vmem:[%s6767_s14 + $0x374] sm:$0xf]  ;;  %v5180_v0 = vld [vmem:[%s6767_s14 + $0x56c] sm:$0xf]  ;;  %v4529_v1 = vld [vmem:[%s6767_s14 + $0x58c] sm:$0xf0] }
 0x207   : > { %2989 = vmatpush.bf16.msrb.mxu0 %v3876_v17  ;;  %3002 = vmatpush.bf16.msrb.mxu1 %v4164_v18  ;;  %v4276_v17 = vor.u32 %v5121_v11, %v4275_v10  ;;  %v3951_v18 = vld [vmem:[%s6767_s14 + $0xe8] sm:$0xf]  ;;  %v4673_v11 = vld [vmem:[%s6767_s14 + $0x6ac] sm:$0xf0]  ;;  %v5189_v52 = vld [vmem:[%s6767_s14 + $0x5b4] sm:$0xf] }
 0x208   : > { %3015 = vmatpush.bf16.msrb.mxu2 %v4452_v22  ;;  %3028 = vmatpush.bf16.msrb.mxu3 %v4740_v23  ;;  %v4239_v22 = vld [vmem:[%s6767_s14 + $0x328] sm:$0xf]  ;;  %v5112_v23 = vld [vmem:[%s6767_s14 + $0x348] sm:$0xf0]  ;;  %v3952_v28 = vor.u32 %v5040_v19, %v3951_v18  ;;  %v5063_v18 = vld [vmem:[%s6767_s14 + $0x1c4] sm:$0xf] }
 0x209   : > { %v4240_v29 = vor.u32 %v5112_v23, %v4239_v22  ;;  %v4061_v19 = vld [vmem:[%s6767_s14 + $0x1e4] sm:$0xf0]  ;;  %v5135_v22 = vld [vmem:[%s6767_s14 + $0x404] sm:$0xf]  ;;  %v5261_v54 = vld [vmem:[%s6767_s14 + $0x7f4] sm:$0xf] }
 0x20a   : > { %v4349_v23 = vld [vmem:[%s6767_s14 + $0x424] sm:$0xf0]  ;;  %v5252_v2 = vld [vmem:[%s6767_s14 + $0x7ac] sm:$0xf]  ;;  %v4817_v3 = vld [vmem:[%s6767_s14 + $0x7cc] sm:$0xf0] }
 0x20b   : > { %2990 = vmatpush.bf16.msrb.mxu0 %v3840_v37  ;;  %3003 = vmatpush.bf16.msrb.mxu1 %v4128_v38  ;;  %v4816_v37 = vor.u32 %v5256_v27, %v4815_v26  ;;  %v4203_v38 = vld [vmem:[%s6767_s14 + $0x2e0] sm:$0xf]  ;;  %v5279_v26 = vld [vmem:[%s6767_s14 + $0x884] sm:$0xf]  ;;  %v4925_v27 = vld [vmem:[%s6767_s14 + $0x8a4] sm:$0xf0] }
 0x20c   : > { %3016 = vmatpush.bf16.msrb.mxu2 %v4416_v42  ;;  %3029 = vmatpush.bf16.msrb.mxu3 %v4704_v43  ;;  %v4779_v42 = vld [vmem:[%s6767_s14 + $0x760] sm:$0xf]  ;;  %v5247_v43 = vld [vmem:[%s6767_s14 + $0x780] sm:$0xf0] }
 0x20e   : > { %2991 = vmatmul.bf16.vlgmr.msrb.gmra.mxu0 %v6917_v30  ;;  %3004 = vmatmul.bf16.vlgmr.msrb.gmra.mxu1 %v6919_v31 }
 0x20f   : > { %3035 = vmatpush.bf16.msra.mxu0 %v4096_v44  ;;  %3048 = vmatpush.bf16.msra.mxu1 %v4384_v45  ;;  %v3916_v44 = vor.u32 %v5031_v35, %v3915_v34  ;;  %v4204_v45 = vor.u32 %v5103_v39, %v4203_v38  ;;  %v5054_v34 = vld [vmem:[%s6767_s14 + $0x17c] sm:$0xf]  ;;  %v4025_v35 = vld [vmem:[%s6767_s14 + $0x19c] sm:$0xf0] }
 0x210   : > { %3061 = vmatpush.bf16.msra.mxu2 %v4672_v48  ;;  %3074 = vmatpush.bf16.msra.mxu3 %v4960_v49  ;;  %v4492_v48 = vor.u32 %v5175_v41, %v4491_v40  ;;  %v4780_v49 = vor.u32 %v5247_v43, %v4779_v42  ;;  %v5126_v38 = vld [vmem:[%s6767_s14 + $0x3bc] sm:$0xf]  ;;  %v4313_v39 = vld [vmem:[%s6767_s14 + $0x3dc] sm:$0xf0] }
 0x211   : > { %3017 = vmatmul.bf16.vlgmr.msrb.gmra.mxu2 %v6921_v32  ;;  %3030 = vmatmul.bf16.vlgmr.msrb.gmra.mxu3 %v6923_v33  ;;  %v5198_v40 = vld [vmem:[%s6767_s14 + $0x5fc] sm:$0xf]  ;;  %v4601_v41 = vld [vmem:[%s6767_s14 + $0x61c] sm:$0xf0] }
 0x212   : > { %v5270_v42 = vld [vmem:[%s6767_s14 + $0x83c] sm:$0xf]  ;;  %v4889_v43 = vld [vmem:[%s6767_s14 + $0x85c] sm:$0xf0] }
 0x213   : > { %3036 = vmatpush.bf16.msra.mxu0 %v4060_v56  ;;  %3049 = vmatpush.bf16.msra.mxu1 %v4348_v57  ;;  %v3843_v56 = vld [vmem:[%s6767_s14 + $0x10] sm:$0xf]  ;;  %v3880_v57 = vor.u32 %v5022_v47, %v3879_v46  ;;  %v5045_v46 = vld [vmem:[%s6767_s14 + $0x134] sm:$0xf]  ;;  %v3989_v47 = vld [vmem:[%s6767_s14 + $0x154] sm:$0xf0] }
 0x214   : > { %3062 = vmatpush.bf16.msra.mxu2 %v4636_v60  ;;  %3075 = vmatpush.bf16.msra.mxu3 %v4924_v61  ;;  %v4131_v60 = vld [vmem:[%s6767_s14 + $0x250] sm:$0xf]  ;;  %v5085_v61 = vld [vmem:[%s6767_s14 + $0x270] sm:$0xf0] }
 0x215   : > { %v4132_v10 = vor.u32 %v5085_v61, %v4131_v60  ;;  %v4568_v60 = vor.u32 %v5189_v52, %v4565_v53  ;;  %v4856_v61 = vor.u32 %v5261_v54, %v4853_v55  ;;  %v4967_v52 = vld [vmem:[%s6767_s14 + $0x8d0] sm:$0xf]  ;;  %v5293_v53 = vld [vmem:[%s6767_s14 + $0x8f0] sm:$0xf0] }
 0x217   : > { %3037 = vmatpush.bf16.msra.mxu0 %v4024_v4  ;;  %3050 = vmatpush.bf16.msra.mxu1 %v4312_v5  ;;  %v5072_v4 = vld [vmem:[%s6767_s14 + $0x20c] sm:$0xf]  ;;  %v4097_v5 = vld [vmem:[%s6767_s14 + $0x22c] sm:$0xf0] }
 0x218   : > { %3063 = vmatpush.bf16.msra.mxu2 %v4600_v8  ;;  %3076 = vmatpush.bf16.msra.mxu3 %v4888_v9  ;;  %v5216_v8 = vld [vmem:[%s6767_s14 + $0x68c] sm:$0xf]  ;;  %v3844_v9 = vor.u32 %v5013_v59, %v3843_v56  ;;  %v3992_v56 = vor.u32 %v5045_v46, %v3989_v47  ;;  %v3953_v59 = vld [vmem:[%s6767_s14 + $0x10c] sm:$0xf0]  ;;  %v5149_v47 = vld [vmem:[%s6767_s14 + $0x470] sm:$0xf0] }
 0x219   : > { %v4391_v46 = vld [vmem:[%s6767_s14 + $0x450] sm:$0xf] }
 0x21b   : > { %3038 = vmatpush.bf16.msra.mxu0 %v3988_v16  ;;  %3051 = vmatpush.bf16.msra.mxu1 %v4276_v17  ;;  %v4100_v16 = vor.u32 %v5072_v4, %v4097_v5  ;;  %v4388_v17 = vor.u32 %v5144_v6, %v4385_v7  ;;  %v5027_v6 = vld [vmem:[%s6767_s14 + $0xa4] sm:$0xf]  ;;  %v3917_v7 = vld [vmem:[%s6767_s14 + $0xc4] sm:$0xf0] }
 0x21c   : > { %3064 = vmatpush.bf16.msra.mxu2 %v4564_v20  ;;  %3077 = vmatpush.bf16.msra.mxu3 %v4852_v21  ;;  %v4676_v20 = vor.u32 %v5216_v8, %v4673_v11  ;;  %v4964_v21 = vor.u32 %v5288_v12, %v4961_v13  ;;  %v4532_v8 = vor.u32 %v5180_v0, %v4529_v1  ;;  %v4205_v11 = vld [vmem:[%s6767_s14 + $0x304] sm:$0xf0]  ;;  %v5171_v12 = vld [vmem:[%s6767_s14 + $0x524] sm:$0xf]  ;;  %v5212_v1 = vld [vmem:[%s6767_s14 + $0x668] sm:$0xf0] }
 0x21d   : > { %v4493_v13 = vld [vmem:[%s6767_s14 + $0x544] sm:$0xf0] }
 0x21e   : > { %v4643_v0 = vld [vmem:[%s6767_s14 + $0x648] sm:$0xf] }
 0x21f   : > { %3039 = vmatpush.bf16.msra.mxu0 %v3952_v28  ;;  %3052 = vmatpush.bf16.msra.mxu1 %v4240_v29  ;;  %v4064_v28 = vor.u32 %v5063_v18, %v4061_v19  ;;  %v4352_v29 = vor.u32 %v5135_v22, %v4349_v23  ;;  %v5018_v18 = vld [vmem:[%s6767_s14 + $0x5c] sm:$0xf]  ;;  %v3881_v19 = vld [vmem:[%s6767_s14 + $0x7c] sm:$0xf0] }
 0x220   : > { %3065 = vmatpush.bf16.msra.mxu2 %v4528_v36  ;;  %3078 = vmatpush.bf16.msra.mxu3 %v4816_v37  ;;  %v4640_v36 = vor.u32 %v5207_v24, %v4637_v25  ;;  %v4928_v37 = vor.u32 %v5279_v26, %v4925_v27  ;;  %v5090_v22 = vld [vmem:[%s6767_s14 + $0x29c] sm:$0xf]  ;;  %v4169_v23 = vld [vmem:[%s6767_s14 + $0x2bc] sm:$0xf0] }
 0x221   : > { %v5162_v24 = vld [vmem:[%s6767_s14 + $0x4dc] sm:$0xf]  ;;  %v4457_v25 = vld [vmem:[%s6767_s14 + $0x4fc] sm:$0xf0] }
 0x222   : > { %v5234_v26 = vld [vmem:[%s6767_s14 + $0x71c] sm:$0xf]  ;;  %v4745_v27 = vld [vmem:[%s6767_s14 + $0x73c] sm:$0xf0] }
 0x223   : > { %3040 = vmatpush.bf16.msra.mxu0 %v3916_v44  ;;  %3053 = vmatpush.bf16.msra.mxu1 %v4204_v45  ;;  %v4028_v44 = vor.u32 %v5054_v34, %v4025_v35  ;;  %v4316_v45 = vor.u32 %v5126_v38, %v4313_v39  ;;  %v4172_v34 = vor.u32 %v5090_v22, %v4169_v23  ;;  %v3845_v35 = vld [vmem:[%s6767_s14 + $0x34] sm:$0xf0]  ;;  %v5050_v23 = vld [vmem:[%s6767_s14 + $0x158] sm:$0xf0] }
 0x224   : > { %3066 = vmatpush.bf16.msra.mxu2 %v4492_v48  ;;  %3079 = vmatpush.bf16.msra.mxu3 %v4780_v49  ;;  %v4604_v48 = vor.u32 %v5198_v40, %v4601_v41  ;;  %v4892_v49 = vor.u32 %v5270_v42, %v4889_v43  ;;  %v4460_v38 = vor.u32 %v5162_v24, %v4457_v25  ;;  %v5153_v40 = vld [vmem:[%s6767_s14 + $0x494] sm:$0xf]  ;;  %v4421_v41 = vld [vmem:[%s6767_s14 + $0x4b4] sm:$0xf0] }
 0x225   : > { %v4748_v39 = vor.u32 %v5234_v26, %v4745_v27  ;;  %v5225_v42 = vld [vmem:[%s6767_s14 + $0x6d4] sm:$0xf]  ;;  %v4709_v43 = vld [vmem:[%s6767_s14 + $0x6f4] sm:$0xf0]  ;;  %v4424_v54 = vor.u32 %v5153_v40, %v4421_v41 }
 0x226   : > { %v4712_v55 = vor.u32 %v5225_v42, %v4709_v43  ;;  %v3995_v22 = vld [vmem:[%s6767_s14 + $0x138] sm:$0xf]  ;;  %v5041_v40 = vld [vmem:[%s6767_s14 + $0x110] sm:$0xf0] }
 0x227   : > { %3041 = vmatpush.bf16.msra.mxu0 %v3880_v57  ;;  %3054 = vmatpush.bf16.msra.mxu1 %v4168_v58  ;;  %v4280_v57 = vor.u32 %v5117_v50, %v4277_v51  ;;  %v5036_v58 = vld [vmem:[%s6767_s14 + $0xec] sm:$0xf]  ;;  %v5221_v51 = vld [vmem:[%s6767_s14 + $0x6b0] sm:$0xf0]  ;;  %v4283_v27 = vld [vmem:[%s6767_s14 + $0x378] sm:$0xf] }
 0x228   : > { %3067 = vmatpush.bf16.msra.mxu2 %v4456_v62  ;;  %3080 = vmatpush.bf16.msra.mxu3 %v4744_v63  ;;  %v5108_v62 = vld [vmem:[%s6767_s14 + $0x32c] sm:$0xf]  ;;  %v4241_v63 = vld [vmem:[%s6767_s14 + $0x34c] sm:$0xf0]  ;;  %v3956_v4 = vor.u32 %v5036_v58, %v3953_v59  ;;  %v4067_v58 = vld [vmem:[%s6767_s14 + $0x1c8] sm:$0xf] }
 0x229   : > { %v4244_v5 = vor.u32 %v5108_v62, %v4241_v63  ;;  %v5068_v59 = vld [vmem:[%s6767_s14 + $0x1e8] sm:$0xf0]  ;;  %v4968_v62 = vor.u32 %v5293_v53, %v4967_v52 }
 0x22a   : > { %v5140_v63 = vld [vmem:[%s6767_s14 + $0x428] sm:$0xf0] }
 0x22b   : > { %3042 = vmatpush.bf16.msra.mxu0 %v3844_v9  ;;  %3055 = vmatpush.bf16.msra.mxu1 %v4132_v10  ;;  %v4820_v9 = vor.u32 %v5252_v2, %v4817_v3  ;;  %v5099_v10 = vld [vmem:[%s6767_s14 + $0x2e4] sm:$0xf]  ;;  %v4931_v2 = vld [vmem:[%s6767_s14 + $0x888] sm:$0xf]  ;;  %v5284_v3 = vld [vmem:[%s6767_s14 + $0x8a8] sm:$0xf0] }
 0x22c   : > { %3068 = vmatpush.bf16.msra.mxu2 %v4420_v14  ;;  %3081 = vmatpush.bf16.msra.mxu3 %v4708_v15  ;;  %v5243_v14 = vld [vmem:[%s6767_s14 + $0x764] sm:$0xf]  ;;  %v4781_v15 = vld [vmem:[%s6767_s14 + $0x784] sm:$0xf0] }
 0x22e   : > { %3043 = vmatmul.bf16.vlgmr.msra.gmra.mxu0 %v6917_v30  ;;  %3056 = vmatmul.bf16.vlgmr.msra.gmra.mxu1 %v6919_v31 }
 0x22f   : > { %3087 = vmatpush.bf16.msrb.mxu0 %v4100_v16  ;;  %3100 = vmatpush.bf16.msrb.mxu1 %v4388_v17  ;;  %v3920_v16 = vor.u32 %v5027_v6, %v3917_v7  ;;  %v4208_v17 = vor.u32 %v5099_v10, %v4205_v11  ;;  %v4031_v7 = vld [vmem:[%s6767_s14 + $0x180] sm:$0xf]  ;;  %v4644_v10 = vor.u32 %v5212_v1, %v4643_v0  ;;  %v4499_v0 = vld [vmem:[%s6767_s14 + $0x528] sm:$0xf]  ;;  %v5176_v1 = vld [vmem:[%s6767_s14 + $0x548] sm:$0xf0] }
 0x230   : > { %3113 = vmatpush.bf16.msrb.mxu2 %v4676_v20  ;;  %3126 = vmatpush.bf16.msrb.mxu3 %v4964_v21  ;;  %v4496_v20 = vor.u32 %v5171_v12, %v4493_v13  ;;  %v4784_v21 = vor.u32 %v5243_v14, %v4781_v15  ;;  %v4932_v11 = vor.u32 %v5284_v3, %v4931_v2  ;;  %v5131_v12 = vld [vmem:[%s6767_s14 + $0x3e0] sm:$0xf0]  ;;  %v4607_v13 = vld [vmem:[%s6767_s14 + $0x600] sm:$0xf]  ;;  %v4787_v2 = vld [vmem:[%s6767_s14 + $0x768] sm:$0xf] }
 0x231   : > { %3069 = vmatmul.bf16.vlgmr.msra.gmra.mxu2 %v6921_v32  ;;  %3082 = vmatmul.bf16.vlgmr.msra.gmra.mxu3 %v6923_v33  ;;  %v5203_v15 = vld [vmem:[%s6767_s14 + $0x620] sm:$0xf0]  ;;  %v5248_v3 = vld [vmem:[%s6767_s14 + $0x788] sm:$0xf0] }
 0x232   : > { %v4608_v24 = vor.u32 %v5203_v15, %v4607_v13  ;;  %v4463_v13 = vld [vmem:[%s6767_s14 + $0x4e0] sm:$0xf] }
 0x233   : > { %3088 = vmatpush.bf16.msrb.mxu0 %v4064_v28  ;;  %3101 = vmatpush.bf16.msrb.mxu1 %v4352_v29  ;;  %v5009_v28 = vld [vmem:[%s6767_s14 + $0x14] sm:$0xf]  ;;  %v3884_v29 = vor.u32 %v5018_v18, %v3881_v19 }
 0x234   : > { %3114 = vmatpush.bf16.msrb.mxu2 %v4640_v36  ;;  %3127 = vmatpush.bf16.msrb.mxu3 %v4928_v37  ;;  %v5081_v36 = vld [vmem:[%s6767_s14 + $0x254] sm:$0xf]  ;;  %v4133_v37 = vld [vmem:[%s6767_s14 + $0x274] sm:$0xf0] }
 0x235   : > { %v4136_v50 = vor.u32 %v5081_v36, %v4133_v37  ;;  %v5266_v36 = vld [vmem:[%s6767_s14 + $0x818] sm:$0xf0]  ;;  %v3996_v37 = vor.u32 %v5050_v23, %v3995_v22  ;;  %v3851_v22 = vld [vmem:[%s6767_s14 + $0x18] sm:$0xf] }
 0x237   : > { %3089 = vmatpush.bf16.msrb.mxu0 %v4028_v44  ;;  %3102 = vmatpush.bf16.msrb.mxu1 %v4316_v45  ;;  %v4103_v44 = vld [vmem:[%s6767_s14 + $0x210] sm:$0xf]  ;;  %v5077_v45 = vld [vmem:[%s6767_s14 + $0x230] sm:$0xf0] }
 0x238   : > { %3115 = vmatpush.bf16.msrb.mxu2 %v4604_v48  ;;  %3128 = vmatpush.bf16.msrb.mxu3 %v4892_v49  ;;  %v4679_v48 = vld [vmem:[%s6767_s14 + $0x690] sm:$0xf]  ;;  %v3848_v49 = vor.u32 %v5009_v28, %v3845_v35  ;;  %v5122_v28 = vld [vmem:[%s6767_s14 + $0x398] sm:$0xf0]  ;;  %v4859_v35 = vld [vmem:[%s6767_s14 + $0x7f8] sm:$0xf] }
 0x239   : > { %v4860_v43 = vor.u32 %v5266_v36, %v4859_v35  ;;  %v4427_v35 = vld [vmem:[%s6767_s14 + $0x498] sm:$0xf]  ;;  %v5158_v36 = vld [vmem:[%s6767_s14 + $0x4b8] sm:$0xf0] }
 0x23b   : > { %3090 = vmatpush.bf16.msrb.mxu0 %v3992_v56  ;;  %3103 = vmatpush.bf16.msrb.mxu1 %v4280_v57  ;;  %v4104_v56 = vor.u32 %v5077_v45, %v4103_v44  ;;  %v4392_v57 = vor.u32 %v5149_v47, %v4391_v46  ;;  %v4247_v44 = vld [vmem:[%s6767_s14 + $0x330] sm:$0xf]  ;;  %v5113_v45 = vld [vmem:[%s6767_s14 + $0x350] sm:$0xf0] }
 0x23c   : > { %3116 = vmatpush.bf16.msrb.mxu2 %v4568_v60  ;;  %3129 = vmatpush.bf16.msrb.mxu3 %v4856_v61  ;;  %v4355_v60 = vld [vmem:[%s6767_s14 + $0x408] sm:$0xf]  ;;  %v4680_v61 = vor.u32 %v5221_v51, %v4679_v48  ;;  %v4535_v46 = vld [vmem:[%s6767_s14 + $0x570] sm:$0xf]  ;;  %v5257_v51 = vld [vmem:[%s6767_s14 + $0x7d0] sm:$0xf0] }
 0x23d   : > { %v4356_v6 = vor.u32 %v5140_v63, %v4355_v60  ;;  %v5104_v63 = vld [vmem:[%s6767_s14 + $0x308] sm:$0xf0] }
 0x23f   : > { %3091 = vmatpush.bf16.msrb.mxu0 %v3956_v4  ;;  %3104 = vmatpush.bf16.msrb.mxu1 %v4244_v5  ;;  %v7219_v4 = vld [vmem:[%s6958_s9] sm:$0xff]  ;;  %v4068_v5 = vor.u32 %v5068_v59, %v4067_v58 }
 0x240   : > { %3117 = vmatpush.bf16.msrb.mxu2 %v4532_v8  ;;  %3130 = vmatpush.bf16.msrb.mxu3 %v4820_v9  ;;  %v5059_v8 = vld [vmem:[%s6767_s14 + $0x1a0] sm:$0xf0]  ;;  %v4319_v9 = vld [vmem:[%s6767_s14 + $0x3c0] sm:$0xf]  ;;  %v1337_v14 = vperm.slane %v7219_v4, 0 }
 0x241   : > { %v5032_v58 = vld [vmem:[%s6767_s14 + $0xc8] sm:$0xf0] }
 0x243   : > { %3092 = vmatpush.bf16.msrb.mxu0 %v3920_v16  ;;  %3105 = vmatpush.bf16.msrb.mxu1 %v4208_v17  ;;  %v4895_v16 = vld [vmem:[%s6767_s14 + $0x840] sm:$0xf]  ;;  %v5275_v17 = vld [vmem:[%s6767_s14 + $0x860] sm:$0xf0] }
 0x244   : > { %3118 = vmatpush.bf16.msrb.mxu2 %v4496_v20  ;;  %3131 = vmatpush.bf16.msrb.mxu3 %v4784_v21  ;;  %v4032_v20 = vor.u32 %v5059_v8, %v4031_v7  ;;  %v4320_v21 = vor.u32 %v5131_v12, %v4319_v9  ;;  %v4896_v25 = vor.u32 %v5275_v17, %v4895_v16  ;;  %v3887_v7 = vld [vmem:[%s6767_s14 + $0x60] sm:$0xf]  ;;  %v5023_v8 = vld [vmem:[%s6767_s14 + $0x80] sm:$0xf0] }
 0x245   : > { %v4175_v9 = vld [vmem:[%s6767_s14 + $0x2a0] sm:$0xf]  ;;  %v5095_v12 = vld [vmem:[%s6767_s14 + $0x2c0] sm:$0xf0]  ;;  %v3888_v23 = vor.u32 %v5023_v8, %v3887_v7 }
 0x246   : > { %v5167_v17 = vld [vmem:[%s6767_s14 + $0x500] sm:$0xf0] }
 0x247   : > { %3093 = vmatpush.bf16.msrb.mxu0 %v3884_v29  ;;  %3106 = vmatpush.bf16.msrb.mxu1 %v4172_v34  ;;  %v4571_v29 = vld [vmem:[%s6767_s14 + $0x5b8] sm:$0xf]  ;;  %v5194_v34 = vld [vmem:[%s6767_s14 + $0x5d8] sm:$0xf0] }
 0x248   : > { %3119 = vmatpush.bf16.msrb.mxu2 %v4460_v38  ;;  %3132 = vmatpush.bf16.msrb.mxu3 %v4748_v39  ;;  %v4284_v38 = vor.u32 %v5122_v28, %v4283_v27  ;;  %v3959_v39 = vld [vmem:[%s6767_s14 + $0xf0] sm:$0xf]  ;;  %v4572_v42 = vor.u32 %v5194_v34, %v4571_v29  ;;  %v5086_v27 = vld [vmem:[%s6767_s14 + $0x278] sm:$0xf0]  ;;  %v4464_v28 = vor.u32 %v5167_v17, %v4463_v13  ;;  %v5271_v17 = vld [vmem:[%s6767_s14 + $0x844] sm:$0xf] }
 0x24a   : > { %v2836_v18 = vpop.f32.mrf.mxu0  ;;  %v2849_v19 = vpop.f32.mrf.mxu1 }
 0x24b   : > { %3094 = vmatpush.bf16.msrb.mxu0 %v3848_v49  ;;  %3107 = vmatpush.bf16.msrb.mxu1 %v4136_v50  ;;  %v2837_v26 = vadd.f32 %v2836_v18, %v1337_v14  ;;  %v5185_v49 = vld [vmem:[%s6767_s14 + $0x590] sm:$0xf0]  ;;  %v4823_v50 = vld [vmem:[%s6767_s14 + $0x7b0] sm:$0xf]  ;;  %v1338_v14 = vperm.slane %v7219_v4, 1 }
 0x24c   : > { %3120 = vmatpush.bf16.msrb.mxu2 %v4424_v54  ;;  %3133 = vmatpush.bf16.msrb.mxu3 %v4712_v55  ;;  %v3960_v55 = vor.u32 %v5041_v40, %v3959_v39  ;;  %v4536_v60 = vor.u32 %v5185_v49, %v4535_v46  ;;  %v4751_v18 = vld [vmem:[%s6767_s14 + $0x720] sm:$0xf]  ;;  %v5073_v39 = vld [vmem:[%s6767_s14 + $0x214] sm:$0xf]  ;;  %v4105_v40 = vld [vmem:[%s6767_s14 + $0x234] sm:$0xf0] }
 0x24d   : > { %v2850_v41 = vadd.f32 %v2849_v19, %v2837_v26  ;;  %v5239_v19 = vld [vmem:[%s6767_s14 + $0x740] sm:$0xf0]  ;;  %v4139_v26 = vld [vmem:[%s6767_s14 + $0x258] sm:$0xf] }
 0x24e   : > { %3095 = vmatmul.bf16.vlgmr.msrb.gmra.mxu0 %v6917_v30  ;;  %3108 = vmatmul.bf16.vlgmr.msrb.gmra.mxu1 %v6919_v31  ;;  %v4752_v29 = vor.u32 %v5239_v19, %v4751_v18  ;;  %v4681_v46 = vld [vmem:[%s6767_s14 + $0x6b4] sm:$0xf0]  ;;  %v4897_v18 = vld [vmem:[%s6767_s14 + $0x864] sm:$0xf0] }
 0x24f   : > { %3139 = vmatpush.bf16.msra.mxu0 %v4104_v56  ;;  %3152 = vmatpush.bf16.msra.mxu1 %v4392_v57  ;;  %v4248_v56 = vor.u32 %v5113_v45, %v4247_v44  ;;  %v3923_v57 = vld [vmem:[%s6767_s14 + $0xa8] sm:$0xf]  ;;  %v4140_v45 = vor.u32 %v5086_v27, %v4139_v26  ;;  %v4900_v27 = vor.u32 %v5271_v17, %v4897_v18  ;;  %v5163_v17 = vld [vmem:[%s6767_s14 + $0x4e4] sm:$0xf] }
 0x250   : > { %3165 = vmatpush.bf16.msra.mxu2 %v4680_v61  ;;  %3178 = vmatpush.bf16.msra.mxu3 %v4968_v62  ;;  %v4824_v61 = vor.u32 %v5257_v51, %v4823_v50  ;;  %v4211_v62 = vld [vmem:[%s6767_s14 + $0x2e8] sm:$0xf]  ;;  %v4428_v50 = vor.u32 %v5158_v36, %v4427_v35  ;;  %v4573_v35 = vld [vmem:[%s6767_s14 + $0x5dc] sm:$0xf0]  ;;  %v5262_v36 = vld [vmem:[%s6767_s14 + $0x7fc] sm:$0xf] }
 0x251   : > { %3121 = vmatmul.bf16.vlgmr.msrb.gmra.mxu2 %v6921_v32  ;;  %3134 = vmatmul.bf16.vlgmr.msrb.gmra.mxu3 %v6923_v33  ;;  %v2862_v47 = vpop.f32.mrf.mxu2  ;;  %v2875_v48 = vpop.f32.mrf.mxu3  ;;  %v4465_v18 = vld [vmem:[%s6767_s14 + $0x504] sm:$0xf0] }
 0x252   : > { %v2863_v52 = vadd.f32 %v2862_v47, %v2850_v41  ;;  %v2838_v53 = vpop.f32.mrf.mxu0  ;;  %v2851_v54 = vpop.f32.mrf.mxu1  ;;  %v5145_v41 = vld [vmem:[%s6767_s14 + $0x454] sm:$0xf] }
 0x253   : > { %3140 = vmatpush.bf16.msra.mxu0 %v4068_v5  ;;  %3153 = vmatpush.bf16.msra.mxu1 %v4356_v6  ;;  %v3924_v5 = vor.u32 %v5032_v58, %v3923_v57  ;;  %v4212_v6 = vor.u32 %v5104_v63, %v4211_v62  ;;  %v5289_v47 = vld [vmem:[%s6767_s14 + $0x8d4] sm:$0xf]  ;;  %v4069_v57 = vld [vmem:[%s6767_s14 + $0x1ec] sm:$0xf0]  ;;  %v5136_v63 = vld [vmem:[%s6767_s14 + $0x40c] sm:$0xf] }
 0x254   : > { %3166 = vmatpush.bf16.msra.mxu2 %v4644_v10  ;;  %3179 = vmatpush.bf16.msra.mxu3 %v4932_v11  ;;  %v2876_v59 = vadd.f32 %v2875_v48, %v2863_v52  ;;  %v4500_v10 = vor.u32 %v5176_v1, %v4499_v0  ;;  %v4788_v11 = vor.u32 %v5248_v3, %v4787_v2  ;;  %v4969_v48 = vld [vmem:[%s6767_s14 + $0x8f4] sm:$0xf0]  ;;  %v4357_v0 = vld [vmem:[%s6767_s14 + $0x42c] sm:$0xf0]  ;;  %v5208_v1 = vld [vmem:[%s6767_s14 + $0x64c] sm:$0xf] }
 0x255   : > { %v4108_v52 = vor.u32 %v5073_v39, %v4105_v40  ;;  %v4645_v2 = vld [vmem:[%s6767_s14 + $0x66c] sm:$0xf0]  ;;  %v5280_v3 = vld [vmem:[%s6767_s14 + $0x88c] sm:$0xf]  ;;  %v4360_v8 = vor.u32 %v5136_v63, %v4357_v0 }
 0x256   : > { %3295 = vst [vmem:[%s7263_s18] sm:$0xff] %v2876_v59  ;;  %v4972_v59 = vor.u32 %v5289_v47, %v4969_v48  ;;  %v5109_v47 = vld [vmem:[%s6767_s14 + $0x334] sm:$0xf]  ;;  %v4249_v48 = vld [vmem:[%s6767_s14 + $0x354] sm:$0xf0] }
 0x257   : > { %3141 = vmatpush.bf16.msra.mxu0 %v4032_v20  ;;  %3154 = vmatpush.bf16.msra.mxu1 %v4320_v21 }
 0x258   : > { %3167 = vmatpush.bf16.msra.mxu2 %v4608_v24  ;;  %3180 = vmatpush.bf16.msra.mxu3 %v4896_v25  ;;  %v4176_v24 = vor.u32 %v5095_v12, %v4175_v9  ;;  %v5014_v25 = vld [vmem:[%s6767_s14 + $0x38] sm:$0xf0]  ;;  %v5055_v9 = vld [vmem:[%s6767_s14 + $0x184] sm:$0xf]  ;;  %v4648_v12 = vor.u32 %v5208_v1, %v4645_v2  ;;  %v4501_v1 = vld [vmem:[%s6767_s14 + $0x54c] sm:$0xf0] }
 0x259   : > { %v2864_v15 = vpop.f32.mrf.mxu2  ;;  %v2877_v16 = vpop.f32.mrf.mxu3  ;;  %v3852_v44 = vor.u32 %v5014_v25, %v3851_v22  ;;  %v3997_v25 = vld [vmem:[%s6767_s14 + $0x15c] sm:$0xf0]  ;;  %v5244_v2 = vld [vmem:[%s6767_s14 + $0x76c] sm:$0xf] }
 0x25a   : > { %v2888_v20 = vpop.f32.mrf.mxu0  ;;  %v2901_v21 = vpop.f32.mrf.mxu1  ;;  %v5199_v15 = vld [vmem:[%s6767_s14 + $0x604] sm:$0xf]  ;;  %v4609_v16 = vld [vmem:[%s6767_s14 + $0x624] sm:$0xf0] }
 0x25b   : > { %3142 = vmatpush.bf16.msra.mxu0 %v3996_v37  ;;  %3155 = vmatpush.bf16.msra.mxu1 %v4284_v38  ;;  %v2889_v34 = vadd.f32 %v2888_v20, %v1338_v14  ;;  %v4715_v37 = vld [vmem:[%s6767_s14 + $0x6d8] sm:$0xf]  ;;  %v5230_v38 = vld [vmem:[%s6767_s14 + $0x6f8] sm:$0xf0]  ;;  %v4321_v14 = vld [vmem:[%s6767_s14 + $0x3e4] sm:$0xf0]  ;;  %v4612_v26 = vor.u32 %v5199_v15, %v4609_v16 }
 0x25c   : > { %3168 = vmatpush.bf16.msra.mxu2 %v4572_v42  ;;  %3181 = vmatpush.bf16.msra.mxu3 %v4860_v43  ;;  %v4393_v42 = vld [vmem:[%s6767_s14 + $0x474] sm:$0xf0]  ;;  %v5217_v43 = vld [vmem:[%s6767_s14 + $0x694] sm:$0xf]  ;;  %v4716_v51 = vor.u32 %v5230_v38, %v4715_v37  ;;  %v4861_v37 = vld [vmem:[%s6767_s14 + $0x81c] sm:$0xf0] }
 0x25d   : > { %v2902_v49 = vadd.f32 %v2901_v21, %v2889_v34  ;;  %v4396_v53 = vor.u32 %v5145_v41, %v4393_v42  ;;  %v4684_v58 = vor.u32 %v5217_v43, %v4681_v46  ;;  %v5190_v34 = vld [vmem:[%s6767_s14 + $0x5bc] sm:$0xf]  ;;  %v5037_v42 = vld [vmem:[%s6767_s14 + $0xf4] sm:$0xf]  ;;  %v3961_v43 = vld [vmem:[%s6767_s14 + $0x114] sm:$0xf0]  ;;  %v4864_v46 = vor.u32 %v5262_v36, %v4861_v37 }
 0x25e   : > { %v5091_v15 = vld [vmem:[%s6767_s14 + $0x2a4] sm:$0xf]  ;;  %v4177_v16 = vld [vmem:[%s6767_s14 + $0x2c4] sm:$0xf0] }
 0x25f   : > { %3143 = vmatpush.bf16.msra.mxu0 %v3960_v55  ;;  %3156 = vmatpush.bf16.msra.mxu1 %v4248_v56  ;;  %v5064_v56 = vld [vmem:[%s6767_s14 + $0x1cc] sm:$0xf] }
 0x260   : > { %3169 = vmatpush.bf16.msra.mxu2 %v4536_v60  ;;  %3182 = vmatpush.bf16.msra.mxu3 %v4824_v61  ;;  %v4072_v7 = vor.u32 %v5064_v56, %v4069_v57  ;;  %v3925_v56 = vld [vmem:[%s6767_s14 + $0xcc] sm:$0xf0] }
 0x261   : > { %v2914_v54 = vpop.f32.mrf.mxu2  ;;  %v2927_v55 = vpop.f32.mrf.mxu3 }
 0x262   : > { %v2915_v60 = vadd.f32 %v2914_v54, %v2902_v49  ;;  %v2890_v61 = vpop.f32.mrf.mxu0  ;;  %v2903_v62 = vpop.f32.mrf.mxu1  ;;  %v5181_v49 = vld [vmem:[%s6767_s14 + $0x574] sm:$0xf]  ;;  %v4252_v54 = vor.u32 %v5109_v47, %v4249_v48  ;;  %v4975_v47 = vld [vmem:[%s6767_s14 + $0x8d8] sm:$0xf]  ;;  %v5294_v48 = vld [vmem:[%s6767_s14 + $0x8f8] sm:$0xf0] }
 0x263   : > { %3144 = vmatpush.bf16.msra.mxu0 %v3924_v5  ;;  %3157 = vmatpush.bf16.msra.mxu1 %v4212_v6  ;;  %v4933_v5 = vld [vmem:[%s6767_s14 + $0x8ac] sm:$0xf0]  ;;  %v5172_v62 = vld [vmem:[%s6767_s14 + $0x52c] sm:$0xf] }
 0x264   : > { %3170 = vmatpush.bf16.msra.mxu2 %v4500_v10  ;;  %3183 = vmatpush.bf16.msra.mxu3 %v4788_v11  ;;  %v2928_v6 = vadd.f32 %v2927_v55, %v2915_v60  ;;  %v4033_v10 = vld [vmem:[%s6767_s14 + $0x1a4] sm:$0xf0]  ;;  %v5127_v11 = vld [vmem:[%s6767_s14 + $0x3c4] sm:$0xf]  ;;  %v4936_v13 = vor.u32 %v5280_v3, %v4933_v5  ;;  %v5028_v55 = vld [vmem:[%s6767_s14 + $0xac] sm:$0xf] }
 0x265   : > { %v4036_v19 = vor.u32 %v5055_v9, %v4033_v10  ;;  %v4324_v20 = vor.u32 %v5127_v11, %v4321_v14  ;;  %v5100_v60 = vld [vmem:[%s6767_s14 + $0x2ec] sm:$0xf]  ;;  %v4213_v61 = vld [vmem:[%s6767_s14 + $0x30c] sm:$0xf0]  ;;  %v5019_v10 = vld [vmem:[%s6767_s14 + $0x64] sm:$0xf] }
 0x266   : > { %3296 = vst [vmem:[%s7263_s18 + $0x8] sm:$0xff] %v2928_v6  ;;  %v4789_v3 = vld [vmem:[%s6767_s14 + $0x78c] sm:$0xf0]  ;;  %v4216_v9 = vor.u32 %v5100_v60, %v4213_v61  ;;  %v3889_v11 = vld [vmem:[%s6767_s14 + $0x84] sm:$0xf0] }
 0x267   : > { %3145 = vmatpush.bf16.msra.mxu0 %v3888_v23  ;;  %3158 = vmatpush.bf16.msra.mxu1 %v4176_v24  ;;  %v1339_v23 = vperm.slane %v7219_v4, 2  ;;  %v5046_v24 = vld [vmem:[%s6767_s14 + $0x13c] sm:$0xf]  ;;  %v4792_v14 = vor.u32 %v5244_v2, %v4789_v3  ;;  %v5213_v60 = vld [vmem:[%s6767_s14 + $0x670] sm:$0xf0] }
 0x268   : > { %3171 = vmatpush.bf16.msra.mxu2 %v4464_v28  ;;  %3184 = vmatpush.bf16.msra.mxu3 %v4752_v29  ;;  %v5118_v28 = vld [vmem:[%s6767_s14 + $0x37c] sm:$0xf]  ;;  %v4285_v29 = vld [vmem:[%s6767_s14 + $0x39c] sm:$0xf0]  ;;  %v4000_v40 = vor.u32 %v5046_v24, %v3997_v25  ;;  %v4939_v61 = vld [vmem:[%s6767_s14 + $0x890] sm:$0xf] }
 0x269   : > { %v2916_v21 = vpop.f32.mrf.mxu2  ;;  %v2929_v22 = vpop.f32.mrf.mxu3  ;;  %v4288_v41 = vor.u32 %v5118_v28, %v4285_v29  ;;  %v3853_v24 = vld [vmem:[%s6767_s14 + $0x3c] sm:$0xf0]  ;;  %v5082_v25 = vld [vmem:[%s6767_s14 + $0x25c] sm:$0xf]  ;;  %v5060_v2 = vld [vmem:[%s6767_s14 + $0x1a8] sm:$0xf0] }
 0x26a   : > { %v5010_v21 = vld [vmem:[%s6767_s14 + $0x1c] sm:$0xf]  ;;  %v3892_v22 = vor.u32 %v5019_v10, %v3889_v11  ;;  %v4903_v10 = vld [vmem:[%s6767_s14 + $0x848] sm:$0xf]  ;;  %v5276_v11 = vld [vmem:[%s6767_s14 + $0x868] sm:$0xf0] }
 0x26b   : > { %3146 = vmatpush.bf16.msra.mxu0 %v3852_v44  ;;  %3159 = vmatpush.bf16.msra.mxu1 %v4140_v45  ;;  %v2940_v38 = vpop.f32.mrf.mxu0  ;;  %v2953_v39 = vpop.f32.mrf.mxu1  ;;  %v4576_v45 = vor.u32 %v5190_v34, %v4573_v35  ;;  %v5154_v29 = vld [vmem:[%s6767_s14 + $0x49c] sm:$0xf]  ;;  %v4429_v34 = vld [vmem:[%s6767_s14 + $0x4bc] sm:$0xf0] }
 0x26c   : > { %3172 = vmatpush.bf16.msra.mxu2 %v4428_v50  ;;  %3185 = vmatpush.bf16.msra.mxu3 %v4716_v51  ;;  %v2941_v44 = vadd.f32 %v2940_v38, %v1339_v23  ;;  %v4537_v50 = vld [vmem:[%s6767_s14 + $0x594] sm:$0xf0]  ;;  %v5253_v51 = vld [vmem:[%s6767_s14 + $0x7b4] sm:$0xf]  ;;  %v4180_v23 = vor.u32 %v5091_v15, %v4177_v16  ;;  %v5226_v35 = vld [vmem:[%s6767_s14 + $0x6dc] sm:$0xf] }
 0x26d   : > { %v4717_v38 = vld [vmem:[%s6767_s14 + $0x6fc] sm:$0xf0]  ;;  %v5051_v16 = vld [vmem:[%s6767_s14 + $0x160] sm:$0xf0] }
 0x26e   : > { %3147 = vmatmul.bf16.vlgmr.msra.gmra.mxu0 %v6917_v30  ;;  %3160 = vmatmul.bf16.vlgmr.msra.gmra.mxu1 %v6919_v31  ;;  %v2954_v57 = vadd.f32 %v2953_v39, %v2941_v44  ;;  %v4111_v39 = vld [vmem:[%s6767_s14 + $0x218] sm:$0xf]  ;;  %v3856_v44 = vor.u32 %v5010_v21, %v3853_v24  ;;  %v4003_v15 = vld [vmem:[%s6767_s14 + $0x140] sm:$0xf]  ;;  %v5267_v24 = vld [vmem:[%s6767_s14 + $0x820] sm:$0xf0] }
 0x26f   : > { %3191 = vmatpush.bf16.msrb.mxu0 %v4108_v52  ;;  %3204 = vmatpush.bf16.msrb.mxu1 %v4396_v53  ;;  %v4825_v52 = vld [vmem:[%s6767_s14 + $0x7d4] sm:$0xf0]  ;;  %v3964_v53 = vor.u32 %v5037_v42, %v3961_v43  ;;  %v5150_v42 = vld [vmem:[%s6767_s14 + $0x478] sm:$0xf0]  ;;  %v4579_v21 = vld [vmem:[%s6767_s14 + $0x5c0] sm:$0xf] }
 0x270   : > { %3217 = vmatpush.bf16.msrb.mxu2 %v4684_v58  ;;  %3230 = vmatpush.bf16.msrb.mxu3 %v4972_v59  ;;  %v4540_v58 = vor.u32 %v5181_v49, %v4537_v50  ;;  %v4828_v59 = vor.u32 %v5253_v51, %v4825_v52  ;;  %v4687_v43 = vld [vmem:[%s6767_s14 + $0x698] sm:$0xf]  ;;  %v4432_v49 = vor.u32 %v5154_v29, %v4429_v34  ;;  %v5042_v34 = vld [vmem:[%s6767_s14 + $0x118] sm:$0xf0] }
 0x271   : > { %3173 = vmatmul.bf16.vlgmr.msra.gmra.mxu2 %v6921_v32  ;;  %3186 = vmatmul.bf16.vlgmr.msra.gmra.mxu3 %v6923_v33  ;;  %v4720_v50 = vor.u32 %v5226_v35, %v4717_v38  ;;  %v3967_v29 = vld [vmem:[%s6767_s14 + $0xf8] sm:$0xf] }
 0x272   : > { %v4255_v38 = vld [vmem:[%s6767_s14 + $0x338] sm:$0xf] }
 0x273   : > { %3192 = vmatpush.bf16.msrb.mxu0 %v4072_v7  ;;  %3205 = vmatpush.bf16.msrb.mxu1 %v4360_v8  ;;  %v2942_v6 = vpop.f32.mrf.mxu0  ;;  %v2955_v7 = vpop.f32.mrf.mxu1  ;;  %v3928_v8 = vor.u32 %v5028_v55, %v3925_v56  ;;  %v4976_v56 = vor.u32 %v5294_v48, %v4975_v47  ;;  %v5033_v47 = vld [vmem:[%s6767_s14 + $0xd0] sm:$0xf0] }
 0x274   : > { %3218 = vmatpush.bf16.msrb.mxu2 %v4648_v12  ;;  %3231 = vmatpush.bf16.msrb.mxu3 %v4936_v13  ;;  %v2966_v63 = vpop.f32.mrf.mxu2  ;;  %v2979_v0 = vpop.f32.mrf.mxu3  ;;  %v4504_v13 = vor.u32 %v5172_v62, %v4501_v1  ;;  %v5285_v62 = vld [vmem:[%s6767_s14 + $0x8b0] sm:$0xf0]  ;;  %v4039_v1 = vld [vmem:[%s6767_s14 + $0x188] sm:$0xf]  ;;  %v5132_v7 = vld [vmem:[%s6767_s14 + $0x3e8] sm:$0xf0] }
 0x275   : > { %v2967_v5 = vadd.f32 %v2966_v63, %v2954_v57  ;;  %v4363_v57 = vld [vmem:[%s6767_s14 + $0x410] sm:$0xf]  ;;  %v4327_v6 = vld [vmem:[%s6767_s14 + $0x3c8] sm:$0xf] }
 0x277   : > { %3193 = vmatpush.bf16.msrb.mxu0 %v4036_v19  ;;  %3206 = vmatpush.bf16.msrb.mxu1 %v4324_v20  ;;  %v2980_v12 = vadd.f32 %v2979_v0, %v2967_v5  ;;  %v5235_v19 = vld [vmem:[%s6767_s14 + $0x724] sm:$0xf]  ;;  %v4753_v20 = vld [vmem:[%s6767_s14 + $0x744] sm:$0xf0]  ;;  %v4940_v5 = vor.u32 %v5285_v62, %v4939_v61 }
 0x278   : > { %3219 = vmatpush.bf16.msrb.mxu2 %v4612_v26  ;;  %3232 = vmatpush.bf16.msrb.mxu3 %v4900_v27  ;;  %v4141_v26 = vld [vmem:[%s6767_s14 + $0x27c] sm:$0xf0]  ;;  %v4468_v27 = vor.u32 %v5163_v17, %v4465_v18  ;;  %v4756_v28 = vor.u32 %v5235_v19, %v4753_v20  ;;  %v4904_v18 = vor.u32 %v5276_v11, %v4903_v10  ;;  %v5123_v20 = vld [vmem:[%s6767_s14 + $0x3a0] sm:$0xf0]  ;;  %v4759_v10 = vld [vmem:[%s6767_s14 + $0x728] sm:$0xf] }
 0x279   : > { %3297 = vst [vmem:[%s7263_s18 + $0x10] sm:$0xff] %v2980_v12  ;;  %v4040_v12 = vor.u32 %v5060_v2, %v4039_v1  ;;  %v4291_v19 = vld [vmem:[%s6767_s14 + $0x380] sm:$0xf]  ;;  %v5024_v1 = vld [vmem:[%s6767_s14 + $0x88] sm:$0xf0] }
 0x27a   : > { %v5240_v11 = vld [vmem:[%s6767_s14 + $0x748] sm:$0xf0] }
 0x27b   : > { %3194 = vmatpush.bf16.msrb.mxu0 %v4000_v40  ;;  %3207 = vmatpush.bf16.msrb.mxu1 %v4288_v41  ;;  %v5078_v40 = vld [vmem:[%s6767_s14 + $0x238] sm:$0xf0]  ;;  %v4399_v41 = vld [vmem:[%s6767_s14 + $0x458] sm:$0xf] }
 0x27c   : > { %3220 = vmatpush.bf16.msrb.mxu2 %v4576_v45  ;;  %3233 = vmatpush.bf16.msrb.mxu3 %v4864_v46  ;;  %v2968_v36 = vpop.f32.mrf.mxu2  ;;  %v2981_v37 = vpop.f32.mrf.mxu3  ;;  %v4144_v45 = vor.u32 %v5082_v25, %v4141_v26  ;;  %v5222_v46 = vld [vmem:[%s6767_s14 + $0x6b8] sm:$0xf0]  ;;  %v4112_v51 = vor.u32 %v5078_v40, %v4111_v39  ;;  %v4400_v52 = vor.u32 %v5150_v42, %v4399_v41  ;;  %v4543_v40 = vld [vmem:[%s6767_s14 + $0x578] sm:$0xf] }
 0x27d   : > { %v4688_v55 = vor.u32 %v5222_v46, %v4687_v43  ;;  %v5114_v39 = vld [vmem:[%s6767_s14 + $0x358] sm:$0xf0]  ;;  %v4831_v42 = vld [vmem:[%s6767_s14 + $0x7b8] sm:$0xf]  ;;  %v3931_v46 = vld [vmem:[%s6767_s14 + $0xb0] sm:$0xf] }
 0x27e   : > { %v5186_v41 = vld [vmem:[%s6767_s14 + $0x598] sm:$0xf0]  ;;  %v3932_v62 = vor.u32 %v5033_v47, %v3931_v46 }
 0x27f   : > { %3195 = vmatpush.bf16.msrb.mxu0 %v3964_v53  ;;  %3208 = vmatpush.bf16.msrb.mxu1 %v4252_v54  ;;  %v4075_v53 = vld [vmem:[%s6767_s14 + $0x1d0] sm:$0xf]  ;;  %v5069_v54 = vld [vmem:[%s6767_s14 + $0x1f0] sm:$0xf0]  ;;  %v5258_v43 = vld [vmem:[%s6767_s14 + $0x7d8] sm:$0xf0] }
 0x280   : > { %3221 = vmatpush.bf16.msrb.mxu2 %v4540_v58  ;;  %3234 = vmatpush.bf16.msrb.mxu3 %v4828_v59  ;;  %v5141_v58 = vld [vmem:[%s6767_s14 + $0x430] sm:$0xf0]  ;;  %v4651_v59 = vld [vmem:[%s6767_s14 + $0x650] sm:$0xf]  ;;  %v4076_v63 = vor.u32 %v5069_v54, %v4075_v53 }
 0x281   : > { %v4364_v0 = vor.u32 %v5141_v58, %v4363_v57  ;;  %v4652_v3 = vor.u32 %v5213_v60, %v4651_v59  ;;  %v4507_v53 = vld [vmem:[%s6767_s14 + $0x530] sm:$0xf]  ;;  %v5249_v58 = vld [vmem:[%s6767_s14 + $0x790] sm:$0xf0] }
 0x282   : > { %v4795_v57 = vld [vmem:[%s6767_s14 + $0x770] sm:$0xf] }
 0x283   : > { %3196 = vmatpush.bf16.msrb.mxu0 %v3928_v8  ;;  %3209 = vmatpush.bf16.msrb.mxu1 %v4216_v9  ;;  %v4615_v8 = vld [vmem:[%s6767_s14 + $0x608] sm:$0xf]  ;;  %v5204_v9 = vld [vmem:[%s6767_s14 + $0x628] sm:$0xf0] }
 0x284   : > { %3222 = vmatpush.bf16.msrb.mxu2 %v4504_v13  ;;  %3235 = vmatpush.bf16.msrb.mxu3 %v4792_v14  ;;  %v4328_v13 = vor.u32 %v5132_v7, %v4327_v6  ;;  %v1340_v14 = vperm.slane %v7219_v4, 3  ;;  %v4616_v17 = vor.u32 %v5204_v9, %v4615_v8  ;;  %v4183_v6 = vld [vmem:[%s6767_s14 + $0x2a8] sm:$0xf]  ;;  %v5096_v7 = vld [vmem:[%s6767_s14 + $0x2c8] sm:$0xf0] }
 0x285   : > { %v4471_v8 = vld [vmem:[%s6767_s14 + $0x4e8] sm:$0xf]  ;;  %v5168_v9 = vld [vmem:[%s6767_s14 + $0x508] sm:$0xf0] }
 0x287   : > { %3197 = vmatpush.bf16.msrb.mxu0 %v3892_v22  ;;  %3210 = vmatpush.bf16.msrb.mxu1 %v4180_v23  ;;  %v5195_v22 = vld [vmem:[%s6767_s14 + $0x5e0] sm:$0xf0]  ;;  %v4867_v23 = vld [vmem:[%s6767_s14 + $0x800] sm:$0xf] }
 0x288   : > { %3223 = vmatpush.bf16.msrb.mxu2 %v4468_v27  ;;  %3236 = vmatpush.bf16.msrb.mxu3 %v4756_v28  ;;  %v4004_v27 = vor.u32 %v5051_v16, %v4003_v15  ;;  %v4292_v28 = vor.u32 %v5123_v20, %v4291_v19  ;;  %v4580_v36 = vor.u32 %v5195_v22, %v4579_v21  ;;  %v5015_v15 = vld [vmem:[%s6767_s14 + $0x40] sm:$0xf0]  ;;  %v4435_v20 = vld [vmem:[%s6767_s14 + $0x4a0] sm:$0xf] }
 0x289   : > { %v4868_v37 = vor.u32 %v5267_v24, %v4867_v23  ;;  %v4472_v16 = vor.u32 %v5168_v9, %v4471_v8  ;;  %v5087_v19 = vld [vmem:[%s6767_s14 + $0x280] sm:$0xf0]  ;;  %v4723_v24 = vld [vmem:[%s6767_s14 + $0x6e0] sm:$0xf] }
 0x28a   : > { %v5159_v23 = vld [vmem:[%s6767_s14 + $0x4c0] sm:$0xf0] }
 0x28b   : > { %3198 = vmatpush.bf16.msrb.mxu0 %v3856_v44  ;;  %3211 = vmatpush.bf16.msrb.mxu1 %v4144_v45  ;;  %v2992_v25 = vpop.f32.mrf.mxu0  ;;  %v3005_v26 = vpop.f32.mrf.mxu1  ;;  %v3968_v44 = vor.u32 %v5042_v34, %v3967_v29  ;;  %v4256_v45 = vor.u32 %v5114_v39, %v4255_v38  ;;  %v1341_v34 = vperm.slane %v7219_v4, 4 }
 0x28c   : > { %3224 = vmatpush.bf16.msrb.mxu2 %v4432_v49  ;;  %3237 = vmatpush.bf16.msrb.mxu3 %v4720_v50  ;;  %v2993_v35 = vadd.f32 %v2992_v25, %v1340_v14  ;;  %v4544_v49 = vor.u32 %v5186_v41, %v4543_v40  ;;  %v4832_v50 = vor.u32 %v5258_v43, %v4831_v42  ;;  %v3859_v14 = vld [vmem:[%s6767_s14 + $0x20] sm:$0xf]  ;;  %v5231_v25 = vld [vmem:[%s6767_s14 + $0x700] sm:$0xf0] }
 0x28d   : > { %v4724_v29 = vor.u32 %v5231_v25, %v4723_v24 }
 0x28e   : > { %3199 = vmatmul.bf16.vlgmr.msrb.gmra.mxu0 %v6917_v30  ;;  %3212 = vmatmul.bf16.vlgmr.msrb.gmra.mxu1 %v6919_v31  ;;  %v3006_v48 = vadd.f32 %v3005_v26, %v2993_v35  ;;  %v3860_v26 = vor.u32 %v5015_v15, %v3859_v14 }
 0x28f   : > { %3243 = vmatpush.bf16.msra.mxu0 %v4112_v51  ;;  %3256 = vmatpush.bf16.msra.mxu1 %v4400_v52  ;;  %v4219_v51 = vld [vmem:[%s6767_s14 + $0x2f0] sm:$0xf]  ;;  %v5105_v52 = vld [vmem:[%s6767_s14 + $0x310] sm:$0xf0] }
 0x290   : > { %3269 = vmatpush.bf16.msra.mxu2 %v4688_v55  ;;  %3282 = vmatpush.bf16.msra.mxu3 %v4976_v56  ;;  %v5177_v56 = vld [vmem:[%s6767_s14 + $0x550] sm:$0xf0] }
 0x291   : > { %3225 = vmatmul.bf16.vlgmr.msrb.gmra.mxu2 %v6921_v32  ;;  %3238 = vmatmul.bf16.vlgmr.msrb.gmra.mxu3 %v6923_v33 }
 0x293   : > { %3244 = vmatpush.bf16.msra.mxu0 %v4076_v63  ;;  %3257 = vmatpush.bf16.msra.mxu1 %v4364_v0  ;;  %v2994_v60 = vpop.f32.mrf.mxu0  ;;  %v3007_v61 = vpop.f32.mrf.mxu1  ;;  %v4220_v63 = vor.u32 %v5105_v52, %v4219_v51  ;;  %v3895_v0 = vld [vmem:[%s6767_s14 + $0x68] sm:$0xf] }
 0x294   : > { %3270 = vmatpush.bf16.msra.mxu2 %v4652_v3  ;;  %3283 = vmatpush.bf16.msra.mxu3 %v4940_v5  ;;  %v3018_v54 = vpop.f32.mrf.mxu2  ;;  %v3031_v55 = vpop.f32.mrf.mxu3  ;;  %v4508_v3 = vor.u32 %v5177_v56, %v4507_v53  ;;  %v4796_v5 = vor.u32 %v5249_v58, %v4795_v57  ;;  %v1343_v56 = vperm.slane %v7219_v4, 6 }
 0x295   : > { %v3019_v59 = vadd.f32 %v3018_v54, %v3006_v48 }
 0x297   : > { %3245 = vmatpush.bf16.msra.mxu0 %v4040_v12  ;;  %3258 = vmatpush.bf16.msra.mxu1 %v4328_v13  ;;  %v3032_v2 = vadd.f32 %v3031_v55, %v3019_v59  ;;  %v3896_v12 = vor.u32 %v5024_v1, %v3895_v0  ;;  %v4184_v13 = vor.u32 %v5096_v7, %v4183_v6  ;;  %v1344_v6 = vperm.slane %v7219_v4, 7 }
 0x298   : > { %3271 = vmatpush.bf16.msra.mxu2 %v4616_v17  ;;  %3284 = vmatpush.bf16.msra.mxu3 %v4904_v18  ;;  %v4760_v17 = vor.u32 %v5240_v11, %v4759_v10  ;;  %v4147_v18 = vld [vmem:[%s6767_s14 + $0x260] sm:$0xf]  ;;  %s7445_s14 = scalar_lea.vmem (%p5856_p6), %s7743_s5, %s5295_s12  }
 0x299   : > { %3298 = vst [vmem:[%s7263_s18 + $0x18] sm:$0xff] %v3032_v2 }
 0x29b   : > { %3246 = vmatpush.bf16.msra.mxu0 %v4004_v27  ;;  %3259 = vmatpush.bf16.msra.mxu1 %v4292_v28  ;;  %v4148_v27 = vor.u32 %v5087_v19, %v4147_v18  ;;  %v4436_v28 = vor.u32 %v5159_v23, %v4435_v20  ;;  %v5548_v19 = vld [vmem:[%s6958_s9 + $0x8] ss:$0 sm:$0xff] }
 0x29c   : > { %3272 = vmatpush.bf16.msra.mxu2 %v4580_v36  ;;  %3285 = vmatpush.bf16.msra.mxu3 %v4868_v37  ;;  %v3020_v21 = vpop.f32.mrf.mxu2  ;;  %v3033_v22 = vpop.f32.mrf.mxu3 }
 0x29f   : > { %3247 = vmatpush.bf16.msra.mxu0 %v3968_v44  ;;  %3260 = vmatpush.bf16.msra.mxu1 %v4256_v45 }
 0x2a0   : > { %3273 = vmatpush.bf16.msra.mxu2 %v4544_v49  ;;  %3286 = vmatpush.bf16.msra.mxu3 %v4832_v50 }
 0x2a3   : > { %3248 = vmatpush.bf16.msra.mxu0 %v3932_v62  ;;  %3261 = vmatpush.bf16.msra.mxu1 %v4220_v63 }
 0x2a4   : > { %3274 = vmatpush.bf16.msra.mxu2 %v4508_v3  ;;  %3287 = vmatpush.bf16.msra.mxu3 %v4796_v5 }
 0x2a7   : > { %3249 = vmatpush.bf16.msra.mxu0 %v3896_v12  ;;  %3262 = vmatpush.bf16.msra.mxu1 %v4184_v13 }
 0x2a8   : > { %3275 = vmatpush.bf16.msra.mxu2 %v4472_v16  ;;  %3288 = vmatpush.bf16.msra.mxu3 %v4760_v17 }
 0x2ab   : > { %3250 = vmatpush.bf16.msra.mxu0 %v3860_v26  ;;  %3263 = vmatpush.bf16.msra.mxu1 %v4148_v27  ;;  %v3044_v35 = vpop.f32.mrf.mxu0  ;;  %v3057_v36 = vpop.f32.mrf.mxu1 }
 0x2ac   : > { %3276 = vmatpush.bf16.msra.mxu2 %v4436_v28  ;;  %3289 = vmatpush.bf16.msra.mxu3 %v4724_v29  ;;  %v3045_v37 = vadd.f32 %v3044_v35, %v1341_v34 }
 0x2ae   : > { %3251 = vmatmul.bf16.vlgmr.msra.gmra.mxu0 %v6917_v30  ;;  %3264 = vmatmul.bf16.vlgmr.msra.gmra.mxu1 %v6919_v31  ;;  %v3058_v38 = vadd.f32 %v3057_v36, %v3045_v37 }
 0x2af   : > { %3277 = vmatmul.bf16.vlgmr.msra.gmra.mxu2 %v6921_v32  ;;  %3290 = vmatmul.bf16.vlgmr.msra.gmra.mxu3 %v6923_v33  ;;  %v1342_v32 = vperm.slane %v7219_v4, 5 }
 0x2b3   : > { %v3046_v42 = vpop.f32.mrf.mxu0  ;;  %v3059_v43 = vpop.f32.mrf.mxu1 }
 0x2b4   : > { %v3070_v39 = vpop.f32.mrf.mxu2  ;;  %v3083_v40 = vpop.f32.mrf.mxu3 }
 0x2b5   : > { %v3071_v41 = vadd.f32 %v3070_v39, %v3058_v38 }
 0x2b7   : > { %v3084_v44 = vadd.f32 %v3083_v40, %v3071_v41 }
 0x2b9   : > { %3299 = vst [vmem:[%s7263_s18 + $0x20] sm:$0xff] %v3084_v44 }
 0x2bc   : > { %v3072_v30 = vpop.f32.mrf.mxu2  ;;  %v3085_v31 = vpop.f32.mrf.mxu3 }
 0x2cb   : > { %v3096_v45 = vpop.f32.mrf.mxu0  ;;  %v3109_v33 = vpop.f32.mrf.mxu1 }
 0x2cc   : > { %v3097_v46 = vadd.f32 %v3096_v45, %v1342_v32 }
 0x2ce   : > { %v3110_v47 = vadd.f32 %v3109_v33, %v3097_v46 }
 0x2d3   : > { %v3098_v51 = vpop.f32.mrf.mxu0  ;;  %v3111_v52 = vpop.f32.mrf.mxu1 }
 0x2d4   : > { %v3122_v48 = vpop.f32.mrf.mxu2  ;;  %v3135_v49 = vpop.f32.mrf.mxu3 }
 0x2d5   : > { %v3123_v50 = vadd.f32 %v3122_v48, %v3110_v47 }
 0x2d7   : > { %v3136_v53 = vadd.f32 %v3135_v49, %v3123_v50 }
 0x2d9   : > { %3300 = vst [vmem:[%s7263_s18 + $0x28] sm:$0xff] %v3136_v53 }
 0x2dc   : > { %v3124_v54 = vpop.f32.mrf.mxu2  ;;  %v3137_v55 = vpop.f32.mrf.mxu3 }
 0x2eb   : > { %v3148_v57 = vpop.f32.mrf.mxu0  ;;  %v3161_v58 = vpop.f32.mrf.mxu1 }
 0x2ec   : > { %v3149_v59 = vadd.f32 %v3148_v57, %v1343_v56 }
 0x2ee   : > { %v3162_v60 = vadd.f32 %v3161_v58, %v3149_v59 }
 0x2f3   : > { %v3150_v0 = vpop.f32.mrf.mxu0  ;;  %v3163_v1 = vpop.f32.mrf.mxu1 }
 0x2f4   : > { %v3174_v61 = vpop.f32.mrf.mxu2  ;;  %v3187_v62 = vpop.f32.mrf.mxu3 }
 0x2f5   : > { %v3175_v63 = vadd.f32 %v3174_v61, %v3162_v60 }
 0x2f7   : > { %v3188_v2 = vadd.f32 %v3187_v62, %v3175_v63 }
 0x2f9   : > { %3301 = vst [vmem:[%s7263_s18 + $0x30] sm:$0xff] %v3188_v2 }
 0x2fc   : > { %v3176_v3 = vpop.f32.mrf.mxu2  ;;  %v3189_v5 = vpop.f32.mrf.mxu3 }
 0x30b   : > { %v3200_v7 = vpop.f32.mrf.mxu0  ;;  %v3213_v8 = vpop.f32.mrf.mxu1 }
 0x30c   : > { %v3201_v9 = vadd.f32 %v3200_v7, %v1344_v6 }
 0x30e   : > { %v3214_v10 = vadd.f32 %v3213_v8, %v3201_v9 }
 0x313   : > { %v3202_v14 = vpop.f32.mrf.mxu0  ;;  %v3215_v15 = vpop.f32.mrf.mxu1 }
 0x314   : > { %v3226_v11 = vpop.f32.mrf.mxu2  ;;  %v3239_v12 = vpop.f32.mrf.mxu3 }
 0x315   : > { %v3227_v13 = vadd.f32 %v3226_v11, %v3214_v10 }
 0x317   : > { %v3240_v16 = vadd.f32 %v3239_v12, %v3227_v13 }
 0x319   : > { %3302 = vst [vmem:[%s7263_s18 + $0x38] sm:$0xff] %v3240_v16 }
 0x31c   : > { %v3228_v17 = vpop.f32.mrf.mxu2  ;;  %v3241_v18 = vpop.f32.mrf.mxu3 }
 0x32b   : > { %v3252_v20 = vpop.f32.mrf.mxu0  ;;  %v3265_v21 = vpop.f32.mrf.mxu1 }
 0x32c   : > { %v3253_v22 = vadd.f32 %v5548_v19, %v3252_v20 }
 0x32e   : > { %v3266_v23 = vadd.f32 %v3265_v21, %v3253_v22 }
 0x332   : > { %v3278_v4 = vpop.f32.mrf.mxu2  ;;  %v3291_v24 = vpop.f32.mrf.mxu3 }
 0x333   : > { %v3279_v25 = vadd.f32 %v3278_v4, %v3266_v23  ;;  %v3254_v26 = vpop.f32.mrf.mxu0  ;;  %v3267_v27 = vpop.f32.mrf.mxu1 }
 0x335   : > { %v3292_v28 = vadd.f32 %v3291_v24, %v3279_v25 }
 0x336   : > { %3310 = sbr.rel (!%p5856_p6) target bundleno = 975 (0x3cf), region = 96 }
 0x337   : > { %3303 = vst [vmem:[%s7263_s18 + $0x40] sm:$0xff] %v3292_v28 }
 0x33a   : > { %v3280_v29 = vpop.f32.mrf.mxu2  ;;  %v3293_v34 = vpop.f32.mrf.mxu3 }
 0x33b   : > { %s7779_s13 = smov (!%p3313_p9, %s3312_s13), 9 }
 0x33c   : > { %s7447_s16 = sshll.u32 %s7779_s13, 3 }
 0x33d   : > { %p4981_p10 = scmp.eq.s32.totalorder %s7447_s16, 0 }
 0x33e   : > { %p3325_p11 = scmp.lt.u32.totalorder (!%p4981_p10), %s7447_s16, 8 }
 0x33f   : > { %3324 = sbr.rel (%p4981_p10) target bundleno = 975 (0x3cf), region = 100 }
 0x344   : > { %3328 = sbr.rel (%p3325_p11) target bundleno = 966 (0x3c6), region = 104  ;;  %s7452_s27 = sand.u32 (!%p3325_p11), 7, %s7447_s16  }
 0x345   : > { %p3345_p6 = scmp.eq.s32.totalorder (!%p3325_p11), %s7452_s27, 0  ;;  %p4982_p12 = scmp.ne.s32.totalorder (!%p3325_p11), %s7452_s27, 0 }
 0x349   : > { %3348 = sbr.rel (%p4982_p12) target bundleno = 901 (0x385), region = 119  ;;  %s3349_s20 = sshrl.u32 (!%p4982_p12), %s7447_s16, 3 }
 0x34a   : > { %s7459_s17 = sshrl.u32 (!%p4982_p12), %s3349_s20, 5 }
 0x34b   : > { %p4983_p13 = scmp.le.s32.totalorder (!%p4982_p12), %s7459_s17, 0 }
 0x34e   : > { %3709 = sbr.rel (%p4983_p13) target bundleno = 884 (0x374), region = 243  ;;  %s7755_s24 = smov (!%p4983_p13), %s7445_s14 }
 0x34f   : > { %s7756_s29 = smov (!%p4983_p13), %s7263_s18  ;;  %s7468_s30 = smov (!%p4983_p13), 0  }
 0x350   : > { %s7470_s6 = smov (!%p4983_p13), 0  }
 0x353 LB: >> { %v3360_v35 = vld [vmem:[%s5725_s29] sm:$0xff]  ;;  %v3362_v36 = vld [vmem:[%s5725_s29 + $0x8] sm:$0xff]  ;;  %v3364_v37 = vld [vmem:[%s5725_s29 + $0x10] sm:$0xff]  ;;  %s3424_s7 = sadd.s32 1, %s5729_s30  ;;  %s3354_s6 = sadd.s32 1, %s5733_s6   ;;  %s5733_s6 = sphi %s7470_s6, %s3354_s6   ;;  %s5729_s30 = sphi %s7468_s30, %s7759_s30   ;;  %s5725_s29 = sphi %s7756_s29, %s7758_s29   ;;  %s5721_s24 = sphi %s7755_s24, %s7757_s24  }
 0x354   : >> { %3361 = vst [vmem:[%s5721_s24] sm:$0xff] %v3360_v35  ;;  %v3366_v38 = vld [vmem:[%s5725_s29 + $0x18] sm:$0xff]  ;;  %p3425_p0 = scmp.ge.s32.totalorder %s3424_s7, %s7459_s17  ;;  %v3368_v39 = vld [vmem:[%s5725_s29 + $0x20] sm:$0xff]  ;;  %v3370_v40 = vld [vmem:[%s5725_s29 + $0x28] sm:$0xff]  ;;  %p3353_p1 = scmp.ge.s32.totalorder %s3354_s6, %s7459_s17 }
 0x355   : >> { %3363 = vst [vmem:[%s5721_s24 + $0x8] sm:$0xff] %v3362_v36  ;;  %v3372_v41 = vld [vmem:[%s5725_s29 + $0x30] sm:$0xff]  ;;  %v3374_v42 = vld [vmem:[%s5725_s29 + $0x38] sm:$0xff]  ;;  %v3376_v43 = vld [vmem:[%s5725_s29 + $0x40] sm:$0xff] }
 0x356   : >> { %3365 = vst [vmem:[%s5721_s24 + $0x10] sm:$0xff] %v3364_v37  ;;  %s7781_s7 = smov (%p3425_p0, %s3424_s7), 0  ;;  %v3378_v44 = vld [vmem:[%s5725_s29 + $0x48] sm:$0xff]  ;;  %v3380_v30 = vld [vmem:[%s5725_s29 + $0x50] sm:$0xff]  ;;  %v3382_v31 = vld [vmem:[%s5725_s29 + $0x58] sm:$0xff] }
 0x357   : >> { %3367 = vst [vmem:[%s5721_s24 + $0x18] sm:$0xff] %v3366_v38  ;;  %s4984_s8 = sshll.u32 %s7781_s7, 8  ;;  %v3384_v32 = vld [vmem:[%s5725_s29 + $0x60] sm:$0xff]  ;;  %v3386_v45 = vld [vmem:[%s5725_s29 + $0x68] sm:$0xff]  ;;  %v3388_v33 = vld [vmem:[%s5725_s29 + $0x70] sm:$0xff]  ;;  %s7759_s30 = smov %s7781_s7 }
 0x358   : >> { %3369 = vst [vmem:[%s5721_s24 + $0x20] sm:$0xff] %v3368_v39  ;;  %s7502_s25 = scalar_lea.vmem %s7263_s18, %s4984_s8 [#allocation3]   ;;  %s7505_s15 = scalar_lea.vmem %s7445_s14, %s4984_s8   ;;  %v3390_v46 = vld [vmem:[%s5725_s29 + $0x78] sm:$0xff]  ;;  %v3392_v47 = vld [vmem:[%s5725_s29 + $0x80] sm:$0xff]  ;;  %v3394_v48 = vld [vmem:[%s5725_s29 + $0x88] sm:$0xff] }
 0x359   : >> { %3371 = vst [vmem:[%s5721_s24 + $0x28] sm:$0xff] %v3370_v40  ;;  %v3396_v49 = vld [vmem:[%s5725_s29 + $0x90] sm:$0xff]  ;;  %v3398_v50 = vld [vmem:[%s5725_s29 + $0x98] sm:$0xff]  ;;  %v3400_v51 = vld [vmem:[%s5725_s29 + $0xa0] sm:$0xff] }
 0x35a   : >> { %3373 = vst [vmem:[%s5721_s24 + $0x30] sm:$0xff] %v3372_v41  ;;  %v3402_v52 = vld [vmem:[%s5725_s29 + $0xa8] sm:$0xff]  ;;  %v3404_v53 = vld [vmem:[%s5725_s29 + $0xb0] sm:$0xff]  ;;  %v3406_v54 = vld [vmem:[%s5725_s29 + $0xb8] sm:$0xff] }
 0x35b   : >> { %3375 = vst [vmem:[%s5721_s24 + $0x38] sm:$0xff] %v3374_v42  ;;  %v3408_v55 = vld [vmem:[%s5725_s29 + $0xc0] sm:$0xff]  ;;  %v3410_v56 = vld [vmem:[%s5725_s29 + $0xc8] sm:$0xff]  ;;  %v3412_v57 = vld [vmem:[%s5725_s29 + $0xd0] sm:$0xff] }
 0x35c   : >> { %3377 = vst [vmem:[%s5721_s24 + $0x40] sm:$0xff] %v3376_v43  ;;  %v3414_v58 = vld [vmem:[%s5725_s29 + $0xd8] sm:$0xff]  ;;  %v3416_v59 = vld [vmem:[%s5725_s29 + $0xe0] sm:$0xff]  ;;  %v3418_v60 = vld [vmem:[%s5725_s29 + $0xe8] sm:$0xff] }
 0x35d   : >> { %3379 = vst [vmem:[%s5721_s24 + $0x48] sm:$0xff] %v3378_v44  ;;  %v3420_v61 = vld [vmem:[%s5725_s29 + $0xf0] sm:$0xff]  ;;  %v3422_v62 = vld [vmem:[%s5725_s29 + $0xf8] sm:$0xff]  ;;  %s7758_s29 = smov %s7502_s25 }
 0x35e   : >> { %3381 = vst [vmem:[%s5721_s24 + $0x50] sm:$0xff] %v3380_v30 }
 0x35f   : >> { %3383 = vst [vmem:[%s5721_s24 + $0x58] sm:$0xff] %v3382_v31 }
 0x360   : >> { %3385 = vst [vmem:[%s5721_s24 + $0x60] sm:$0xff] %v3384_v32 }
 0x361   : >> { %3387 = vst [vmem:[%s5721_s24 + $0x68] sm:$0xff] %v3386_v45 }
 0x362   : >> { %3389 = vst [vmem:[%s5721_s24 + $0x70] sm:$0xff] %v3388_v33 }
 0x363   : >> { %3391 = vst [vmem:[%s5721_s24 + $0x78] sm:$0xff] %v3390_v46 }
 0x364   : >> { %3393 = vst [vmem:[%s5721_s24 + $0x80] sm:$0xff] %v3392_v47 }
 0x365   : >> { %3395 = vst [vmem:[%s5721_s24 + $0x88] sm:$0xff] %v3394_v48 }
 0x366   : >> { %3397 = vst [vmem:[%s5721_s24 + $0x90] sm:$0xff] %v3396_v49 }
 0x367   : >> { %3399 = vst [vmem:[%s5721_s24 + $0x98] sm:$0xff] %v3398_v50 }
 0x368   : >> { %3401 = vst [vmem:[%s5721_s24 + $0xa0] sm:$0xff] %v3400_v51 }
 0x369   : >> { %3403 = vst [vmem:[%s5721_s24 + $0xa8] sm:$0xff] %v3402_v52 }
 0x36a   : >> { %3405 = vst [vmem:[%s5721_s24 + $0xb0] sm:$0xff] %v3404_v53 }
 0x36b   : >> { %3407 = vst [vmem:[%s5721_s24 + $0xb8] sm:$0xff] %v3406_v54 }
 0x36c   : >> { %3409 = vst [vmem:[%s5721_s24 + $0xc0] sm:$0xff] %v3408_v55 }
 0x36d   : >> { %3411 = vst [vmem:[%s5721_s24 + $0xc8] sm:$0xff] %v3410_v56 }
 0x36e   : >> { %3413 = vst [vmem:[%s5721_s24 + $0xd0] sm:$0xff] %v3412_v57 }
 0x36f   : >> { %3415 = vst [vmem:[%s5721_s24 + $0xd8] sm:$0xff] %v3414_v58  ;;  %3356 = sbr.rel (!%p3353_p1) target bundleno = 851 (0x353), region = 249 }
 0x370   : >> { %3417 = vst [vmem:[%s5721_s24 + $0xe0] sm:$0xff] %v3416_v59 }
 0x371   : >> { %3419 = vst [vmem:[%s5721_s24 + $0xe8] sm:$0xff] %v3418_v60 }
 0x372   : >> { %3421 = vst [vmem:[%s5721_s24 + $0xf0] sm:$0xff] %v3420_v61 }
 0x373   : >> { %3423 = vst [vmem:[%s5721_s24 + $0xf8] sm:$0xff] %v3422_v62  ;;  %s7757_s24 = smov %s7505_s15 }
 0x374 PF: > { %s7571_s9 = sand.u32 31, %s3349_s20   ;;  %s5296_s10 = sshll.u32 %s7459_s17, 8 }
 0x375   : > { %s3435_s13 = scalar_lea.vmem %s7263_s18, %s5296_s10 [#allocation3]   ;;  %s3437_s12 = scalar_lea.vmem %s7445_s14, %s5296_s10  }
 0x376   : > { %p4989_p2 = scmp.le.s32.totalorder %s7571_s9, 0 }
 0x377   : > { %s5735_s26 = smov (!%p4989_p2), %s3437_s12   ;;  %s5739_s11 = smov (!%p4989_p2), %s3435_s13  }
 0x378   : > { %3723 = sbr.rel (%p4989_p2) target bundleno = 901 (0x385), region = 254  ;;  %s5743_s7 = smov (!%p4989_p2), 0  }
 0x379   : > { %s5747_s8 = smov (!%p4989_p2), 0  }
 0x37d LB: >> { %v3447_v63 = vld [vmem:[%s5741_s11] sm:$0xff]  ;;  %s3449_s20 = sadd.s32 1, %s5745_s7  ;;  %s3441_s8 = sadd.s32 1, %s5749_s8   ;;  %s5749_s8 = sphi %s5747_s8, %s3441_s8   ;;  %s5745_s7 = sphi %s5743_s7, %s5744_s7   ;;  %s5741_s11 = sphi %s5739_s11, %s3454_s11   ;;  %s5737_s26 = sphi %s5735_s26, %s3455_s26  }
 0x37e   : >> { %3448 = vst [vmem:[%s5737_s26] sm:$0xff] %v3447_v63  ;;  %p3450_p3 = scmp.ge.s32.totalorder %s3449_s20, %s7571_s9  ;;  %p3440_p4 = scmp.ge.s32.totalorder %s3441_s8, %s7571_s9 }
 0x380   : >> { %s7783_s20 = smov (%p3450_p3, %s3449_s20), 0  ;;  %3443 = sbr.rel (!%p3440_p4) target bundleno = 893 (0x37d), region = 260 }
 0x381   : >> { %s4990_s17 = sshll.u32 %s7783_s20, 3  ;;  %s5744_s7 = smov %s7783_s20  }
 0x382   : >> { %s3454_s11 = scalar_lea.vmem %s3435_s13, %s4990_s17 [#allocation3]   ;;  %s3455_s26 = scalar_lea.vmem %s3437_s12, %s4990_s17  }
 0x385 PF: > { %3458 = sbr.rel (%p3345_p6) target bundleno = 966 (0x3c6), region = 137  ;;  %s7583_s24 = ssub.s32 (!%p3345_p6), %s7447_s16, %s7452_s27 }
 0x386   : > { %s3464_s29 = sshrl.u32 (!%p3345_p6), %s7447_s16, 3  ;;  %s3461_s30 = scalar_lea.vmem (!%p3345_p6), %s7263_s18, %s7583_s24 [#allocation3] }
 0x387   : > { %s7592_s25 = sshrl.u32 (!%p3345_p6), %s3464_s29, 5 }
 0x388   : > { %p4992_p5 = scmp.le.s32.totalorder (!%p3345_p6), %s7592_s25, 0 }
 0x38a   : > { %3737 = sbr.rel (%p4992_p5) target bundleno = 944 (0x3b0), region = 265  ;;  %s7760_s15 = smov (!%p4992_p5), %s7445_s14 }
 0x38b   : > { %s7761_s9 = smov (!%p4992_p5), %s7263_s18  ;;  %s7601_s10 = smov (!%p4992_p5), 0  }
 0x38c   : > { %s7603_s13 = smov (!%p4992_p5), 0  }
 0x38f LB: >> { %v3475_v0 = vld [vmem:[%s5757_s9] sm:$0xff]  ;;  %v3477_v1 = vld [vmem:[%s5757_s9 + $0x8] sm:$0xff]  ;;  %v3479_v2 = vld [vmem:[%s5757_s9 + $0x10] sm:$0xff]  ;;  %s3539_s12 = sadd.s32 1, %s5761_s10  ;;  %s3469_s13 = sadd.s32 1, %s5765_s13   ;;  %s5765_s13 = sphi %s7603_s13, %s3469_s13   ;;  %s5761_s10 = sphi %s7601_s10, %s7764_s10   ;;  %s5757_s9 = sphi %s7761_s9, %s7763_s9   ;;  %s5753_s15 = sphi %s7760_s15, %s7762_s15  }
 0x390   : >> { %3476 = vst [vmem:[%s5753_s15] sm:$0xff] %v3475_v0  ;;  %v3481_v3 = vld [vmem:[%s5757_s9 + $0x18] sm:$0xff]  ;;  %p3540_p7 = scmp.ge.s32.totalorder %s3539_s12, %s7592_s25  ;;  %v3483_v5 = vld [vmem:[%s5757_s9 + $0x20] sm:$0xff]  ;;  %v3485_v6 = vld [vmem:[%s5757_s9 + $0x28] sm:$0xff]  ;;  %p3468_p8 = scmp.ge.s32.totalorder %s3469_s13, %s7592_s25 }
 0x391   : >> { %3478 = vst [vmem:[%s5753_s15 + $0x8] sm:$0xff] %v3477_v1  ;;  %v3487_v7 = vld [vmem:[%s5757_s9 + $0x30] sm:$0xff]  ;;  %v3489_v8 = vld [vmem:[%s5757_s9 + $0x38] sm:$0xff]  ;;  %v3491_v9 = vld [vmem:[%s5757_s9 + $0x40] sm:$0xff] }
 0x392   : >> { %3480 = vst [vmem:[%s5753_s15 + $0x10] sm:$0xff] %v3479_v2  ;;  %s7785_s12 = smov (%p3540_p7, %s3539_s12), 0  ;;  %v3493_v10 = vld [vmem:[%s5757_s9 + $0x48] sm:$0xff]  ;;  %v3495_v11 = vld [vmem:[%s5757_s9 + $0x50] sm:$0xff]  ;;  %v3497_v12 = vld [vmem:[%s5757_s9 + $0x58] sm:$0xff] }
 0x393   : >> { %3482 = vst [vmem:[%s5753_s15 + $0x18] sm:$0xff] %v3481_v3  ;;  %s4993_s26 = sshll.u32 %s7785_s12, 8  ;;  %v3499_v13 = vld [vmem:[%s5757_s9 + $0x60] sm:$0xff]  ;;  %v3501_v14 = vld [vmem:[%s5757_s9 + $0x68] sm:$0xff]  ;;  %v3503_v15 = vld [vmem:[%s5757_s9 + $0x70] sm:$0xff]  ;;  %s7764_s10 = smov %s7785_s12 }
 0x394   : >> { %3484 = vst [vmem:[%s5753_s15 + $0x20] sm:$0xff] %v3483_v5  ;;  %s7635_s11 = scalar_lea.vmem %s7263_s18, %s4993_s26 [#allocation3]   ;;  %s7638_s7 = scalar_lea.vmem %s7445_s14, %s4993_s26   ;;  %v3505_v16 = vld [vmem:[%s5757_s9 + $0x78] sm:$0xff]  ;;  %v3507_v17 = vld [vmem:[%s5757_s9 + $0x80] sm:$0xff]  ;;  %v3509_v18 = vld [vmem:[%s5757_s9 + $0x88] sm:$0xff] }
 0x395   : >> { %3486 = vst [vmem:[%s5753_s15 + $0x28] sm:$0xff] %v3485_v6  ;;  %v3511_v19 = vld [vmem:[%s5757_s9 + $0x90] sm:$0xff]  ;;  %v3513_v20 = vld [vmem:[%s5757_s9 + $0x98] sm:$0xff]  ;;  %v3515_v21 = vld [vmem:[%s5757_s9 + $0xa0] sm:$0xff] }
 0x396   : >> { %3488 = vst [vmem:[%s5753_s15 + $0x30] sm:$0xff] %v3487_v7  ;;  %v3517_v22 = vld [vmem:[%s5757_s9 + $0xa8] sm:$0xff]  ;;  %v3519_v23 = vld [vmem:[%s5757_s9 + $0xb0] sm:$0xff]  ;;  %v3521_v4 = vld [vmem:[%s5757_s9 + $0xb8] sm:$0xff] }
 0x397   : >> { %3490 = vst [vmem:[%s5753_s15 + $0x38] sm:$0xff] %v3489_v8  ;;  %v3523_v24 = vld [vmem:[%s5757_s9 + $0xc0] sm:$0xff]  ;;  %v3525_v25 = vld [vmem:[%s5757_s9 + $0xc8] sm:$0xff]  ;;  %v3527_v26 = vld [vmem:[%s5757_s9 + $0xd0] sm:$0xff] }
 0x398   : >> { %3492 = vst [vmem:[%s5753_s15 + $0x40] sm:$0xff] %v3491_v9  ;;  %v3529_v27 = vld [vmem:[%s5757_s9 + $0xd8] sm:$0xff]  ;;  %v3531_v28 = vld [vmem:[%s5757_s9 + $0xe0] sm:$0xff]  ;;  %v3533_v29 = vld [vmem:[%s5757_s9 + $0xe8] sm:$0xff] }
 0x399   : >> { %3494 = vst [vmem:[%s5753_s15 + $0x48] sm:$0xff] %v3493_v10  ;;  %v3535_v34 = vld [vmem:[%s5757_s9 + $0xf0] sm:$0xff]  ;;  %v3537_v35 = vld [vmem:[%s5757_s9 + $0xf8] sm:$0xff]  ;;  %s7763_s9 = smov %s7635_s11 }
 0x39a   : >> { %3496 = vst [vmem:[%s5753_s15 + $0x50] sm:$0xff] %v3495_v11 }
 0x39b   : >> { %3498 = vst [vmem:[%s5753_s15 + $0x58] sm:$0xff] %v3497_v12 }
 0x39c   : >> { %3500 = vst [vmem:[%s5753_s15 + $0x60] sm:$0xff] %v3499_v13 }
 0x39d   : >> { %3502 = vst [vmem:[%s5753_s15 + $0x68] sm:$0xff] %v3501_v14 }
 0x39e   : >> { %3504 = vst [vmem:[%s5753_s15 + $0x70] sm:$0xff] %v3503_v15 }
 0x39f   : >> { %3506 = vst [vmem:[%s5753_s15 + $0x78] sm:$0xff] %v3505_v16 }
 0x3a0   : >> { %3508 = vst [vmem:[%s5753_s15 + $0x80] sm:$0xff] %v3507_v17 }
 0x3a1   : >> { %3510 = vst [vmem:[%s5753_s15 + $0x88] sm:$0xff] %v3509_v18 }
 0x3a2   : >> { %3512 = vst [vmem:[%s5753_s15 + $0x90] sm:$0xff] %v3511_v19 }
 0x3a3   : >> { %3514 = vst [vmem:[%s5753_s15 + $0x98] sm:$0xff] %v3513_v20 }
 0x3a4   : >> { %3516 = vst [vmem:[%s5753_s15 + $0xa0] sm:$0xff] %v3515_v21 }
 0x3a5   : >> { %3518 = vst [vmem:[%s5753_s15 + $0xa8] sm:$0xff] %v3517_v22 }
 0x3a6   : >> { %3520 = vst [vmem:[%s5753_s15 + $0xb0] sm:$0xff] %v3519_v23 }
 0x3a7   : >> { %3522 = vst [vmem:[%s5753_s15 + $0xb8] sm:$0xff] %v3521_v4 }
 0x3a8   : >> { %3524 = vst [vmem:[%s5753_s15 + $0xc0] sm:$0xff] %v3523_v24 }
 0x3a9   : >> { %3526 = vst [vmem:[%s5753_s15 + $0xc8] sm:$0xff] %v3525_v25 }
 0x3aa   : >> { %3528 = vst [vmem:[%s5753_s15 + $0xd0] sm:$0xff] %v3527_v26 }
 0x3ab   : >> { %3530 = vst [vmem:[%s5753_s15 + $0xd8] sm:$0xff] %v3529_v27  ;;  %3471 = sbr.rel (!%p3468_p8) target bundleno = 911 (0x38f), region = 271 }
 0x3ac   : >> { %3532 = vst [vmem:[%s5753_s15 + $0xe0] sm:$0xff] %v3531_v28 }
 0x3ad   : >> { %3534 = vst [vmem:[%s5753_s15 + $0xe8] sm:$0xff] %v3533_v29 }
 0x3ae   : >> { %3536 = vst [vmem:[%s5753_s15 + $0xf0] sm:$0xff] %v3535_v34 }
 0x3af   : >> { %3538 = vst [vmem:[%s5753_s15 + $0xf8] sm:$0xff] %v3537_v35  ;;  %s7762_s15 = smov %s7638_s7 }
 0x3b0 PF: > { %s7704_s8 = sand.u32 31, %s3464_s29   ;;  %s5298_s20 = sshll.u32 %s7592_s25, 8 }
 0x3b1   : > { %s3550_s17 = scalar_lea.vmem %s7263_s18, %s5298_s20 [#allocation3]   ;;  %s3552_s26 = scalar_lea.vmem %s7445_s14, %s5298_s20  }
 0x3b2   : > { %p4998_p9 = scmp.le.s32.totalorder %s7704_s8, 0 }
 0x3b3   : > { %s5767_s11 = smov (!%p4998_p9), %s3552_s26   ;;  %s5771_s7 = smov (!%p4998_p9), %s3550_s17  }
 0x3b4   : > { %3751 = sbr.rel (%p4998_p9) target bundleno = 961 (0x3c1), region = 276  ;;  %s5775_s12 = smov (!%p4998_p9), 0  }
 0x3b5   : > { %s5779_s6 = smov (!%p4998_p9), 0  }
 0x3b9 LB: >> { %v3562_v36 = vld [vmem:[%s5773_s7] sm:$0xff]  ;;  %s3564_s29 = sadd.s32 1, %s5777_s12  ;;  %s3556_s6 = sadd.s32 1, %s5781_s6   ;;  %s5781_s6 = sphi %s5779_s6, %s3556_s6   ;;  %s5777_s12 = sphi %s5775_s12, %s5776_s12   ;;  %s5773_s7 = sphi %s5771_s7, %s3569_s7   ;;  %s5769_s11 = sphi %s5767_s11, %s3570_s11  }
 0x3ba   : >> { %3563 = vst [vmem:[%s5769_s11] sm:$0xff] %v3562_v36  ;;  %p3565_p10 = scmp.ge.s32.totalorder %s3564_s29, %s7704_s8  ;;  %p3555_p11 = scmp.ge.s32.totalorder %s3556_s6, %s7704_s8 }
 0x3bc   : >> { %s7787_s29 = smov (%p3565_p10, %s3564_s29), 0  ;;  %3558 = sbr.rel (!%p3555_p11) target bundleno = 953 (0x3b9), region = 282 }
 0x3bd   : >> { %s4999_s25 = sshll.u32 %s7787_s29, 3  ;;  %s5776_s12 = smov %s7787_s29  }
 0x3be   : >> { %s3569_s7 = scalar_lea.vmem %s3550_s17, %s4999_s25 [#allocation3]   ;;  %s3570_s11 = scalar_lea.vmem %s3552_s26, %s4999_s25  }
 0x3c1 PF: > { %s5789_s15 = smov 1   ;;  %s7765_s13 = scalar_lea.vmem %s7445_s14, %s7583_s24 }
 0x3c2   : > { %s3571_s9 = sshll.u32 %s5789_s15, %s7452_s27 }
 0x3c3   : > { %s5001_s10 = sadd.s32 4294967295, %s3571_s9 }
 0x3c4   : > { %v3581_v37 = vld [vmem:[%s3461_s30] sm:%s5001_s10] }
 0x3c5   : > { %3582 = vst [vmem:[%s7765_s13] sm:%s5001_s10] %v3581_v37 }
 0x3c6 PF: > { %p5002_p6 = scmp.ge.u32.totalorder %s7447_s16, 8 }
 0x3c7   : > { %s5790_s6 = smov (!%p5002_p6), 1  }
 0x3c8   : > { %3331 = sbr.rel (%p5002_p6) target bundleno = 975 (0x3cf), region = 108  ;;  %s3332_s8 = sshll.u32 (!%p5002_p6), %s5790_s6, %s7447_s16 }
 0x3c9   : > { %s5003_s20 = sadd.s32 (!%p5002_p6), 4294967295, %s3332_s8 }
 0x3cd   : > { %v3342_v38 = vld [vmem:[%s7263_s18] sm:%s5003_s20] }
 0x3ce   : > { %3343 = vst [vmem:[%s7445_s14] sm:%s5003_s20] %v3342_v38 }
 0x3cf PF: > { %s15_s22 = sadd.s32 1, %s5685_s22   ;;  %s7766_s18 = smov %s5673_s19 }
 0x3d0   : > { %p12_p12 = scmp.ge.s32.totalorder %s15_s22, 4   ;;  %s7767_s19 = smov %s5861_s28 }
 0x3d1   : > { %s7768_s20 = smov %s5681_s21  ;;  %s7769_s21 = smov %s7771_s23 }
 0x3d2   :  { %14 = sbr.rel (!%p12_p12) target bundleno = 3 (0x3), region = 293 }

</bundles_post_ra>
